<compile_context>
chip_gen: v6e
topology: v6e:2x2x1
jax: 0.10.0
libtpu: 0.0.40
codegen_flags: <defaults>
</compile_context>

<pallas_src>
import functools

import jax
import jax.numpy as jnp
from jax.experimental import pallas as pl
from jax.experimental.pallas import tpu as pltpu


# ------------------------------- fused kernel ------------------------------- #

def _stage_kernel(x_ref, w_ref, sh_ref, mask_ref, feats_ref, out_ref,
                  apad_ref, ypad_ref, *, H, W, C, bn, num_blocks, block_relu):
    """Fused Stage forward for `bn` images, channels-in-sublanes layout.

    x_ref:     (bn, C, NP)        zero-padded flat input, NP=(H+2)*(W+2)+2
    w_ref:     (num_blocks*18, C, C)  per-tap (Cout,Cin) weights, BN scale folded in
    sh_ref:    (num_blocks*2, C, 1)   folded BN shifts [ba, bb] per block
    mask_ref:  (1, H*(W+2))       1.0 on real pixels, 0.0 on the 2 wrap cols per row
    feats_ref: (bn, num_blocks, C, H*(W+2))   per-block features (junk cols stripped
                                              by the wrapper)
    out_ref:   (bn, C, H*(W+2))   final activation
    apad_ref / ypad_ref: VMEM padded-activation scratches (C, NP)
    """
    Wp = W + 2
    HWp = H * Wp          # conv-output lane layout: pixel (h,w) -> lane h*Wp + w
    OFF = Wp + 1          # flat lane of interior pixel (0,0) in the padded layout

    # ypad's never-written halo lanes must be zero; zero the whole scratch once per
    # grid step (~6 vreg stores).  apad is fully overwritten per image below.
    ypad_ref[...] = jnp.zeros_like(ypad_ref)

    mask = mask_ref[...]                                    # (1, HWp)

    def conv3x3(src_ref, w_base):
        """3x3 'same' conv: 9 shifted ref-slices x (C,C) MXU matmuls, f32 accum."""
        acc = jnp.zeros((C, HWp), jnp.float32)
        for dh in range(3):
            for dw in range(3):
                off = dh * Wp + dw
                patch = src_ref[:, off:off + HWp]           # (C, HWp) ref-slice load
                acc = acc + jnp.dot(w_ref[w_base + 3 * dh + dw], patch,
                                    preferred_element_type=jnp.float32)
        return acc

    for i in range(bn):
        # Padded input (zero halo + 2 slack lanes) -> activation scratch.
        apad_ref[...] = x_ref[i]

        for b in range(num_blocks):
            resid = apad_ref[:, OFF:OFF + HWp]              # block input, conv layout

            # conv_a (BN scale folded into weights) -> +shift -> ReLU
            ya = conv3x3(apad_ref, 18 * b)
            ya = jnp.maximum(ya + sh_ref[2 * b], 0.0)
            ypad_ref[:, OFF:OFF + HWp] = ya * mask          # keep halo cols zero

            # conv_b (BN scale folded) -> +shift -> + residual
            yb = conv3x3(ypad_ref, 18 * b + 9)
            feat = yb + sh_ref[2 * b + 1] + resid
            feats_ref[i, b] = feat                          # intermediary feature

            cur = jnp.maximum(feat, 0.0) if block_relu else feat
            if b + 1 < num_blocks:
                apad_ref[:, OFF:OFF + HWp] = cur * mask
            else:
                out_ref[i] = cur


# ------------------------------- Stage forward ------------------------------ #

def stage_forward(x_nchw, block_params, block_relu):
    """Mirrors Stage.forward: returns ([feat_0, ..., feat_{B-1}], x_final) in NCHW."""
    N, C, H, W = x_nchw.shape
    B = len(block_params)
    Wp, Hp = W + 2, H + 2
    HWp = H * Wp
    NP = Hp * Wp + 2   # +2 slack lanes so the (dh=2,dw=2) tap slice stays in-bounds

    # Zero-padded, flattened activations (NCHW kept): pixel (h,w) at lane (h+1)*Wp+(w+1).
    x_pad = jnp.pad(x_nchw, ((0, 0), (0, 0), (1, 1), (1, 1))).reshape(N, C, Hp * Wp)
    x_pad = jnp.pad(x_pad, ((0, 0), (0, 0), (0, 2)))

    # Fold eval-mode BN scale into the conv weights (HWIO -> per-tap (Cout,Cin));
    # keep the per-channel shifts as (C,1) column adds.
    w_chunks, sh_chunks = [], []
    for p in block_params:
        sa = p["sa"].reshape(C)
        sb = p["sb"].reshape(C)
        wa = jnp.transpose(p["wa"] * sa.reshape(1, 1, 1, C), (0, 1, 3, 2)).reshape(9, C, C)
        wb = jnp.transpose(p["wb"] * sb.reshape(1, 1, 1, C), (0, 1, 3, 2)).reshape(9, C, C)
        w_chunks += [wa, wb]
        sh_chunks += [p["ba"].reshape(C, 1), p["bb"].reshape(C, 1)]
    w_all = jnp.concatenate(w_chunks, axis=0)               # (B*18, C, C)
    sh_all = jnp.stack(sh_chunks, axis=0)                   # (B*2, C, 1)

    # Lane-validity mask for the conv-output layout (zeroes the 2 wrap cols per row).
    mask = (jnp.arange(HWp) % Wp < W).astype(jnp.float32).reshape(1, HWp)

    # Grid: 2 parallel steps when the batch splits evenly (fills both v7x TCs);
    # otherwise 1 step holding the whole batch (amortizes per-step overhead on
    # single-TensorCore v5e / v6e).
    G = 2 if (N >= 2 and N % 2 == 0) else 1
    bn = N // G

    feats, out = pl.pallas_call(
        functools.partial(_stage_kernel, H=H, W=W, C=C, bn=bn,
                          num_blocks=B, block_relu=block_relu),
        out_shape=(jax.ShapeDtypeStruct((N, B, C, HWp), jnp.float32),
                   jax.ShapeDtypeStruct((N, C, HWp), jnp.float32)),
        grid_spec=pltpu.PrefetchScalarGridSpec(
            num_scalar_prefetch=0,
            grid=(G,),
            in_specs=[
                pl.BlockSpec((bn, C, NP), lambda g: (g, 0, 0)),
                pl.BlockSpec((B * 18, C, C), lambda g: (0, 0, 0)),
                pl.BlockSpec((B * 2, C, 1), lambda g: (0, 0, 0)),
                pl.BlockSpec((1, HWp), lambda g: (0, 0)),
            ],
            out_specs=(
                pl.BlockSpec((bn, B, C, HWp), lambda g: (g, 0, 0, 0)),
                pl.BlockSpec((bn, C, HWp), lambda g: (g, 0, 0)),
            ),
            scratch_shapes=[
                pltpu.VMEM((C, NP), jnp.float32),
                pltpu.VMEM((C, NP), jnp.float32),
            ],
        ),
        compiler_params=pltpu.CompilerParams(dimension_semantics=("parallel",)),
    )(x_pad, w_all, sh_all, mask)

    # Strip the 2 junk columns per row (tiny XLA slice), already NCHW.
    feats = feats.reshape(N, B, C, H, Wp)[..., :W]          # (N, B, C, H, W)
    out = out.reshape(N, C, H, Wp)[..., :W]                 # (N, C, H, W)
    return [feats[:, b] for b in range(B)], out


# ------------------------------ pure-JAX reference --------------------------- #

def _ref_stage(x_nchw, block_params, block_relu):
    x = jnp.transpose(x_nchw, (0, 2, 3, 1))
    dn = ("NHWC", "HWIO", "NHWC")
    feats = []
    for p in block_params:
        y = jax.lax.conv_general_dilated(x, p["wa"], (1, 1), "SAME",
                                         dimension_numbers=dn)
        y = jnp.maximum(y * p["sa"] + p["ba"], 0.0)
        y = jax.lax.conv_general_dilated(y, p["wb"], (1, 1), "SAME",
                                         dimension_numbers=dn)
        feat = y * p["sb"] + p["bb"] + x
        feats.append(jnp.transpose(feat, (0, 3, 1, 2)))
        x = jnp.maximum(feat, 0.0) if block_relu else feat
    return feats, jnp.transpose(x, (0, 3, 1, 2))


# ------------------------------- parameter init ------------------------------ #

def _init_block_params(key, C):
    ks = jax.random.split(key, 10)

    def bn_affine(kg, kb, km, kv):
        gamma = 1.0 + 0.1 * jax.random.normal(kg, (C,), jnp.float32)
        beta = 0.05 * jax.random.normal(kb, (C,), jnp.float32)
        mean = 0.01 * jax.random.normal(km, (C,), jnp.float32)
        var = 0.9 + 0.2 * jax.random.uniform(kv, (C,), jnp.float32)
        scale = gamma * jax.lax.rsqrt(var + 1e-5)
        shift = beta - mean * scale
        return scale.reshape(1, C), shift.reshape(1, C)

    wa = 0.1 * jax.random.normal(ks[0], (3, 3, C, C), jnp.float32)  # HWIO
    wb = 0.1 * jax.random.normal(ks[1], (3, 3, C, C), jnp.float32)
    sa, ba = bn_affine(ks[2], ks[3], ks[4], ks[5])
    sb, bb = bn_affine(ks[6], ks[7], ks[8], ks[9])
    return {"wa": wa, "sa": sa, "ba": ba, "wb": wb, "sb": sb, "bb": bb}


# ------------------------------------ main ----------------------------------- #

if __name__ == "__main__":
    N, C, H, W = 2, 16, 16, 16
    NUM_BLOCKS = 2
    BLOCK_RELU = True

    root = jax.random.PRNGKey(0)
    kx, *kblocks = jax.random.split(root, 1 + NUM_BLOCKS)
    x = jax.random.normal(kx, (N, C, H, W), jnp.float32)          # NCHW input
    params = [_init_block_params(k, C) for k in kblocks]

    fwd = jax.jit(stage_forward, static_argnums=(2,))
    feats, x_out = fwd(x, params, BLOCK_RELU)
    x_out = jax.block_until_ready(x_out)
    feats = [jax.block_until_ready(f) for f in feats]

    ref_feats, ref_out = _ref_stage(x, params, BLOCK_RELU)
    assert len(feats) == NUM_BLOCKS
    for f, rf in zip(feats, ref_feats):
        assert f.shape == (N, C, H, W)
        assert jnp.allclose(f, rf, rtol=1e-4, atol=1e-4)
    assert jnp.allclose(x_out, ref_out, rtol=1e-4, atol=1e-4)

    print("KERNEL_OK")
</pallas_src>

<mosaic_0001>
module attributes {stable_mosaic.version = 11 : i64} {
  func.func @_stage_kernel(%arg0: i32, %arg1: memref<1x16x326xf32, #tpu.memory_space<vmem>>, %arg2: memref<36x16x16xf32, #tpu.memory_space<vmem>>, %arg3: memref<4x16x1xf32, #tpu.memory_space<vmem>>, %arg4: memref<1x288xf32, #tpu.memory_space<vmem>>, %arg5: memref<1x2x16x288xf32, #tpu.memory_space<vmem>>, %arg6: memref<1x16x288xf32, #tpu.memory_space<vmem>>, %arg7: memref<16x326xf32, #tpu.memory_space<vmem>>, %arg8: memref<16x326xf32, #tpu.memory_space<vmem>>) attributes {dimension_semantics = [#tpu.dimension_semantics<parallel>], iteration_bounds = array<i64: 2>, scalar_prefetch = 0 : i64, scratch_operands = 2 : i64, tpu.core_type = #tpu.core_type<tc>, window_params = [{transform_indices = @transform_0, window_bounds = array<i64: 1, 16, 326>}, {pipeline_mode = #tpu.pipeline_mode<synchronous>, transform_indices = @transform_1, window_bounds = array<i64: 36, 16, 16>}, {pipeline_mode = #tpu.pipeline_mode<synchronous>, transform_indices = @transform_2, window_bounds = array<i64: 4, 16, 1>}, {pipeline_mode = #tpu.pipeline_mode<synchronous>, transform_indices = @transform_3, window_bounds = array<i64: 1, 288>}, {transform_indices = @transform_4, window_bounds = array<i64: 1, 2, 16, 288>}, {transform_indices = @transform_5, window_bounds = array<i64: 1, 16, 288>}]} {
    %cst = arith.constant 0.000000e+00 : f32
    %0 = vector.broadcast %cst : f32 to vector<16x326xf32>
    %c0 = arith.constant 0 : index
    %c0_0 = arith.constant 0 : index
    %1 = vector.load %arg8[%c0, %c0_0] : memref<16x326xf32, #tpu.memory_space<vmem>>, vector<16x326xf32>
    tpu.vector_store %arg8[%c0, %c0_0], %0 {strides = array<i32>} : memref<16x326xf32, #tpu.memory_space<vmem>>, vector<16x326xf32>,
    %c0_1 = arith.constant 0 : index
    %c0_2 = arith.constant 0 : index
    %2 = vector.load %arg4[%c0_1, %c0_2] : memref<1x288xf32, #tpu.memory_space<vmem>>, vector<1x288xf32>
    %c0_3 = arith.constant 0 : index
    %c0_4 = arith.constant 0 : index
    %c0_5 = arith.constant 0 : index
    %3 = vector.load %arg1[%c0_3, %c0_4, %c0_5] : memref<1x16x326xf32, #tpu.memory_space<vmem>>, vector<1x16x326xf32>
    %4 = vector.shape_cast %3 : vector<1x16x326xf32> to vector<16x326xf32>
    %c0_6 = arith.constant 0 : index
    %c0_7 = arith.constant 0 : index
    %5 = vector.load %arg7[%c0_6, %c0_7] : memref<16x326xf32, #tpu.memory_space<vmem>>, vector<16x326xf32>
    tpu.vector_store %arg7[%c0_6, %c0_7], %4 {strides = array<i32>} : memref<16x326xf32, #tpu.memory_space<vmem>>, vector<16x326xf32>,
    %c0_8 = arith.constant 0 : index
    %c19 = arith.constant 19 : index
    %6 = vector.load %arg7[%c0_8, %c19] : memref<16x326xf32, #tpu.memory_space<vmem>>, vector<16x288xf32>
    %cst_9 = arith.constant 0.000000e+00 : f32
    %7 = vector.broadcast %cst_9 : f32 to vector<16x288xf32>
    %c0_10 = arith.constant 0 : index
    %c0_11 = arith.constant 0 : index
    %8 = vector.load %arg7[%c0_10, %c0_11] : memref<16x326xf32, #tpu.memory_space<vmem>>, vector<16x288xf32>
    %c0_12 = arith.constant 0 : index
    %c0_13 = arith.constant 0 : index
    %c0_14 = arith.constant 0 : index
    %9 = vector.load %arg2[%c0_12, %c0_13, %c0_14] : memref<36x16x16xf32, #tpu.memory_space<vmem>>, vector<1x16x16xf32>
    %10 = vector.shape_cast %9 : vector<1x16x16xf32> to vector<16x16xf32>
    %cst_15 = arith.constant dense<0.000000e+00> : vector<16x288xf32>
    %11 = tpu.matmul %10, %8, %cst_15 {dimension_numbers = #tpu.dot_dimension_numbers<[1], [0], [0], [1], [0, 0, 1, 1], [], []>} : vector<16x16xf32>, vector<16x288xf32>, vector<16x288xf32> -> vector<16x288xf32>
    %12 = arith.addf %7, %11 : vector<16x288xf32>
    %c0_16 = arith.constant 0 : index
    %c1 = arith.constant 1 : index
    %13 = vector.load %arg7[%c0_16, %c1] : memref<16x326xf32, #tpu.memory_space<vmem>>, vector<16x288xf32>
    %c1_17 = arith.constant 1 : index
    %c0_18 = arith.constant 0 : index
    %c0_19 = arith.constant 0 : index
    %14 = vector.load %arg2[%c1_17, %c0_18, %c0_19] : memref<36x16x16xf32, #tpu.memory_space<vmem>>, vector<1x16x16xf32>
    %15 = vector.shape_cast %14 : vector<1x16x16xf32> to vector<16x16xf32>
    %cst_20 = arith.constant dense<0.000000e+00> : vector<16x288xf32>
    %16 = tpu.matmul %15, %13, %cst_20 {dimension_numbers = #tpu.dot_dimension_numbers<[1], [0], [0], [1], [0, 0, 1, 1], [], []>} : vector<16x16xf32>, vector<16x288xf32>, vector<16x288xf32> -> vector<16x288xf32>
    %17 = arith.addf %12, %16 : vector<16x288xf32>
    %c0_21 = arith.constant 0 : index
    %c2 = arith.constant 2 : index
    %18 = vector.load %arg7[%c0_21, %c2] : memref<16x326xf32, #tpu.memory_space<vmem>>, vector<16x288xf32>
    %c2_22 = arith.constant 2 : index
    %c0_23 = arith.constant 0 : index
    %c0_24 = arith.constant 0 : index
    %19 = vector.load %arg2[%c2_22, %c0_23, %c0_24] : memref<36x16x16xf32, #tpu.memory_space<vmem>>, vector<1x16x16xf32>
    %20 = vector.shape_cast %19 : vector<1x16x16xf32> to vector<16x16xf32>
    %cst_25 = arith.constant dense<0.000000e+00> : vector<16x288xf32>
    %21 = tpu.matmul %20, %18, %cst_25 {dimension_numbers = #tpu.dot_dimension_numbers<[1], [0], [0], [1], [0, 0, 1, 1], [], []>} : vector<16x16xf32>, vector<16x288xf32>, vector<16x288xf32> -> vector<16x288xf32>
    %22 = arith.addf %17, %21 : vector<16x288xf32>
    %c0_26 = arith.constant 0 : index
    %c18 = arith.constant 18 : index
    %23 = vector.load %arg7[%c0_26, %c18] : memref<16x326xf32, #tpu.memory_space<vmem>>, vector<16x288xf32>
    %c3 = arith.constant 3 : index
    %c0_27 = arith.constant 0 : index
    %c0_28 = arith.constant 0 : index
    %24 = vector.load %arg2[%c3, %c0_27, %c0_28] : memref<36x16x16xf32, #tpu.memory_space<vmem>>, vector<1x16x16xf32>
    %25 = vector.shape_cast %24 : vector<1x16x16xf32> to vector<16x16xf32>
    %cst_29 = arith.constant dense<0.000000e+00> : vector<16x288xf32>
    %26 = tpu.matmul %25, %23, %cst_29 {dimension_numbers = #tpu.dot_dimension_numbers<[1], [0], [0], [1], [0, 0, 1, 1], [], []>} : vector<16x16xf32>, vector<16x288xf32>, vector<16x288xf32> -> vector<16x288xf32>
    %27 = arith.addf %22, %26 : vector<16x288xf32>
    %c0_30 = arith.constant 0 : index
    %c19_31 = arith.constant 19 : index
    %28 = vector.load %arg7[%c0_30, %c19_31] : memref<16x326xf32, #tpu.memory_space<vmem>>, vector<16x288xf32>
    %c4 = arith.constant 4 : index
    %c0_32 = arith.constant 0 : index
    %c0_33 = arith.constant 0 : index
    %29 = vector.load %arg2[%c4, %c0_32, %c0_33] : memref<36x16x16xf32, #tpu.memory_space<vmem>>, vector<1x16x16xf32>
    %30 = vector.shape_cast %29 : vector<1x16x16xf32> to vector<16x16xf32>
    %cst_34 = arith.constant dense<0.000000e+00> : vector<16x288xf32>
    %31 = tpu.matmul %30, %28, %cst_34 {dimension_numbers = #tpu.dot_dimension_numbers<[1], [0], [0], [1], [0, 0, 1, 1], [], []>} : vector<16x16xf32>, vector<16x288xf32>, vector<16x288xf32> -> vector<16x288xf32>
    %32 = arith.addf %27, %31 : vector<16x288xf32>
    %c0_35 = arith.constant 0 : index
    %c20 = arith.constant 20 : index
    %33 = vector.load %arg7[%c0_35, %c20] : memref<16x326xf32, #tpu.memory_space<vmem>>, vector<16x288xf32>
    %c5 = arith.constant 5 : index
    %c0_36 = arith.constant 0 : index
    %c0_37 = arith.constant 0 : index
    %34 = vector.load %arg2[%c5, %c0_36, %c0_37] : memref<36x16x16xf32, #tpu.memory_space<vmem>>, vector<1x16x16xf32>
    %35 = vector.shape_cast %34 : vector<1x16x16xf32> to vector<16x16xf32>
    %cst_38 = arith.constant dense<0.000000e+00> : vector<16x288xf32>
    %36 = tpu.matmul %35, %33, %cst_38 {dimension_numbers = #tpu.dot_dimension_numbers<[1], [0], [0], [1], [0, 0, 1, 1], [], []>} : vector<16x16xf32>, vector<16x288xf32>, vector<16x288xf32> -> vector<16x288xf32>
    %37 = arith.addf %32, %36 : vector<16x288xf32>
    %c0_39 = arith.constant 0 : index
    %c36 = arith.constant 36 : index
    %38 = vector.load %arg7[%c0_39, %c36] : memref<16x326xf32, #tpu.memory_space<vmem>>, vector<16x288xf32>
    %c6 = arith.constant 6 : index
    %c0_40 = arith.constant 0 : index
    %c0_41 = arith.constant 0 : index
    %39 = vector.load %arg2[%c6, %c0_40, %c0_41] : memref<36x16x16xf32, #tpu.memory_space<vmem>>, vector<1x16x16xf32>
    %40 = vector.shape_cast %39 : vector<1x16x16xf32> to vector<16x16xf32>
    %cst_42 = arith.constant dense<0.000000e+00> : vector<16x288xf32>
    %41 = tpu.matmul %40, %38, %cst_42 {dimension_numbers = #tpu.dot_dimension_numbers<[1], [0], [0], [1], [0, 0, 1, 1], [], []>} : vector<16x16xf32>, vector<16x288xf32>, vector<16x288xf32> -> vector<16x288xf32>
    %42 = arith.addf %37, %41 : vector<16x288xf32>
    %c0_43 = arith.constant 0 : index
    %c37 = arith.constant 37 : index
    %43 = vector.load %arg7[%c0_43, %c37] : memref<16x326xf32, #tpu.memory_space<vmem>>, vector<16x288xf32>
    %c7 = arith.constant 7 : index
    %c0_44 = arith.constant 0 : index
    %c0_45 = arith.constant 0 : index
    %44 = vector.load %arg2[%c7, %c0_44, %c0_45] : memref<36x16x16xf32, #tpu.memory_space<vmem>>, vector<1x16x16xf32>
    %45 = vector.shape_cast %44 : vector<1x16x16xf32> to vector<16x16xf32>
    %cst_46 = arith.constant dense<0.000000e+00> : vector<16x288xf32>
    %46 = tpu.matmul %45, %43, %cst_46 {dimension_numbers = #tpu.dot_dimension_numbers<[1], [0], [0], [1], [0, 0, 1, 1], [], []>} : vector<16x16xf32>, vector<16x288xf32>, vector<16x288xf32> -> vector<16x288xf32>
    %47 = arith.addf %42, %46 : vector<16x288xf32>
    %c0_47 = arith.constant 0 : index
    %c38 = arith.constant 38 : index
    %48 = vector.load %arg7[%c0_47, %c38] : memref<16x326xf32, #tpu.memory_space<vmem>>, vector<16x288xf32>
    %c8 = arith.constant 8 : index
    %c0_48 = arith.constant 0 : index
    %c0_49 = arith.constant 0 : index
    %49 = vector.load %arg2[%c8, %c0_48, %c0_49] : memref<36x16x16xf32, #tpu.memory_space<vmem>>, vector<1x16x16xf32>
    %50 = vector.shape_cast %49 : vector<1x16x16xf32> to vector<16x16xf32>
    %cst_50 = arith.constant dense<0.000000e+00> : vector<16x288xf32>
    %51 = tpu.matmul %50, %48, %cst_50 {dimension_numbers = #tpu.dot_dimension_numbers<[1], [0], [0], [1], [0, 0, 1, 1], [], []>} : vector<16x16xf32>, vector<16x288xf32>, vector<16x288xf32> -> vector<16x288xf32>
    %52 = arith.addf %47, %51 : vector<16x288xf32>
    %c0_51 = arith.constant 0 : index
    %c0_52 = arith.constant 0 : index
    %c0_53 = arith.constant 0 : index
    %53 = vector.load %arg3[%c0_51, %c0_52, %c0_53] : memref<4x16x1xf32, #tpu.memory_space<vmem>>, vector<1x16x1xf32>
    %54 = vector.shape_cast %53 : vector<1x16x1xf32> to vector<16x1xf32>
    %55 = vector.broadcast %54 : vector<16x1xf32> to vector<16x288xf32>
    %56 = arith.addf %52, %55 : vector<16x288xf32>
    %cst_54 = arith.constant 0.000000e+00 : f32
    %57 = vector.broadcast %cst_54 : f32 to vector<16x288xf32>
    %58 = arith.maximumf %56, %57 : vector<16x288xf32>
    %59 = vector.broadcast %2 : vector<1x288xf32> to vector<16x288xf32>
    %60 = arith.mulf %58, %59 : vector<16x288xf32>
    %c0_55 = arith.constant 0 : index
    %c19_56 = arith.constant 19 : index
    %61 = vector.load %arg8[%c0_55, %c19_56] : memref<16x326xf32, #tpu.memory_space<vmem>>, vector<16x288xf32>
    tpu.vector_store %arg8[%c0_55, %c19_56], %60 {strides = array<i32>} : memref<16x326xf32, #tpu.memory_space<vmem>>, vector<16x288xf32>,
    %cst_57 = arith.constant 0.000000e+00 : f32
    %62 = vector.broadcast %cst_57 : f32 to vector<16x288xf32>
    %c0_58 = arith.constant 0 : index
    %c0_59 = arith.constant 0 : index
    %63 = vector.load %arg8[%c0_58, %c0_59] : memref<16x326xf32, #tpu.memory_space<vmem>>, vector<16x288xf32>
    %c9 = arith.constant 9 : index
    %c0_60 = arith.constant 0 : index
    %c0_61 = arith.constant 0 : index
    %64 = vector.load %arg2[%c9, %c0_60, %c0_61] : memref<36x16x16xf32, #tpu.memory_space<vmem>>, vector<1x16x16xf32>
    %65 = vector.shape_cast %64 : vector<1x16x16xf32> to vector<16x16xf32>
    %cst_62 = arith.constant dense<0.000000e+00> : vector<16x288xf32>
    %66 = tpu.matmul %65, %63, %cst_62 {dimension_numbers = #tpu.dot_dimension_numbers<[1], [0], [0], [1], [0, 0, 1, 1], [], []>} : vector<16x16xf32>, vector<16x288xf32>, vector<16x288xf32> -> vector<16x288xf32>
    %67 = arith.addf %62, %66 : vector<16x288xf32>
    %c0_63 = arith.constant 0 : index
    %c1_64 = arith.constant 1 : index
    %68 = vector.load %arg8[%c0_63, %c1_64] : memref<16x326xf32, #tpu.memory_space<vmem>>, vector<16x288xf32>
    %c10 = arith.constant 10 : index
    %c0_65 = arith.constant 0 : index
    %c0_66 = arith.constant 0 : index
    %69 = vector.load %arg2[%c10, %c0_65, %c0_66] : memref<36x16x16xf32, #tpu.memory_space<vmem>>, vector<1x16x16xf32>
    %70 = vector.shape_cast %69 : vector<1x16x16xf32> to vector<16x16xf32>
    %cst_67 = arith.constant dense<0.000000e+00> : vector<16x288xf32>
    %71 = tpu.matmul %70, %68, %cst_67 {dimension_numbers = #tpu.dot_dimension_numbers<[1], [0], [0], [1], [0, 0, 1, 1], [], []>} : vector<16x16xf32>, vector<16x288xf32>, vector<16x288xf32> -> vector<16x288xf32>
    %72 = arith.addf %67, %71 : vector<16x288xf32>
    %c0_68 = arith.constant 0 : index
    %c2_69 = arith.constant 2 : index
    %73 = vector.load %arg8[%c0_68, %c2_69] : memref<16x326xf32, #tpu.memory_space<vmem>>, vector<16x288xf32>
    %c11 = arith.constant 11 : index
    %c0_70 = arith.constant 0 : index
    %c0_71 = arith.constant 0 : index
    %74 = vector.load %arg2[%c11, %c0_70, %c0_71] : memref<36x16x16xf32, #tpu.memory_space<vmem>>, vector<1x16x16xf32>
    %75 = vector.shape_cast %74 : vector<1x16x16xf32> to vector<16x16xf32>
    %cst_72 = arith.constant dense<0.000000e+00> : vector<16x288xf32>
    %76 = tpu.matmul %75, %73, %cst_72 {dimension_numbers = #tpu.dot_dimension_numbers<[1], [0], [0], [1], [0, 0, 1, 1], [], []>} : vector<16x16xf32>, vector<16x288xf32>, vector<16x288xf32> -> vector<16x288xf32>
    %77 = arith.addf %72, %76 : vector<16x288xf32>
    %c0_73 = arith.constant 0 : index
    %c18_74 = arith.constant 18 : index
    %78 = vector.load %arg8[%c0_73, %c18_74] : memref<16x326xf32, #tpu.memory_space<vmem>>, vector<16x288xf32>
    %c12 = arith.constant 12 : index
    %c0_75 = arith.constant 0 : index
    %c0_76 = arith.constant 0 : index
    %79 = vector.load %arg2[%c12, %c0_75, %c0_76] : memref<36x16x16xf32, #tpu.memory_space<vmem>>, vector<1x16x16xf32>
    %80 = vector.shape_cast %79 : vector<1x16x16xf32> to vector<16x16xf32>
    %cst_77 = arith.constant dense<0.000000e+00> : vector<16x288xf32>
    %81 = tpu.matmul %80, %78, %cst_77 {dimension_numbers = #tpu.dot_dimension_numbers<[1], [0], [0], [1], [0, 0, 1, 1], [], []>} : vector<16x16xf32>, vector<16x288xf32>, vector<16x288xf32> -> vector<16x288xf32>
    %82 = arith.addf %77, %81 : vector<16x288xf32>
    %c0_78 = arith.constant 0 : index
    %c19_79 = arith.constant 19 : index
    %83 = vector.load %arg8[%c0_78, %c19_79] : memref<16x326xf32, #tpu.memory_space<vmem>>, vector<16x288xf32>
    %c13 = arith.constant 13 : index
    %c0_80 = arith.constant 0 : index
    %c0_81 = arith.constant 0 : index
    %84 = vector.load %arg2[%c13, %c0_80, %c0_81] : memref<36x16x16xf32, #tpu.memory_space<vmem>>, vector<1x16x16xf32>
    %85 = vector.shape_cast %84 : vector<1x16x16xf32> to vector<16x16xf32>
    %cst_82 = arith.constant dense<0.000000e+00> : vector<16x288xf32>
    %86 = tpu.matmul %85, %83, %cst_82 {dimension_numbers = #tpu.dot_dimension_numbers<[1], [0], [0], [1], [0, 0, 1, 1], [], []>} : vector<16x16xf32>, vector<16x288xf32>, vector<16x288xf32> -> vector<16x288xf32>
    %87 = arith.addf %82, %86 : vector<16x288xf32>
    %c0_83 = arith.constant 0 : index
    %c20_84 = arith.constant 20 : index
    %88 = vector.load %arg8[%c0_83, %c20_84] : memref<16x326xf32, #tpu.memory_space<vmem>>, vector<16x288xf32>
    %c14 = arith.constant 14 : index
    %c0_85 = arith.constant 0 : index
    %c0_86 = arith.constant 0 : index
    %89 = vector.load %arg2[%c14, %c0_85, %c0_86] : memref<36x16x16xf32, #tpu.memory_space<vmem>>, vector<1x16x16xf32>
    %90 = vector.shape_cast %89 : vector<1x16x16xf32> to vector<16x16xf32>
    %cst_87 = arith.constant dense<0.000000e+00> : vector<16x288xf32>
    %91 = tpu.matmul %90, %88, %cst_87 {dimension_numbers = #tpu.dot_dimension_numbers<[1], [0], [0], [1], [0, 0, 1, 1], [], []>} : vector<16x16xf32>, vector<16x288xf32>, vector<16x288xf32> -> vector<16x288xf32>
    %92 = arith.addf %87, %91 : vector<16x288xf32>
    %c0_88 = arith.constant 0 : index
    %c36_89 = arith.constant 36 : index
    %93 = vector.load %arg8[%c0_88, %c36_89] : memref<16x326xf32, #tpu.memory_space<vmem>>, vector<16x288xf32>
    %c15 = arith.constant 15 : index
    %c0_90 = arith.constant 0 : index
    %c0_91 = arith.constant 0 : index
    %94 = vector.load %arg2[%c15, %c0_90, %c0_91] : memref<36x16x16xf32, #tpu.memory_space<vmem>>, vector<1x16x16xf32>
    %95 = vector.shape_cast %94 : vector<1x16x16xf32> to vector<16x16xf32>
    %cst_92 = arith.constant dense<0.000000e+00> : vector<16x288xf32>
    %96 = tpu.matmul %95, %93, %cst_92 {dimension_numbers = #tpu.dot_dimension_numbers<[1], [0], [0], [1], [0, 0, 1, 1], [], []>} : vector<16x16xf32>, vector<16x288xf32>, vector<16x288xf32> -> vector<16x288xf32>
    %97 = arith.addf %92, %96 : vector<16x288xf32>
    %c0_93 = arith.constant 0 : index
    %c37_94 = arith.constant 37 : index
    %98 = vector.load %arg8[%c0_93, %c37_94] : memref<16x326xf32, #tpu.memory_space<vmem>>, vector<16x288xf32>
    %c16 = arith.constant 16 : index
    %c0_95 = arith.constant 0 : index
    %c0_96 = arith.constant 0 : index
    %99 = vector.load %arg2[%c16, %c0_95, %c0_96] : memref<36x16x16xf32, #tpu.memory_space<vmem>>, vector<1x16x16xf32>
    %100 = vector.shape_cast %99 : vector<1x16x16xf32> to vector<16x16xf32>
    %cst_97 = arith.constant dense<0.000000e+00> : vector<16x288xf32>
    %101 = tpu.matmul %100, %98, %cst_97 {dimension_numbers = #tpu.dot_dimension_numbers<[1], [0], [0], [1], [0, 0, 1, 1], [], []>} : vector<16x16xf32>, vector<16x288xf32>, vector<16x288xf32> -> vector<16x288xf32>
    %102 = arith.addf %97, %101 : vector<16x288xf32>
    %c0_98 = arith.constant 0 : index
    %c38_99 = arith.constant 38 : index
    %103 = vector.load %arg8[%c0_98, %c38_99] : memref<16x326xf32, #tpu.memory_space<vmem>>, vector<16x288xf32>
    %c17 = arith.constant 17 : index
    %c0_100 = arith.constant 0 : index
    %c0_101 = arith.constant 0 : index
    %104 = vector.load %arg2[%c17, %c0_100, %c0_101] : memref<36x16x16xf32, #tpu.memory_space<vmem>>, vector<1x16x16xf32>
    %105 = vector.shape_cast %104 : vector<1x16x16xf32> to vector<16x16xf32>
    %cst_102 = arith.constant dense<0.000000e+00> : vector<16x288xf32>
    %106 = tpu.matmul %105, %103, %cst_102 {dimension_numbers = #tpu.dot_dimension_numbers<[1], [0], [0], [1], [0, 0, 1, 1], [], []>} : vector<16x16xf32>, vector<16x288xf32>, vector<16x288xf32> -> vector<16x288xf32>
    %107 = arith.addf %102, %106 : vector<16x288xf32>
    %c1_103 = arith.constant 1 : index
    %c0_104 = arith.constant 0 : index
    %c0_105 = arith.constant 0 : index
    %108 = vector.load %arg3[%c1_103, %c0_104, %c0_105] : memref<4x16x1xf32, #tpu.memory_space<vmem>>, vector<1x16x1xf32>
    %109 = vector.shape_cast %108 : vector<1x16x1xf32> to vector<16x1xf32>
    %110 = vector.broadcast %109 : vector<16x1xf32> to vector<16x288xf32>
    %111 = arith.addf %107, %110 : vector<16x288xf32>
    %112 = arith.addf %111, %6 : vector<16x288xf32>
    %c0_106 = arith.constant 0 : index
    %c0_107 = arith.constant 0 : index
    %c0_108 = arith.constant 0 : index
    %c0_109 = arith.constant 0 : index
    %113 = vector.load %arg5[%c0_106, %c0_107, %c0_108, %c0_109] : memref<1x2x16x288xf32, #tpu.memory_space<vmem>>, vector<1x1x16x288xf32>
    %114 = vector.shape_cast %113 : vector<1x1x16x288xf32> to vector<16x288xf32>
    %115 = vector.shape_cast %112 : vector<16x288xf32> to vector<1x1x16x288xf32>
    tpu.vector_store %arg5[%c0_106, %c0_107, %c0_108, %c0_109], %115 {strides = array<i32>} : memref<1x2x16x288xf32, #tpu.memory_space<vmem>>, vector<1x1x16x288xf32>,
    %cst_110 = arith.constant 0.000000e+00 : f32
    %116 = vector.broadcast %cst_110 : f32 to vector<16x288xf32>
    %117 = arith.maximumf %112, %116 : vector<16x288xf32>
    %118 = vector.broadcast %2 : vector<1x288xf32> to vector<16x288xf32>
    %119 = arith.mulf %117, %118 : vector<16x288xf32>
    %c0_111 = arith.constant 0 : index
    %c19_112 = arith.constant 19 : index
    %120 = vector.load %arg7[%c0_111, %c19_112] : memref<16x326xf32, #tpu.memory_space<vmem>>, vector<16x288xf32>
    tpu.vector_store %arg7[%c0_111, %c19_112], %119 {strides = array<i32>} : memref<16x326xf32, #tpu.memory_space<vmem>>, vector<16x288xf32>,
    %c0_113 = arith.constant 0 : index
    %c19_114 = arith.constant 19 : index
    %121 = vector.load %arg7[%c0_113, %c19_114] : memref<16x326xf32, #tpu.memory_space<vmem>>, vector<16x288xf32>
    %cst_115 = arith.constant 0.000000e+00 : f32
    %122 = vector.broadcast %cst_115 : f32 to vector<16x288xf32>
    %c0_116 = arith.constant 0 : index
    %c0_117 = arith.constant 0 : index
    %123 = vector.load %arg7[%c0_116, %c0_117] : memref<16x326xf32, #tpu.memory_space<vmem>>, vector<16x288xf32>
    %c18_118 = arith.constant 18 : index
    %c0_119 = arith.constant 0 : index
    %c0_120 = arith.constant 0 : index
    %124 = vector.load %arg2[%c18_118, %c0_119, %c0_120] : memref<36x16x16xf32, #tpu.memory_space<vmem>>, vector<1x16x16xf32>
    %125 = vector.shape_cast %124 : vector<1x16x16xf32> to vector<16x16xf32>
    %cst_121 = arith.constant dense<0.000000e+00> : vector<16x288xf32>
    %126 = tpu.matmul %125, %123, %cst_121 {dimension_numbers = #tpu.dot_dimension_numbers<[1], [0], [0], [1], [0, 0, 1, 1], [], []>} : vector<16x16xf32>, vector<16x288xf32>, vector<16x288xf32> -> vector<16x288xf32>
    %127 = arith.addf %122, %126 : vector<16x288xf32>
    %c0_122 = arith.constant 0 : index
    %c1_123 = arith.constant 1 : index
    %128 = vector.load %arg7[%c0_122, %c1_123] : memref<16x326xf32, #tpu.memory_space<vmem>>, vector<16x288xf32>
    %c19_124 = arith.constant 19 : index
    %c0_125 = arith.constant 0 : index
    %c0_126 = arith.constant 0 : index
    %129 = vector.load %arg2[%c19_124, %c0_125, %c0_126] : memref<36x16x16xf32, #tpu.memory_space<vmem>>, vector<1x16x16xf32>
    %130 = vector.shape_cast %129 : vector<1x16x16xf32> to vector<16x16xf32>
    %cst_127 = arith.constant dense<0.000000e+00> : vector<16x288xf32>
    %131 = tpu.matmul %130, %128, %cst_127 {dimension_numbers = #tpu.dot_dimension_numbers<[1], [0], [0], [1], [0, 0, 1, 1], [], []>} : vector<16x16xf32>, vector<16x288xf32>, vector<16x288xf32> -> vector<16x288xf32>
    %132 = arith.addf %127, %131 : vector<16x288xf32>
    %c0_128 = arith.constant 0 : index
    %c2_129 = arith.constant 2 : index
    %133 = vector.load %arg7[%c0_128, %c2_129] : memref<16x326xf32, #tpu.memory_space<vmem>>, vector<16x288xf32>
    %c20_130 = arith.constant 20 : index
    %c0_131 = arith.constant 0 : index
    %c0_132 = arith.constant 0 : index
    %134 = vector.load %arg2[%c20_130, %c0_131, %c0_132] : memref<36x16x16xf32, #tpu.memory_space<vmem>>, vector<1x16x16xf32>
    %135 = vector.shape_cast %134 : vector<1x16x16xf32> to vector<16x16xf32>
    %cst_133 = arith.constant dense<0.000000e+00> : vector<16x288xf32>
    %136 = tpu.matmul %135, %133, %cst_133 {dimension_numbers = #tpu.dot_dimension_numbers<[1], [0], [0], [1], [0, 0, 1, 1], [], []>} : vector<16x16xf32>, vector<16x288xf32>, vector<16x288xf32> -> vector<16x288xf32>
    %137 = arith.addf %132, %136 : vector<16x288xf32>
    %c0_134 = arith.constant 0 : index
    %c18_135 = arith.constant 18 : index
    %138 = vector.load %arg7[%c0_134, %c18_135] : memref<16x326xf32, #tpu.memory_space<vmem>>, vector<16x288xf32>
    %c21 = arith.constant 21 : index
    %c0_136 = arith.constant 0 : index
    %c0_137 = arith.constant 0 : index
    %139 = vector.load %arg2[%c21, %c0_136, %c0_137] : memref<36x16x16xf32, #tpu.memory_space<vmem>>, vector<1x16x16xf32>
    %140 = vector.shape_cast %139 : vector<1x16x16xf32> to vector<16x16xf32>
    %cst_138 = arith.constant dense<0.000000e+00> : vector<16x288xf32>
    %141 = tpu.matmul %140, %138, %cst_138 {dimension_numbers = #tpu.dot_dimension_numbers<[1], [0], [0], [1], [0, 0, 1, 1], [], []>} : vector<16x16xf32>, vector<16x288xf32>, vector<16x288xf32> -> vector<16x288xf32>
    %142 = arith.addf %137, %141 : vector<16x288xf32>
    %c0_139 = arith.constant 0 : index
    %c19_140 = arith.constant 19 : index
    %143 = vector.load %arg7[%c0_139, %c19_140] : memref<16x326xf32, #tpu.memory_space<vmem>>, vector<16x288xf32>
    %c22 = arith.constant 22 : index
    %c0_141 = arith.constant 0 : index
    %c0_142 = arith.constant 0 : index
    %144 = vector.load %arg2[%c22, %c0_141, %c0_142] : memref<36x16x16xf32, #tpu.memory_space<vmem>>, vector<1x16x16xf32>
    %145 = vector.shape_cast %144 : vector<1x16x16xf32> to vector<16x16xf32>
    %cst_143 = arith.constant dense<0.000000e+00> : vector<16x288xf32>
    %146 = tpu.matmul %145, %143, %cst_143 {dimension_numbers = #tpu.dot_dimension_numbers<[1], [0], [0], [1], [0, 0, 1, 1], [], []>} : vector<16x16xf32>, vector<16x288xf32>, vector<16x288xf32> -> vector<16x288xf32>
    %147 = arith.addf %142, %146 : vector<16x288xf32>
    %c0_144 = arith.constant 0 : index
    %c20_145 = arith.constant 20 : index
    %148 = vector.load %arg7[%c0_144, %c20_145] : memref<16x326xf32, #tpu.memory_space<vmem>>, vector<16x288xf32>
    %c23 = arith.constant 23 : index
    %c0_146 = arith.constant 0 : index
    %c0_147 = arith.constant 0 : index
    %149 = vector.load %arg2[%c23, %c0_146, %c0_147] : memref<36x16x16xf32, #tpu.memory_space<vmem>>, vector<1x16x16xf32>
    %150 = vector.shape_cast %149 : vector<1x16x16xf32> to vector<16x16xf32>
    %cst_148 = arith.constant dense<0.000000e+00> : vector<16x288xf32>
    %151 = tpu.matmul %150, %148, %cst_148 {dimension_numbers = #tpu.dot_dimension_numbers<[1], [0], [0], [1], [0, 0, 1, 1], [], []>} : vector<16x16xf32>, vector<16x288xf32>, vector<16x288xf32> -> vector<16x288xf32>
    %152 = arith.addf %147, %151 : vector<16x288xf32>
    %c0_149 = arith.constant 0 : index
    %c36_150 = arith.constant 36 : index
    %153 = vector.load %arg7[%c0_149, %c36_150] : memref<16x326xf32, #tpu.memory_space<vmem>>, vector<16x288xf32>
    %c24 = arith.constant 24 : index
    %c0_151 = arith.constant 0 : index
    %c0_152 = arith.constant 0 : index
    %154 = vector.load %arg2[%c24, %c0_151, %c0_152] : memref<36x16x16xf32, #tpu.memory_space<vmem>>, vector<1x16x16xf32>
    %155 = vector.shape_cast %154 : vector<1x16x16xf32> to vector<16x16xf32>
    %cst_153 = arith.constant dense<0.000000e+00> : vector<16x288xf32>
    %156 = tpu.matmul %155, %153, %cst_153 {dimension_numbers = #tpu.dot_dimension_numbers<[1], [0], [0], [1], [0, 0, 1, 1], [], []>} : vector<16x16xf32>, vector<16x288xf32>, vector<16x288xf32> -> vector<16x288xf32>
    %157 = arith.addf %152, %156 : vector<16x288xf32>
    %c0_154 = arith.constant 0 : index
    %c37_155 = arith.constant 37 : index
    %158 = vector.load %arg7[%c0_154, %c37_155] : memref<16x326xf32, #tpu.memory_space<vmem>>, vector<16x288xf32>
    %c25 = arith.constant 25 : index
    %c0_156 = arith.constant 0 : index
    %c0_157 = arith.constant 0 : index
    %159 = vector.load %arg2[%c25, %c0_156, %c0_157] : memref<36x16x16xf32, #tpu.memory_space<vmem>>, vector<1x16x16xf32>
    %160 = vector.shape_cast %159 : vector<1x16x16xf32> to vector<16x16xf32>
    %cst_158 = arith.constant dense<0.000000e+00> : vector<16x288xf32>
    %161 = tpu.matmul %160, %158, %cst_158 {dimension_numbers = #tpu.dot_dimension_numbers<[1], [0], [0], [1], [0, 0, 1, 1], [], []>} : vector<16x16xf32>, vector<16x288xf32>, vector<16x288xf32> -> vector<16x288xf32>
    %162 = arith.addf %157, %161 : vector<16x288xf32>
    %c0_159 = arith.constant 0 : index
    %c38_160 = arith.constant 38 : index
    %163 = vector.load %arg7[%c0_159, %c38_160] : memref<16x326xf32, #tpu.memory_space<vmem>>, vector<16x288xf32>
    %c26 = arith.constant 26 : index
    %c0_161 = arith.constant 0 : index
    %c0_162 = arith.constant 0 : index
    %164 = vector.load %arg2[%c26, %c0_161, %c0_162] : memref<36x16x16xf32, #tpu.memory_space<vmem>>, vector<1x16x16xf32>
    %165 = vector.shape_cast %164 : vector<1x16x16xf32> to vector<16x16xf32>
    %cst_163 = arith.constant dense<0.000000e+00> : vector<16x288xf32>
    %166 = tpu.matmul %165, %163, %cst_163 {dimension_numbers = #tpu.dot_dimension_numbers<[1], [0], [0], [1], [0, 0, 1, 1], [], []>} : vector<16x16xf32>, vector<16x288xf32>, vector<16x288xf32> -> vector<16x288xf32>
    %167 = arith.addf %162, %166 : vector<16x288xf32>
    %c2_164 = arith.constant 2 : index
    %c0_165 = arith.constant 0 : index
    %c0_166 = arith.constant 0 : index
    %168 = vector.load %arg3[%c2_164, %c0_165, %c0_166] : memref<4x16x1xf32, #tpu.memory_space<vmem>>, vector<1x16x1xf32>
    %169 = vector.shape_cast %168 : vector<1x16x1xf32> to vector<16x1xf32>
    %170 = vector.broadcast %169 : vector<16x1xf32> to vector<16x288xf32>
    %171 = arith.addf %167, %170 : vector<16x288xf32>
    %cst_167 = arith.constant 0.000000e+00 : f32
    %172 = vector.broadcast %cst_167 : f32 to vector<16x288xf32>
    %173 = arith.maximumf %171, %172 : vector<16x288xf32>
    %174 = vector.broadcast %2 : vector<1x288xf32> to vector<16x288xf32>
    %175 = arith.mulf %173, %174 : vector<16x288xf32>
    %c0_168 = arith.constant 0 : index
    %c19_169 = arith.constant 19 : index
    %176 = vector.load %arg8[%c0_168, %c19_169] : memref<16x326xf32, #tpu.memory_space<vmem>>, vector<16x288xf32>
    tpu.vector_store %arg8[%c0_168, %c19_169], %175 {strides = array<i32>} : memref<16x326xf32, #tpu.memory_space<vmem>>, vector<16x288xf32>,
    %cst_170 = arith.constant 0.000000e+00 : f32
    %177 = vector.broadcast %cst_170 : f32 to vector<16x288xf32>
    %c0_171 = arith.constant 0 : index
    %c0_172 = arith.constant 0 : index
    %178 = vector.load %arg8[%c0_171, %c0_172] : memref<16x326xf32, #tpu.memory_space<vmem>>, vector<16x288xf32>
    %c27 = arith.constant 27 : index
    %c0_173 = arith.constant 0 : index
    %c0_174 = arith.constant 0 : index
    %179 = vector.load %arg2[%c27, %c0_173, %c0_174] : memref<36x16x16xf32, #tpu.memory_space<vmem>>, vector<1x16x16xf32>
    %180 = vector.shape_cast %179 : vector<1x16x16xf32> to vector<16x16xf32>
    %cst_175 = arith.constant dense<0.000000e+00> : vector<16x288xf32>
    %181 = tpu.matmul %180, %178, %cst_175 {dimension_numbers = #tpu.dot_dimension_numbers<[1], [0], [0], [1], [0, 0, 1, 1], [], []>} : vector<16x16xf32>, vector<16x288xf32>, vector<16x288xf32> -> vector<16x288xf32>
    %182 = arith.addf %177, %181 : vector<16x288xf32>
    %c0_176 = arith.constant 0 : index
    %c1_177 = arith.constant 1 : index
    %183 = vector.load %arg8[%c0_176, %c1_177] : memref<16x326xf32, #tpu.memory_space<vmem>>, vector<16x288xf32>
    %c28 = arith.constant 28 : index
    %c0_178 = arith.constant 0 : index
    %c0_179 = arith.constant 0 : index
    %184 = vector.load %arg2[%c28, %c0_178, %c0_179] : memref<36x16x16xf32, #tpu.memory_space<vmem>>, vector<1x16x16xf32>
    %185 = vector.shape_cast %184 : vector<1x16x16xf32> to vector<16x16xf32>
    %cst_180 = arith.constant dense<0.000000e+00> : vector<16x288xf32>
    %186 = tpu.matmul %185, %183, %cst_180 {dimension_numbers = #tpu.dot_dimension_numbers<[1], [0], [0], [1], [0, 0, 1, 1], [], []>} : vector<16x16xf32>, vector<16x288xf32>, vector<16x288xf32> -> vector<16x288xf32>
    %187 = arith.addf %182, %186 : vector<16x288xf32>
    %c0_181 = arith.constant 0 : index
    %c2_182 = arith.constant 2 : index
    %188 = vector.load %arg8[%c0_181, %c2_182] : memref<16x326xf32, #tpu.memory_space<vmem>>, vector<16x288xf32>
    %c29 = arith.constant 29 : index
    %c0_183 = arith.constant 0 : index
    %c0_184 = arith.constant 0 : index
    %189 = vector.load %arg2[%c29, %c0_183, %c0_184] : memref<36x16x16xf32, #tpu.memory_space<vmem>>, vector<1x16x16xf32>
    %190 = vector.shape_cast %189 : vector<1x16x16xf32> to vector<16x16xf32>
    %cst_185 = arith.constant dense<0.000000e+00> : vector<16x288xf32>
    %191 = tpu.matmul %190, %188, %cst_185 {dimension_numbers = #tpu.dot_dimension_numbers<[1], [0], [0], [1], [0, 0, 1, 1], [], []>} : vector<16x16xf32>, vector<16x288xf32>, vector<16x288xf32> -> vector<16x288xf32>
    %192 = arith.addf %187, %191 : vector<16x288xf32>
    %c0_186 = arith.constant 0 : index
    %c18_187 = arith.constant 18 : index
    %193 = vector.load %arg8[%c0_186, %c18_187] : memref<16x326xf32, #tpu.memory_space<vmem>>, vector<16x288xf32>
    %c30 = arith.constant 30 : index
    %c0_188 = arith.constant 0 : index
    %c0_189 = arith.constant 0 : index
    %194 = vector.load %arg2[%c30, %c0_188, %c0_189] : memref<36x16x16xf32, #tpu.memory_space<vmem>>, vector<1x16x16xf32>
    %195 = vector.shape_cast %194 : vector<1x16x16xf32> to vector<16x16xf32>
    %cst_190 = arith.constant dense<0.000000e+00> : vector<16x288xf32>
    %196 = tpu.matmul %195, %193, %cst_190 {dimension_numbers = #tpu.dot_dimension_numbers<[1], [0], [0], [1], [0, 0, 1, 1], [], []>} : vector<16x16xf32>, vector<16x288xf32>, vector<16x288xf32> -> vector<16x288xf32>
    %197 = arith.addf %192, %196 : vector<16x288xf32>
    %c0_191 = arith.constant 0 : index
    %c19_192 = arith.constant 19 : index
    %198 = vector.load %arg8[%c0_191, %c19_192] : memref<16x326xf32, #tpu.memory_space<vmem>>, vector<16x288xf32>
    %c31 = arith.constant 31 : index
    %c0_193 = arith.constant 0 : index
    %c0_194 = arith.constant 0 : index
    %199 = vector.load %arg2[%c31, %c0_193, %c0_194] : memref<36x16x16xf32, #tpu.memory_space<vmem>>, vector<1x16x16xf32>
    %200 = vector.shape_cast %199 : vector<1x16x16xf32> to vector<16x16xf32>
    %cst_195 = arith.constant dense<0.000000e+00> : vector<16x288xf32>
    %201 = tpu.matmul %200, %198, %cst_195 {dimension_numbers = #tpu.dot_dimension_numbers<[1], [0], [0], [1], [0, 0, 1, 1], [], []>} : vector<16x16xf32>, vector<16x288xf32>, vector<16x288xf32> -> vector<16x288xf32>
    %202 = arith.addf %197, %201 : vector<16x288xf32>
    %c0_196 = arith.constant 0 : index
    %c20_197 = arith.constant 20 : index
    %203 = vector.load %arg8[%c0_196, %c20_197] : memref<16x326xf32, #tpu.memory_space<vmem>>, vector<16x288xf32>
    %c32 = arith.constant 32 : index
    %c0_198 = arith.constant 0 : index
    %c0_199 = arith.constant 0 : index
    %204 = vector.load %arg2[%c32, %c0_198, %c0_199] : memref<36x16x16xf32, #tpu.memory_space<vmem>>, vector<1x16x16xf32>
    %205 = vector.shape_cast %204 : vector<1x16x16xf32> to vector<16x16xf32>
    %cst_200 = arith.constant dense<0.000000e+00> : vector<16x288xf32>
    %206 = tpu.matmul %205, %203, %cst_200 {dimension_numbers = #tpu.dot_dimension_numbers<[1], [0], [0], [1], [0, 0, 1, 1], [], []>} : vector<16x16xf32>, vector<16x288xf32>, vector<16x288xf32> -> vector<16x288xf32>
    %207 = arith.addf %202, %206 : vector<16x288xf32>
    %c0_201 = arith.constant 0 : index
    %c36_202 = arith.constant 36 : index
    %208 = vector.load %arg8[%c0_201, %c36_202] : memref<16x326xf32, #tpu.memory_space<vmem>>, vector<16x288xf32>
    %c33 = arith.constant 33 : index
    %c0_203 = arith.constant 0 : index
    %c0_204 = arith.constant 0 : index
    %209 = vector.load %arg2[%c33, %c0_203, %c0_204] : memref<36x16x16xf32, #tpu.memory_space<vmem>>, vector<1x16x16xf32>
    %210 = vector.shape_cast %209 : vector<1x16x16xf32> to vector<16x16xf32>
    %cst_205 = arith.constant dense<0.000000e+00> : vector<16x288xf32>
    %211 = tpu.matmul %210, %208, %cst_205 {dimension_numbers = #tpu.dot_dimension_numbers<[1], [0], [0], [1], [0, 0, 1, 1], [], []>} : vector<16x16xf32>, vector<16x288xf32>, vector<16x288xf32> -> vector<16x288xf32>
    %212 = arith.addf %207, %211 : vector<16x288xf32>
    %c0_206 = arith.constant 0 : index
    %c37_207 = arith.constant 37 : index
    %213 = vector.load %arg8[%c0_206, %c37_207] : memref<16x326xf32, #tpu.memory_space<vmem>>, vector<16x288xf32>
    %c34 = arith.constant 34 : index
    %c0_208 = arith.constant 0 : index
    %c0_209 = arith.constant 0 : index
    %214 = vector.load %arg2[%c34, %c0_208, %c0_209] : memref<36x16x16xf32, #tpu.memory_space<vmem>>, vector<1x16x16xf32>
    %215 = vector.shape_cast %214 : vector<1x16x16xf32> to vector<16x16xf32>
    %cst_210 = arith.constant dense<0.000000e+00> : vector<16x288xf32>
    %216 = tpu.matmul %215, %213, %cst_210 {dimension_numbers = #tpu.dot_dimension_numbers<[1], [0], [0], [1], [0, 0, 1, 1], [], []>} : vector<16x16xf32>, vector<16x288xf32>, vector<16x288xf32> -> vector<16x288xf32>
    %217 = arith.addf %212, %216 : vector<16x288xf32>
    %c0_211 = arith.constant 0 : index
    %c38_212 = arith.constant 38 : index
    %218 = vector.load %arg8[%c0_211, %c38_212] : memref<16x326xf32, #tpu.memory_space<vmem>>, vector<16x288xf32>
    %c35 = arith.constant 35 : index
    %c0_213 = arith.constant 0 : index
    %c0_214 = arith.constant 0 : index
    %219 = vector.load %arg2[%c35, %c0_213, %c0_214] : memref<36x16x16xf32, #tpu.memory_space<vmem>>, vector<1x16x16xf32>
    %220 = vector.shape_cast %219 : vector<1x16x16xf32> to vector<16x16xf32>
    %cst_215 = arith.constant dense<0.000000e+00> : vector<16x288xf32>
    %221 = tpu.matmul %220, %218, %cst_215 {dimension_numbers = #tpu.dot_dimension_numbers<[1], [0], [0], [1], [0, 0, 1, 1], [], []>} : vector<16x16xf32>, vector<16x288xf32>, vector<16x288xf32> -> vector<16x288xf32>
    %222 = arith.addf %217, %221 : vector<16x288xf32>
    %c3_216 = arith.constant 3 : index
    %c0_217 = arith.constant 0 : index
    %c0_218 = arith.constant 0 : index
    %223 = vector.load %arg3[%c3_216, %c0_217, %c0_218] : memref<4x16x1xf32, #tpu.memory_space<vmem>>, vector<1x16x1xf32>
    %224 = vector.shape_cast %223 : vector<1x16x1xf32> to vector<16x1xf32>
    %225 = vector.broadcast %224 : vector<16x1xf32> to vector<16x288xf32>
    %226 = arith.addf %222, %225 : vector<16x288xf32>
    %227 = arith.addf %226, %121 : vector<16x288xf32>
    %c0_219 = arith.constant 0 : index
    %c1_220 = arith.constant 1 : index
    %c0_221 = arith.constant 0 : index
    %c0_222 = arith.constant 0 : index
    %228 = vector.load %arg5[%c0_219, %c1_220, %c0_221, %c0_222] : memref<1x2x16x288xf32, #tpu.memory_space<vmem>>, vector<1x1x16x288xf32>
    %229 = vector.shape_cast %228 : vector<1x1x16x288xf32> to vector<16x288xf32>
    %230 = vector.shape_cast %227 : vector<16x288xf32> to vector<1x1x16x288xf32>
    tpu.vector_store %arg5[%c0_219, %c1_220, %c0_221, %c0_222], %230 {strides = array<i32>} : memref<1x2x16x288xf32, #tpu.memory_space<vmem>>, vector<1x1x16x288xf32>,
    %cst_223 = arith.constant 0.000000e+00 : f32
    %231 = vector.broadcast %cst_223 : f32 to vector<16x288xf32>
    %232 = arith.maximumf %227, %231 : vector<16x288xf32>
    %c0_224 = arith.constant 0 : index
    %c0_225 = arith.constant 0 : index
    %c0_226 = arith.constant 0 : index
    %233 = vector.load %arg6[%c0_224, %c0_225, %c0_226] : memref<1x16x288xf32, #tpu.memory_space<vmem>>, vector<1x16x288xf32>
    %234 = vector.shape_cast %233 : vector<1x16x288xf32> to vector<16x288xf32>
    %235 = vector.shape_cast %232 : vector<16x288xf32> to vector<1x16x288xf32>
    tpu.vector_store %arg6[%c0_224, %c0_225, %c0_226], %235 {strides = array<i32>} : memref<1x16x288xf32, #tpu.memory_space<vmem>>, vector<1x16x288xf32>,
    return
  }
  func.func @transform_0(%arg0: i32) -> (i32, i32, i32) {
    %c0_i32 = arith.constant 0 : i32
    %c0_i32_0 = arith.constant 0 : i32
    %c0_i32_1 = arith.constant 0 : i32
    return %arg0, %c0_i32, %c0_i32_0 : i32, i32, i32
  }
  func.func @transform_1(%arg0: i32) -> (i32, i32, i32) {
    %c0_i32 = arith.constant 0 : i32
    %c0_i32_0 = arith.constant 0 : i32
    %c0_i32_1 = arith.constant 0 : i32
    %c0_i32_2 = arith.constant 0 : i32
    return %c0_i32, %c0_i32_0, %c0_i32_1 : i32, i32, i32
  }
  func.func @transform_2(%arg0: i32) -> (i32, i32, i32) {
    %c0_i32 = arith.constant 0 : i32
    %c0_i32_0 = arith.constant 0 : i32
    %c0_i32_1 = arith.constant 0 : i32
    %c0_i32_2 = arith.constant 0 : i32
    return %c0_i32, %c0_i32_0, %c0_i32_1 : i32, i32, i32
  }
  func.func @transform_3(%arg0: i32) -> (i32, i32) {
    %c0_i32 = arith.constant 0 : i32
    %c0_i32_0 = arith.constant 0 : i32
    %c0_i32_1 = arith.constant 0 : i32
    return %c0_i32, %c0_i32_0 : i32, i32
  }
  func.func @transform_4(%arg0: i32) -> (i32, i32, i32, i32) {
    %c0_i32 = arith.constant 0 : i32
    %c0_i32_0 = arith.constant 0 : i32
    %c0_i32_1 = arith.constant 0 : i32
    %c0_i32_2 = arith.constant 0 : i32
    return %arg0, %c0_i32, %c0_i32_0, %c0_i32_1 : i32, i32, i32, i32
  }
  func.func @transform_5(%arg0: i32) -> (i32, i32, i32) {
    %c0_i32 = arith.constant 0 : i32
    %c0_i32_0 = arith.constant 0 : i32
    %c0_i32_1 = arith.constant 0 : i32
    return %arg0, %c0_i32, %c0_i32_0 : i32, i32, i32
  }
}

</mosaic_0001>

<bundles_post_ra>
// kernel: stage_forward.1
= control target key start
LH: loop header
LB: loop body
LE: loop exit
PB: predicated region body
PF: predicated region fallthrough
CT: control target
= control target key end

     0   :  { %s8044_s18 = smov 0   ;;  %s9548_s0 = inlined_call_operand.vmem [shape: f32[2,16,326], index: 0, kind: input, shape index: {}]   ;;  %s9549_s1 = inlined_call_operand.vmem [shape: f32[36,16,16], index: 1, kind: input, shape index: {}]   ;;  %s9550_s2 = inlined_call_operand.vmem [shape: f32[4,16,1], index: 2, kind: input, shape index: {}]   ;;  %s9551_s3 = inlined_call_operand.vmem [shape: f32[1,288], index: 3, kind: input, shape index: {}]   ;;  %s9552_s4 = inlined_call_operand.vmem [shape: f32[2,2,16,288], index: 4, kind: output, shape index: {0}]   ;;  %s9553_s5 = inlined_call_operand.vmem [shape: f32[2,16,288], index: 5, kind: output, shape index: {1}]  }
   0x1 LB: > { %s7340_s19 = sadd.s32 4294967295, %s8001_s18   ;;  %p7344_p0 = scmp.ge.s32.totalorder %s8001_s18, 1  ;;  %s8001_s18 = sphi %s8044_s18, %s16_s18  }
   0x2   : > { %p190_p1 = scmp.lt.s32.totalorder %s8001_s18, 3 }
   0x4   : > { %p191_p2 = pnand %p7344_p0, %p190_p1 }
   0x6   : > { %194 = sbr.rel (%p191_p2) target bundleno = 2093 (0x82d), region = 36 }
   0xb   : > { %p223_p3 = scmp.lt.s32.totalorder %s7340_s19, 1  ;;  %vm240_vm0 = vcmask 572416   ;;  %s8003_s24 = smov 127   ;;  %vm298_vm1 = vcmask 130048   ;;  %v9554_v6 = vmov 0.0   ;;  %v8085_v7 = vld [vmem:[%s9549_s1 + $0x10] sm:$0xff] }
   0xc   : > { %369 = vmatprep.mubr.f32.mxu0 %v9554_v6  ;;  %238 = vst [vmem:[#allocation3] sm:$0xff] %v9554_v6  ;;  %241 = vst.msk [vmem:[#allocation3 + $0x10] sm:$0xff] %vm240_vm0, %v9554_v6  ;;  %7724 = vmatprep.mubr.msk.f32.mxu1 %vm298_vm1, %v8085_v7  ;;  %s8005_s27 = smov 126   ;;  %s8006_s28 = smov 110   ;;  %v8012_v10 = vmov 0   ;;  %v1945_v11 = vld [vmem:[%s9550_s2] sm:$0xff] }
   0xd   : > { %s9568_s19 = smov (!%p223_p3, %s7340_s19), 1  ;;  %242 = vst [vmem:[#allocation3 + $0x18] sm:$0xff] %v9554_v6  ;;  %244 = vst.msk [vmem:[#allocation3 + $0x28] sm:$0xff] %vm240_vm0, %v9554_v6  ;;  %s8007_s29 = smov 109   ;;  %7993 = vset.pattern.permute.xlu0 %v8012_v10  ;;  %7994 = vset.pattern.permute.xlu1 %v8012_v10  ;;  %v1946_v12 = vld [vmem:[%s9550_s2 + $0x8] sm:$0xff]  ;;  %vm287_vm2 = vcmask 1039360  }
   0xe   : > { %s7972_s20 = smul.u32 48, %s9568_s19  ;;  %s8008_s30 = smov 108   ;;  %v7349_v23 = vld [vmem:[%s9549_s1 + $0x18] sm:$0xff]  ;;  %vm630_vm3 = vcmask 1031168   ;;  %v264_v28 = vld [vmem:[%s9549_s1] sm:$0xff]  ;;  %v265_v31 = vld [vmem:[%s9549_s1 + $0x8] sm:$0xff] }
   0xf   : > { %s8009_s6 = smov 92   ;;  %s8010_s7 = smov 91   ;;  %v7358_v36 = vld [vmem:[%s9549_s1 + $0x20] sm:$0xff]  ;;  %vm820_vm4 = vcmask 900096   ;;  %v7359_v41 = vld [vmem:[%s9549_s1 + $0x28] sm:$0xff]  ;;  %v7364_v45 = vld [vmem:[%s9549_s1 + $0x30] sm:$0xff] }
  0x10   : > { %s227_s23 = scalar_lea.vmem %s9548_s0, %s7972_s20  ;;  %s8011_s8 = smov 90   ;;  %v7365_v48 = vld [vmem:[%s9549_s1 + $0x38] sm:$0xff]  ;;  %vm1010_vm5 = vcmask 891904   ;;  %v7370_v56 = vld [vmem:[%s9549_s1 + $0x40] sm:$0xff]  ;;  %v7371_v60 = vld [vmem:[%s9549_s1 + $0x48] sm:$0xff]  ;;  %vm1200_vm6 = vcmask 883712  }
  0x11   : > { %v8060_v0 = vld [vmem:[%s227_s23 + $0x20] sm:$0xff]  ;;  %v8062_v1 = vld [vmem:[%s227_s23 + $0x18] sm:$0xff]  ;;  %v251_v2 = vld [vmem:[%s227_s23 + $0x28] sm:$0xff]  ;;  %vm1390_vm7 = vcmask 752640   ;;  %vm1580_vm8 = vcmask 744448   ;;  %vm1770_vm9 = vcmask 736256  }
  0x12   : > { %283 = vrot.lane.b32.xlu0 %v8060_v0, %s8003_s24  ;;  %255 = vst [vmem:[#allocation2 + $0x18] sm:$0xff] %v8062_v1  ;;  %281 = vrot.lane.b32.xlu1 %v8062_v1, %s8003_s24  ;;  %257 = vst.msk [vmem:[#allocation2 + $0x28] sm:$0xff] %vm240_vm0, %v251_v2  ;;  %v248_v3 = vld [vmem:[%s227_s23 + $0x10] sm:$0xff]  ;;  %v8070_v4 = vld [vmem:[%s227_s23 + $0x8] sm:$0xff]  ;;  %s8013_s25 = smov 19   ;;  %vm2020_vm10 = vcmask 1047704  }
  0x13   : > { %254 = vst.msk [vmem:[#allocation2 + $0x10] sm:$0xff] %vm240_vm0, %v248_v3  ;;  %v8073_v5 = vld [vmem:[%s227_s23] sm:$0xff]  ;;  %v7376_v3 = vld [vmem:[%s9549_s1 + $0x50] sm:$0xff]  ;;  %vm2009_vm11 = vcmask 154624   ;;  %vm2023_vm12 = vcmask 416768   ;;  %s7973_s9 = smul.u32 96, %s9568_s19 }
  0x14   : > { %252 = vst [vmem:[#allocation2] sm:$0xff] %v8073_v5  ;;  %vm3734_vm13 = vcmask 261120  }
  0x15   : > { %s8738_s12 = scalar_lea.vmem %s9552_s4, %s7973_s9 }
  0x16   : > { %277 = vrot.lane.b32.xlu1 %v8070_v4, %s8003_s24 }
  0x19   : > { %v8092_v8 = vld [vmem:[#allocation2 + $0x28] sm:$0xff] }
  0x1a   : > { %285 = vrot.lane.b32.xlu0 %v8092_v8, %s8003_s24  ;;  %275 = vrot.lane.b32.xlu1 %v8073_v5, %s8003_s24  ;;  %v8098_v9 = vld [vmem:[#allocation2 + $0x10] sm:$0xff] }
  0x1e   : > { %279 = vrot.lane.b32.xlu0 %v8098_v9, %s8003_s24  ;;  %628 = vrot.lane.b32.xlu1 %v8092_v8, %s8005_s27 }
  0x22   : > { %626 = vrot.lane.b32.xlu0 %v8060_v0, %s8005_s27  ;;  %620 = vrot.lane.b32.xlu1 %v8070_v4, %s8005_s27 }
  0x26   : > { %624 = vrot.lane.b32.xlu0 %v8062_v1, %s8005_s27  ;;  %618 = vrot.lane.b32.xlu1 %v8073_v5, %s8005_s27 }
  0x2a   : > { %622 = vrot.lane.b32.xlu0 %v8098_v9, %s8005_s27  ;;  %816 = vrot.lane.b32.xlu1 %v8060_v0, %s8006_s28 }
  0x2e   : > { %818 = vrot.lane.b32.xlu0 %v8092_v8, %s8006_s28  ;;  %814 = vrot.lane.b32.xlu1 %v8062_v1, %s8006_s28 }
  0x32   : > { %812 = vrot.lane.b32.xlu0 %v8098_v9, %s8006_s28  ;;  %1006 = vrot.lane.b32.xlu1 %v8060_v0, %s8007_s29 }
  0x36   : > { %810 = vrot.lane.b32.xlu0 %v8070_v4, %s8006_s28  ;;  %808 = vrot.lane.b32.xlu1 %v8073_v5, %s8006_s28 }
  0x3a   : > { %1008 = vrot.lane.b32.xlu0 %v8092_v8, %s8007_s29  ;;  %1000 = vrot.lane.b32.xlu1 %v8070_v4, %s8007_s29 }
  0x3e   : > { %1004 = vrot.lane.b32.xlu0 %v8062_v1, %s8007_s29  ;;  %998 = vrot.lane.b32.xlu1 %v8073_v5, %s8007_s29 }
  0x42   : > { %1002 = vrot.lane.b32.xlu0 %v8098_v9, %s8007_s29  ;;  %1196 = vrot.lane.b32.xlu1 %v8060_v0, %s8008_s30 }
  0x46   : > { %1198 = vrot.lane.b32.xlu0 %v8092_v8, %s8008_s30  ;;  %1194 = vrot.lane.b32.xlu1 %v8062_v1, %s8008_s30 }
  0x4a   : > { %1192 = vrot.lane.b32.xlu0 %v8098_v9, %s8008_s30  ;;  %1386 = vrot.lane.b32.xlu1 %v8060_v0, %s8009_s6 }
  0x4e   : > { %1190 = vrot.lane.b32.xlu0 %v8070_v4, %s8008_s30  ;;  %1188 = vrot.lane.b32.xlu1 %v8073_v5, %s8008_s30 }
  0x52   : > { %1388 = vrot.lane.b32.xlu0 %v8092_v8, %s8009_s6  ;;  %1380 = vrot.lane.b32.xlu1 %v8070_v4, %s8009_s6 }
  0x56   : > { %1384 = vrot.lane.b32.xlu0 %v8062_v1, %s8009_s6  ;;  %1378 = vrot.lane.b32.xlu1 %v8073_v5, %s8009_s6 }
  0x5a   : > { %1382 = vrot.lane.b32.xlu0 %v8098_v9, %s8009_s6  ;;  %1576 = vrot.lane.b32.xlu1 %v8060_v0, %s8010_s7 }
  0x5e   : > { %1578 = vrot.lane.b32.xlu0 %v8092_v8, %s8010_s7  ;;  %1574 = vrot.lane.b32.xlu1 %v8062_v1, %s8010_s7 }
  0x62   : > { %1572 = vrot.lane.b32.xlu0 %v8098_v9, %s8010_s7  ;;  %1766 = vrot.lane.b32.xlu1 %v8060_v0, %s8011_s8 }
  0x66   : > { %1570 = vrot.lane.b32.xlu0 %v8070_v4, %s8010_s7  ;;  %1568 = vrot.lane.b32.xlu1 %v8073_v5, %s8010_s7 }
  0x6a   : > { %1768 = vrot.lane.b32.xlu0 %v8092_v8, %s8011_s8  ;;  %1760 = vrot.lane.b32.xlu1 %v8070_v4, %s8011_s8 }
  0x6e   : > { %1764 = vrot.lane.b32.xlu0 %v8062_v1, %s8011_s8  ;;  %1758 = vrot.lane.b32.xlu1 %v8073_v5, %s8011_s8 }
  0x72   : > { %1762 = vrot.lane.b32.xlu0 %v8098_v9, %s8011_s8  ;;  %1949 = vperm.xlu1 %7994, %v1945_v11  }
  0x76   : > { %1954 = vperm.xlu0 %7993, %v1946_v12  }
  0x84   : > { %v282_v13 = vpop.permute.xlu1 %281  ;;  %v284_v14 = vpop.permute.xlu0 %283 }
  0x85   : > { %v290_v19 = vsel %vm287_vm2, %v282_v13, %v284_v14 }
  0x88   : > { %v278_v15 = vpop.permute.xlu1 %277 }
  0x8c   : > { %v286_v16 = vpop.permute.xlu0 %285  ;;  %v276_v17 = vpop.permute.xlu1 %275 }
  0x8d   : > { %7720 = vmatprep.subr.mxu1 %v286_v16  ;;  %v291_v18 = vsel %vm287_vm2, %v284_v14, %v286_v16  ;;  %v288_v24 = vsel %vm287_vm2, %v276_v17, %v278_v15 }
  0x8e   : > { %333 = vmatprep.subr.mxu0 %v291_v18  ;;  %7721 = vmatpush3.msra.mxu1 %v286_v16 }
  0x8f   : > { %334 = vmatpush1.msra.mxu0 %v290_v19 }
  0x90   : > { %v280_v20 = vpop.permute.xlu0 %279  ;;  %v629_v21 = vpop.permute.xlu1 %628 }
  0x91   : > { %7722 = vmatprep.subr.mxu1 %v280_v20  ;;  %v289_v22 = vsel %vm287_vm2, %v278_v15, %v280_v20  ;;  %v7382_v15 = vld [vmem:[%s9549_s1 + $0x60] sm:$0xff] }
  0x92   : > { %335 = vmatprep.subr.mxu0 %v289_v22  ;;  %7723 = vmatpush3.msra.mxu1 %v280_v20  ;;  %v7383_v20 = vld [vmem:[%s9549_s1 + $0x68] sm:$0xff] }
  0x93   : > { %336 = vmatpush1.msra.mxu0 %v288_v24  ;;  %491 = vmatprep.subr.mxu1 %v8060_v0 }
  0x94   : > { %7725 = vmatmul.mubr.msk.f32.vlgmr.msra.gmra.mxu1 %vm298_vm1, %v7349_v23  ;;  %v627_v25 = vpop.permute.xlu0 %626  ;;  %7350 = vmatmul.mubr.msk.f32.vlgmr.msra.gmra.mxu0 %vm298_vm1, %v8085_v7  ;;  %v621_v26 = vpop.permute.xlu1 %620  ;;  %v7377_v7 = vld [vmem:[%s9549_s1 + $0x58] sm:$0xff] }
  0x95   : > { %492 = vmatpush1.msra.mxu1 %v8062_v1  ;;  %7727 = vmatprep.subr.mxu0 %v8092_v8  ;;  %v634_v30 = vsel %vm630_vm3, %v627_v25, %v629_v21 }
  0x96   : > { %493 = vmatprep.subr.mxu1 %v8070_v4  ;;  %7728 = vmatpush3.msra.mxu0 %v8092_v8 }
  0x97   : > { %494 = vmatpush1.msra.mxu1 %v8073_v5  ;;  %7729 = vmatprep.subr.mxu0 %v8098_v9 }
  0x98   : > { %375 = vmatprep.mubr.f32.mxu0 %v9554_v6  ;;  %527 = vmatprep.mubr.f32.mxu1 %v9554_v6  ;;  %v625_v27 = vpop.permute.xlu0 %624  ;;  %v619_v29 = vpop.permute.xlu1 %618 }
  0x99   : > { %7730 = vmatpush3.msra.mxu0 %v8098_v9  ;;  %7734 = vmatprep.subr.mxu1 %v629_v21  ;;  %v633_v35 = vsel %vm630_vm3, %v625_v27, %v627_v25  ;;  %v631_v37 = vsel %vm630_vm3, %v619_v29, %v621_v26 }
  0x9a   : > { %7351 = vmatmul.mubr.msk.f32.gmra.mxu0 %vm298_vm1, %v7349_v23  ;;  %675 = vmatprep.subr.mxu0 %v634_v30 }
  0x9b   : > { %7354 = vmatmul.mubr.msk.f32.vlgmr.msra.gmra.mxu1 %vm298_vm1, %v264_v28  ;;  %7731 = vmatprep.mubr.msk.f32.mxu0 %vm298_vm1, %v264_v28  ;;  %v7388_v28 = vld [vmem:[%s9549_s1 + $0x70] sm:$0xff] }
  0x9c   : > { %7735 = vmatpush3.msra.mxu1 %v629_v21  ;;  %v623_v32 = vpop.permute.xlu0 %622  ;;  %v817_v33 = vpop.permute.xlu1 %816  ;;  %533 = vmatprep.mubr.f32.mxu1 %v9554_v6 }
  0x9d   : > { %7736 = vmatprep.subr.mxu1 %v623_v32  ;;  %v632_v34 = vsel %vm630_vm3, %v621_v26, %v623_v32 }
  0x9e   : > { %7732 = vmatmul.mubr.msk.f32.vlgmr.msra.gmra.mxu0 %vm298_vm1, %v265_v31  ;;  %7737 = vmatpush3.msra.mxu1 %v623_v32 }
  0x9f   : > { %676 = vmatpush1.msra.mxu0 %v633_v35  ;;  %711 = vmatprep.mubr.f32.mxu0 %v9554_v6 }
  0xa0   : > { %677 = vmatprep.subr.mxu0 %v632_v34  ;;  %v819_v38 = vpop.permute.xlu0 %818  ;;  %7355 = vmatmul.mubr.msk.f32.gmra.mxu1 %vm298_vm1, %v265_v31  ;;  %v815_v39 = vpop.permute.xlu1 %814  ;;  %v7389_v31 = vld [vmem:[%s9549_s1 + $0x78] sm:$0xff] }
  0xa1   : > { %678 = vmatpush1.msra.mxu0 %v631_v37  ;;  %v824_v40 = vsel %vm820_vm4, %v817_v33, %v819_v38  ;;  %7738 = vmatprep.mubr.msk.f32.mxu1 %vm298_vm1, %v7358_v36  ;;  %v823_v42 = vsel %vm820_vm4, %v815_v39, %v817_v33  ;;  %v7394_v39 = vld [vmem:[%s9549_s1 + $0x80] sm:$0xff] }
  0xa2   : > { %7741 = vmatprep.subr.mxu0 %v819_v38  ;;  %7360 = vmatmul.mubr.msk.f32.vlgmr.msra.gmra.mxu0 %vm298_vm1, %v7358_v36 }
  0xa3   : > { %865 = vmatprep.subr.mxu1 %v824_v40  ;;  %7742 = vmatpush3.msra.mxu0 %v819_v38 }
  0xa4   : > { %v813_v43 = vpop.permute.xlu0 %812  ;;  %7739 = vmatmul.mubr.msk.f32.vlgmr.msra.gmra.mxu1 %vm298_vm1, %v7359_v41  ;;  %v1007_v44 = vpop.permute.xlu1 %1006  ;;  %717 = vmatprep.mubr.f32.mxu0 %v9554_v6 }
  0xa5   : > { %7743 = vmatprep.subr.mxu0 %v813_v43  ;;  %866 = vmatpush1.msra.mxu1 %v823_v42 }
  0xa6   : > { %7744 = vmatpush3.msra.mxu0 %v813_v43  ;;  %901 = vmatprep.mubr.f32.mxu1 %v9554_v6 }
  0xa7   : > { %7361 = vmatmul.mubr.msk.f32.gmra.mxu0 %vm298_vm1, %v7359_v41 }
  0xa8   : > { %v811_v46 = vpop.permute.xlu0 %810  ;;  %v809_v47 = vpop.permute.xlu1 %808  ;;  %7745 = vmatprep.mubr.msk.f32.mxu0 %vm298_vm1, %v7364_v45 }
  0xa9   : > { %v822_v49 = vsel %vm820_vm4, %v811_v46, %v813_v43  ;;  %v821_v50 = vsel %vm820_vm4, %v809_v47, %v811_v46 }
  0xaa   : > { %867 = vmatprep.subr.mxu1 %v822_v49 }
  0xab   : > { %868 = vmatpush1.msra.mxu1 %v821_v50  ;;  %7746 = vmatmul.mubr.msk.f32.vlgmr.msra.gmra.mxu0 %vm298_vm1, %v7365_v48 }
  0xac   : > { %v8253_v51 = vpop.permute.xlu0 %1008  ;;  %v1001_v52 = vpop.permute.xlu1 %1000  ;;  %7366 = vmatmul.mubr.msk.f32.vlgmr.msra.gmra.mxu1 %vm298_vm1, %v7364_v45  ;;  %1091 = vmatprep.mubr.f32.mxu0 %v9554_v6 }
  0xad   : > { %v8259_v53 = vsel %vm1010_vm5, %v1007_v44, %v8253_v51  ;;  %7748 = vmatprep.subr.mxu1 %v8253_v51  ;;  %907 = vmatprep.mubr.f32.mxu1 %v9554_v6 }
  0xae   : > { %1055 = vmatprep.subr.mxu0 %v8259_v53  ;;  %7749 = vmatpush3.msra.mxu1 %v8253_v51 }
  0xb0   : > { %v1005_v54 = vpop.permute.xlu0 %1004  ;;  %v999_v55 = vpop.permute.xlu1 %998  ;;  %7367 = vmatmul.mubr.msk.f32.gmra.mxu1 %vm298_vm1, %v7365_v48 }
  0xb1   : > { %v8270_v57 = vsel %vm1010_vm5, %v1005_v54, %v1007_v44  ;;  %7752 = vmatprep.mubr.msk.f32.mxu1 %vm298_vm1, %v7370_v56  ;;  %v8285_v62 = vsel %vm1010_vm5, %v999_v55, %v1001_v52  ;;  %v7395_v44 = vld [vmem:[%s9549_s1 + $0x88] sm:$0xff] }
  0xb2   : > { %1056 = vmatpush1.msra.mxu0 %v8270_v57 }
  0xb4   : > { %v8274_v58 = vpop.permute.xlu0 %1002  ;;  %v1197_v59 = vpop.permute.xlu1 %1196 }
  0xb5   : > { %7750 = vmatprep.subr.mxu1 %v8274_v58  ;;  %v8282_v61 = vsel %vm1010_vm5, %v1001_v52, %v8274_v58 }
  0xb6   : > { %1057 = vmatprep.subr.mxu0 %v8282_v61  ;;  %7751 = vmatpush3.msra.mxu1 %v8274_v58 }
  0xb7   : > { %1058 = vmatpush1.msra.mxu0 %v8285_v62  ;;  %7753 = vmatmul.mubr.msk.f32.vlgmr.msra.gmra.mxu1 %vm298_vm1, %v7371_v60 }
  0xb8   : > { %v1199_v63 = vpop.permute.xlu0 %1198  ;;  %7372 = vmatmul.mubr.msk.f32.vlgmr.msra.gmra.mxu0 %vm298_vm1, %v7370_v56  ;;  %v1195_v0 = vpop.permute.xlu1 %1194  ;;  %1281 = vmatprep.mubr.f32.mxu1 %v9554_v6 }
  0xb9   : > { %7755 = vmatprep.subr.mxu0 %v1199_v63  ;;  %v1204_v1 = vsel %vm1200_vm6, %v1197_v59, %v1199_v63  ;;  %1097 = vmatprep.mubr.f32.mxu0 %v9554_v6  ;;  %v1203_v2 = vsel %vm1200_vm6, %v1195_v0, %v1197_v59 }
  0xba   : > { %1245 = vmatprep.subr.mxu1 %v1204_v1  ;;  %7756 = vmatpush3.msra.mxu0 %v1199_v63 }
  0xbb   : > { %1246 = vmatpush1.msra.mxu1 %v1203_v2 }
  0xbc   : > { %v1193_v4 = vpop.permute.xlu0 %1192  ;;  %7373 = vmatmul.mubr.msk.f32.gmra.mxu0 %vm298_vm1, %v7371_v60  ;;  %v1387_v5 = vpop.permute.xlu1 %1386 }
  0xbd   : > { %7757 = vmatprep.subr.mxu0 %v1193_v4  ;;  %7759 = vmatprep.mubr.msk.f32.mxu0 %vm298_vm1, %v7376_v3 }
  0xbe   : > { %7758 = vmatpush3.msra.mxu0 %v1193_v4 }
  0xc0   : > { %v1191_v8 = vpop.permute.xlu0 %1190  ;;  %7760 = vmatmul.mubr.msk.f32.vlgmr.msra.gmra.mxu0 %vm298_vm1, %v7377_v7  ;;  %v1189_v9 = vpop.permute.xlu1 %1188 }
  0xc1   : > { %v1202_v10 = vsel %vm1200_vm6, %v1191_v8, %v1193_v4  ;;  %v1201_v11 = vsel %vm1200_vm6, %v1189_v9, %v1191_v8  ;;  %1471 = vmatprep.mubr.f32.mxu0 %v9554_v6 }
  0xc2   : > { %1247 = vmatprep.subr.mxu1 %v1202_v10 }
  0xc3   : > { %1248 = vmatpush1.msra.mxu1 %v1201_v11 }
  0xc4   : > { %v1389_v12 = vpop.permute.xlu0 %1388  ;;  %7378 = vmatmul.mubr.msk.f32.vlgmr.msra.gmra.mxu1 %vm298_vm1, %v7376_v3  ;;  %v1381_v13 = vpop.permute.xlu1 %1380 }
  0xc5   : > { %v1394_v14 = vsel %vm1390_vm7, %v1387_v5, %v1389_v12  ;;  %7762 = vmatprep.subr.mxu1 %v1389_v12  ;;  %1287 = vmatprep.mubr.f32.mxu1 %v9554_v6 }
  0xc6   : > { %1435 = vmatprep.subr.mxu0 %v1394_v14  ;;  %7763 = vmatpush3.msra.mxu1 %v1389_v12 }
  0xc8   : > { %v1385_v16 = vpop.permute.xlu0 %1384  ;;  %7379 = vmatmul.mubr.msk.f32.gmra.mxu1 %vm298_vm1, %v7377_v7  ;;  %v1379_v17 = vpop.permute.xlu1 %1378 }
  0xc9   : > { %v1393_v18 = vsel %vm1390_vm7, %v1385_v16, %v1387_v5  ;;  %7766 = vmatprep.mubr.msk.f32.mxu1 %vm298_vm1, %v7382_v15  ;;  %v1391_v23 = vsel %vm1390_vm7, %v1379_v17, %v1381_v13 }
  0xca   : > { %1436 = vmatpush1.msra.mxu0 %v1393_v18 }
  0xcc   : > { %v1383_v19 = vpop.permute.xlu0 %1382  ;;  %v1577_v21 = vpop.permute.xlu1 %1576 }
  0xcd   : > { %7764 = vmatprep.subr.mxu1 %v1383_v19  ;;  %v1392_v22 = vsel %vm1390_vm7, %v1381_v13, %v1383_v19 }
  0xce   : > { %1437 = vmatprep.subr.mxu0 %v1392_v22  ;;  %7765 = vmatpush3.msra.mxu1 %v1383_v19 }
  0xcf   : > { %1438 = vmatpush1.msra.mxu0 %v1391_v23  ;;  %7767 = vmatmul.mubr.msk.f32.vlgmr.msra.gmra.mxu1 %vm298_vm1, %v7383_v20 }
  0xd0   : > { %v1579_v24 = vpop.permute.xlu0 %1578  ;;  %7384 = vmatmul.mubr.msk.f32.vlgmr.msra.gmra.mxu0 %vm298_vm1, %v7382_v15  ;;  %v1575_v25 = vpop.permute.xlu1 %1574  ;;  %1661 = vmatprep.mubr.f32.mxu1 %v9554_v6 }
  0xd1   : > { %7769 = vmatprep.subr.mxu0 %v1579_v24  ;;  %v1584_v26 = vsel %vm1580_vm8, %v1577_v21, %v1579_v24  ;;  %1477 = vmatprep.mubr.f32.mxu0 %v9554_v6  ;;  %v1583_v27 = vsel %vm1580_vm8, %v1575_v25, %v1577_v21 }
  0xd2   : > { %1625 = vmatprep.subr.mxu1 %v1584_v26  ;;  %7770 = vmatpush3.msra.mxu0 %v1579_v24 }
  0xd3   : > { %1626 = vmatpush1.msra.mxu1 %v1583_v27 }
  0xd4   : > { %v1573_v29 = vpop.permute.xlu0 %1572  ;;  %7385 = vmatmul.mubr.msk.f32.gmra.mxu0 %vm298_vm1, %v7383_v20  ;;  %v1767_v30 = vpop.permute.xlu1 %1766 }
  0xd5   : > { %7771 = vmatprep.subr.mxu0 %v1573_v29  ;;  %7773 = vmatprep.mubr.msk.f32.mxu0 %vm298_vm1, %v7388_v28 }
  0xd6   : > { %7772 = vmatpush3.msra.mxu0 %v1573_v29 }
  0xd8   : > { %v1571_v32 = vpop.permute.xlu0 %1570  ;;  %7774 = vmatmul.mubr.msk.f32.vlgmr.msra.gmra.mxu0 %vm298_vm1, %v7389_v31  ;;  %v1569_v33 = vpop.permute.xlu1 %1568 }
  0xd9   : > { %v1582_v34 = vsel %vm1580_vm8, %v1571_v32, %v1573_v29  ;;  %v1581_v35 = vsel %vm1580_vm8, %v1569_v33, %v1571_v32  ;;  %1851 = vmatprep.mubr.f32.mxu0 %v9554_v6 }
  0xda   : > { %1627 = vmatprep.subr.mxu1 %v1582_v34 }
  0xdb   : > { %1628 = vmatpush1.msra.mxu1 %v1581_v35 }
  0xdc   : > { %v1769_v36 = vpop.permute.xlu0 %1768  ;;  %7390 = vmatmul.mubr.msk.f32.vlgmr.msra.gmra.mxu1 %vm298_vm1, %v7388_v28  ;;  %v1761_v38 = vpop.permute.xlu1 %1760 }
  0xdd   : > { %v1774_v37 = vsel %vm1770_vm9, %v1767_v30, %v1769_v36  ;;  %7776 = vmatprep.subr.mxu1 %v1769_v36  ;;  %1667 = vmatprep.mubr.f32.mxu1 %v9554_v6 }
  0xde   : > { %1815 = vmatprep.subr.mxu0 %v1774_v37  ;;  %7777 = vmatpush3.msra.mxu1 %v1769_v36 }
  0xe0   : > { %v1765_v40 = vpop.permute.xlu0 %1764  ;;  %7391 = vmatmul.mubr.msk.f32.gmra.mxu1 %vm298_vm1, %v7389_v31  ;;  %v1759_v42 = vpop.permute.xlu1 %1758 }
  0xe1   : > { %v1773_v41 = vsel %vm1770_vm9, %v1765_v40, %v1767_v30  ;;  %7780 = vmatprep.mubr.msk.f32.mxu1 %vm298_vm1, %v7394_v39  ;;  %v1771_v46 = vsel %vm1770_vm9, %v1759_v42, %v1761_v38 }
  0xe2   : > { %1816 = vmatpush1.msra.mxu0 %v1773_v41 }
  0xe4   : > { %v1763_v43 = vpop.permute.xlu0 %1762 }
  0xe5   : > { %7778 = vmatprep.subr.mxu1 %v1763_v43  ;;  %v1772_v45 = vsel %vm1770_vm9, %v1761_v38, %v1763_v43 }
  0xe6   : > { %1817 = vmatprep.subr.mxu0 %v1772_v45  ;;  %7779 = vmatpush3.msra.mxu1 %v1763_v43 }
  0xe7   : > { %1818 = vmatpush1.msra.mxu0 %v1771_v46  ;;  %7781 = vmatmul.mubr.msk.f32.vlgmr.msra.gmra.mxu1 %vm298_vm1, %v7395_v44 }
  0xe8   : > { %7396 = vmatmul.mubr.msk.f32.vlgmr.msra.gmra.mxu0 %vm298_vm1, %v7394_v39  ;;  %2138 = vmatprep.mubr.f32.mxu1 %v9554_v6 }
  0xe9   : > { %1857 = vmatprep.mubr.f32.mxu0 %v9554_v6 }
  0xec   : > { %7397 = vmatmul.mubr.msk.f32.gmra.mxu0 %vm298_vm1, %v7395_v44 }
 0x154   : > { %v371_v47 = vpop.f32.mrf.mxu0  ;;  %v7726_v48 = vpop.f32.mrf.mxu1 }
 0x156   : > { %v373_v49 = vpop.f32.mrf.mxu0  ;;  %v448_v50 = vpop.f32.mrf.mxu1 }
 0x15a   : > { %v377_v52 = vpop.f32.mrf.mxu0 }
 0x15b   : > { %v529_v54 = vpop.f32.mrf.mxu1 }
 0x15c   : > { %v379_v55 = vpop.f32.mrf.mxu0  ;;  %v530_v28 = vadd.f32 %v529_v54, %v371_v47  ;;  %v1970_v54 = vlaneseq }
 0x15d   : > { %v531_v59 = vpop.f32.mrf.mxu1 }
 0x15e   : > { %v7733_v56 = vpop.f32.mrf.mxu0  ;;  %v532_v33 = vadd.f32 %v531_v59, %v373_v49 }
 0x15f   : > { %v612_v25 = vadd.f32 %v7733_v56, %v7726_v48 }
 0x160   : > { %v606_v60 = vpop.f32.mrf.mxu0  ;;  %v535_v63 = vpop.f32.mrf.mxu1 }
 0x161   : > { %v607_v32 = vadd.f32 %v606_v60, %v448_v50  ;;  %v536_v35 = vadd.f32 %v535_v63, %v377_v52  ;;  %v1971_v63 = vshrl.u32 %v1970_v54, 7 }
 0x162   : > { %v713_v0 = vpop.f32.mrf.mxu0  ;;  %v537_v1 = vpop.f32.mrf.mxu1 }
 0x163   : > { %v799_v34 = vadd.f32 %v713_v0, %v530_v28  ;;  %v538_v36 = vadd.f32 %v537_v1, %v379_v55 }
 0x164   : > { %v715_v2 = vpop.f32.mrf.mxu0  ;;  %v7740_v3 = vpop.f32.mrf.mxu1 }
 0x165   : > { %v804_v29 = vadd.f32 %v7740_v3, %v612_v25  ;;  %v800_v40 = vadd.f32 %v715_v2, %v532_v33 }
 0x166   : > { %v790_v5 = vpop.f32.mrf.mxu1 }
 0x167   : > { %v719_v4 = vpop.f32.mrf.mxu0  ;;  %v801_v41 = vadd.f32 %v790_v5, %v607_v32  ;;  %v1955_v32 = vpop.permute.xlu0 %1954 }
 0x168   : > { %v802_v43 = vadd.f32 %v719_v4, %v536_v35 }
 0x169   : > { %v721_v7 = vpop.f32.mrf.mxu0 }
 0x16a   : > { %v803_v45 = vadd.f32 %v721_v7, %v538_v36 }
 0x16b   : > { %v7747_v9 = vpop.f32.mrf.mxu0 }
 0x16c   : > { %v903_v8 = vpop.f32.mrf.mxu1  ;;  %v994_v37 = vadd.f32 %v7747_v9, %v804_v29 }
 0x16d   : > { %v980_v11 = vpop.f32.mrf.mxu0  ;;  %v989_v44 = vadd.f32 %v903_v8, %v799_v34 }
 0x16e   : > { %v905_v10 = vpop.f32.mrf.mxu1  ;;  %v991_v56 = vadd.f32 %v980_v11, %v801_v41  ;;  %v1980_v11 = vsub.s32 2, %v1971_v63 }
 0x16f   : > { %v990_v3 = vadd.f32 %v905_v10, %v800_v40  ;;  %v1972_v10 = vsub.s32 0, %v1971_v63 }
 0x170   : > { %v909_v12 = vpop.f32.mrf.mxu1 }
 0x171   : > { %v992_v49 = vadd.f32 %v909_v12, %v802_v43 }
 0x172   : > { %v911_v14 = vpop.f32.mrf.mxu1 }
 0x173   : > { %v993_v52 = vadd.f32 %v911_v14, %v803_v45 }
 0x177   : > { %v7754_v16 = vpop.f32.mrf.mxu1 }
 0x178   : > { %v1093_v13 = vpop.f32.mrf.mxu0  ;;  %v1184_v46 = vadd.f32 %v7754_v16, %v994_v37 }
 0x179   : > { %v1170_v18 = vpop.f32.mrf.mxu1  ;;  %v1179_v50 = vadd.f32 %v1093_v13, %v989_v44 }
 0x17a   : > { %v1095_v15 = vpop.f32.mrf.mxu0  ;;  %v1181_v1 = vadd.f32 %v1170_v18, %v991_v56 }
 0x17b   : > { %v1180_v0 = vadd.f32 %v1095_v15, %v990_v3  ;;  %v245_v15 = vld [vmem:[%s9551_s3] sm:$0x7] }
 0x17c   : > { %v1099_v17 = vpop.f32.mrf.mxu0  ;;  %v8364_v36 = vrot.slane %v245_v15, %v1972_v10 }
 0x17d   : > { %v1182_v4 = vadd.f32 %v1099_v17, %v992_v49 }
 0x17e   : > { %v1101_v19 = vpop.f32.mrf.mxu0 }
 0x17f   : > { %v1183_v16 = vadd.f32 %v1101_v19, %v993_v52 }
 0x180   : > { %v7761_v21 = vpop.f32.mrf.mxu0 }
 0x181   : > { %v1374_v55 = vadd.f32 %v7761_v21, %v1184_v46 }
 0x182   : > { %v1360_v23 = vpop.f32.mrf.mxu0 }
 0x183   : > { %v1371_v13 = vadd.f32 %v1360_v23, %v1181_v1 }
 0x184   : > { %v1283_v20 = vpop.f32.mrf.mxu1 }
 0x185   : > { %v1369_v2 = vadd.f32 %v1283_v20, %v1179_v50 }
 0x186   : > { %v1285_v22 = vpop.f32.mrf.mxu1 }
 0x187   : > { %v1370_v8 = vadd.f32 %v1285_v22, %v1180_v0  ;;  %v1950_v22 = vpop.permute.xlu1 %1949 }
 0x188   : > { %v1289_v24 = vpop.f32.mrf.mxu1 }
 0x189   : > { %v1372_v12 = vadd.f32 %v1289_v24, %v1182_v4 }
 0x18a   : > { %v1291_v27 = vpop.f32.mrf.mxu1 }
 0x18b   : > { %v1373_v18 = vadd.f32 %v1291_v27, %v1183_v16 }
 0x18f   : > { %v7768_v30 = vpop.f32.mrf.mxu1 }
 0x190   : > { %v1473_v26 = vpop.f32.mrf.mxu0  ;;  %v1564_v5 = vadd.f32 %v7768_v30, %v1374_v55 }
 0x191   : > { %v1550_v38 = vpop.f32.mrf.mxu1  ;;  %v1559_v7 = vadd.f32 %v1473_v26, %v1369_v2 }
 0x192   : > { %v1475_v31 = vpop.f32.mrf.mxu0  ;;  %v1561_v26 = vadd.f32 %v1550_v38, %v1371_v13 }
 0x193   : > { %v1560_v29 = vadd.f32 %v1475_v31, %v1370_v8  ;;  %v8362_v31 = vrot.slane %v245_v15, %v1980_v11 }
 0x194   : > { %v1479_v39 = vpop.f32.mrf.mxu0 }
 0x195   : > { %v1562_v19 = vadd.f32 %v1479_v39, %v1372_v12 }
 0x196   : > { %v1481_v48 = vpop.f32.mrf.mxu0 }
 0x197   : > { %v1563_v34 = vadd.f32 %v1481_v48, %v1373_v18  ;;  %v7454_v18 = vld [vmem:[%s9550_s2 + $0x10] sm:$0xff] }
 0x198   : > { %v7775_v60 = vpop.f32.mrf.mxu0 }
 0x199   : > { %v1754_v25 = vadd.f32 %v7775_v60, %v1564_v5 }
 0x19a   : > { %v1740_v28 = vpop.f32.mrf.mxu0 }
 0x19b   : > { %v1751_v37 = vadd.f32 %v1740_v28, %v1561_v26 }
 0x19c   : > { %v1663_v42 = vpop.f32.mrf.mxu1 }
 0x19d   : > { %v1749_v14 = vadd.f32 %v1663_v42, %v1559_v7 }
 0x19e   : > { %v1665_v47 = vpop.f32.mrf.mxu1 }
 0x19f   : > { %v1750_v30 = vadd.f32 %v1665_v47, %v1560_v29  ;;  %v1976_v47 = vsub.s32 1, %v1971_v63 }
 0x1a0   : > { %v1669_v59 = vpop.f32.mrf.mxu1 }
 0x1a1   : > { %v1752_v40 = vadd.f32 %v1669_v59, %v1562_v19  ;;  %v8371_v0 = vrot.slane %v245_v15, %v1976_v47  ;;  %v7400_v47 = vld [vmem:[%s9549_s1 + $0x90] sm:$0xff] }
 0x1a2   : > { %v1671_v9 = vpop.f32.mrf.mxu1 }
 0x1a3   : > { %v1753_v44 = vadd.f32 %v1671_v9, %v1563_v34  ;;  %9560 = vst [vmem:[#allocation4_spill] sm:$0xff] %v8371_v0 }
 0x1a7   : > { %v7782_v21 = vpop.f32.mrf.mxu1 }
 0x1a8   : > { %v1944_v17 = vadd.f32 %v7782_v21, %v1754_v25  ;;  %v1853_v20 = vpop.f32.mrf.mxu0 }
 0x1a9   : > { %v1939_v33 = vadd.f32 %v1853_v20, %v1749_v14  ;;  %v1930_v23 = vpop.f32.mrf.mxu1  ;;  %v8422_v14 = vld [vmem:[%s9549_s1 + $0xa0] sm:$0xff] }
 0x1aa   : > { %v1962_v35 = vadd.f32 %v1955_v32, %v1944_v17  ;;  %v1855_v24 = vpop.f32.mrf.mxu0  ;;  %v1941_v45 = vadd.f32 %v1930_v23, %v1751_v37  ;;  %7787 = vmatprep.mubr.msk.f32.mxu0 %vm298_vm1, %v8422_v14  ;;  %v7455_v17 = vld [vmem:[%s9550_s2 + $0x18] sm:$0xff] }
 0x1ab   : > { %v1940_v41 = vadd.f32 %v1855_v24, %v1750_v30  ;;  %v1957_v42 = vadd.f32 %v1950_v22, %v1939_v33 }
 0x1ac   : > { %v1859_v27 = vpop.f32.mrf.mxu0  ;;  %v1968_v43 = vmax.f32 %v1962_v35, 0.0  ;;  %v1959_v49 = vadd.f32 %v1950_v22, %v1941_v45 }
 0x1ad   : > { %v1942_v38 = vadd.f32 %v1859_v27, %v1752_v40  ;;  %v1963_v39 = vmax.f32 %v1957_v42, 0.0  ;;  %v1958_v54 = vadd.f32 %v1950_v22, %v1940_v41 }
 0x1ae   : > { %v1861_v46 = vpop.f32.mrf.mxu0  ;;  %v1990_v48 = vmul.f32 %v8362_v31, %v1968_v43  ;;  %v1965_v2 = vmax.f32 %v1959_v49, 0.0 }
 0x1af   : > { %v1960_v56 = vadd.f32 %v1955_v32, %v1942_v38  ;;  %v1943_v3 = vadd.f32 %v1861_v46, %v1753_v44  ;;  %v1985_v50 = vmul.f32 %v8364_v36, %v1963_v39  ;;  %v1964_v1 = vmax.f32 %v1958_v54, 0.0  ;;  %v7403_v39 = vld [vmem:[%s9549_s1 + $0xa8] sm:$0xff] }
 0x1b0   : > { %2007 = vrot.lane.b32.xlu1 %v1990_v48, %s8013_s25  ;;  %v1987_v4 = vmul.f32 %v8362_v31, %v1965_v2  ;;  %v7412_v2 = vld [vmem:[%s9549_s1 + $0xb0] sm:$0xff] }
 0x1b1   : > { %v1966_v59 = vmax.f32 %v1960_v56, 0.0  ;;  %v1961_v52 = vadd.f32 %v1955_v32, %v1943_v3  ;;  %1997 = vrot.lane.b32.xlu0 %v1985_v50, %s8013_s25  ;;  %v1986_v5 = vmul.f32 %v8371_v0, %v1964_v1 }
 0x1b3   : > { %v1967_v55 = vmax.f32 %v1961_v52, 0.0  ;;  %v1988_v60 = vmul.f32 %v8364_v36, %v1966_v59 }
 0x1b5   : > { %2003 = vrot.lane.b32.xlu1 %v1988_v60, %s8013_s25  ;;  %v1989_v63 = vmul.f32 %v8371_v0, %v1967_v55 }
 0x1b7   : > { %2005 = vrot.lane.b32.xlu0 %v1989_v63, %s8013_s25  ;;  %v7401_v63 = vld [vmem:[%s9549_s1 + $0x98] sm:$0xff] }
 0x1b9   : > { %1999 = vrot.lane.b32.xlu1 %v1986_v5, %s8013_s25 }
 0x1bb   : > { %2001 = vrot.lane.b32.xlu0 %v1987_v4, %s8013_s25 }
 0x222   : > { %v2008_v8 = vpop.permute.xlu1 %2007 }
 0x223   : > { %v1998_v7 = vpop.permute.xlu0 %1997 }
 0x224   : > { %2021 = vst.msk [vmem:[#allocation3] sm:$0xff] %vm2020_vm10, %v1998_v7 }
 0x227   : > { %v2004_v9 = vpop.permute.xlu1 %2003 }
 0x228   : > { %2025 = vst.msk [vmem:[#allocation3 + $0x18] sm:$0xff] %vm2020_vm10, %v2004_v9 }
 0x229   : > { %v2006_v16 = vpop.permute.xlu0 %2005 }
 0x22a   : > { %v2013_v25 = vsel %vm2009_vm11, %v2006_v16, %v2008_v8  ;;  %v2012_v15 = vsel %vm2009_vm11, %v2004_v9, %v2006_v16  ;;  %v7413_v8 = vld [vmem:[%s9549_s1 + $0xb8] sm:$0xff] }
 0x22b   : > { %2027 = vst.msk [vmem:[#allocation3 + $0x28] sm:$0xff] %vm2023_vm12, %v2013_v25  ;;  %v8384_v28 = vld [vmem:[#allocation3] sm:$0xff]  ;;  %v2000_v11 = vpop.permute.xlu1 %1999 }
 0x22c   : > { %2046 = vrot.lane.b32.xlu0 %v8384_v28, %s8003_s24  ;;  %v8405_v29 = vsel %vm2009_vm11, %v1998_v7, %v2000_v11 }
 0x22d   : > { %v2002_v10 = vpop.permute.xlu0 %2001 }
 0x22e   : > { %v2011_v13 = vsel %vm2009_vm11, %v2000_v11, %v2002_v10 }
 0x22f   : > { %2024 = vst.msk [vmem:[#allocation3 + $0x10] sm:$0xff] %vm2023_vm12, %v2011_v13  ;;  %v8426_v21 = vld [vmem:[#allocation3 + $0x18] sm:$0xff] }
 0x230   : > { %2387 = vrot.lane.b32.xlu0 %v8384_v28, %s8005_s27 }
 0x232   : > { %v8438_v32 = vld [vmem:[#allocation3 + $0x28] sm:$0xff] }
 0x234   : > { %2576 = vrot.lane.b32.xlu0 %v8384_v28, %s8006_s28 }
 0x236   : > { %v8394_v12 = vld [vmem:[#allocation3 + $0x10] sm:$0xff] }
 0x237   : > { %2050 = vrot.lane.b32.xlu1 %v8394_v12, %s8003_s24 }
 0x238   : > { %2765 = vrot.lane.b32.xlu0 %v8384_v28, %s8007_s29 }
 0x23b   : > { %2391 = vrot.lane.b32.xlu1 %v8394_v12, %s8005_s27 }
 0x23c   : > { %2954 = vrot.lane.b32.xlu0 %v8384_v28, %s8008_s30 }
 0x23f   : > { %2580 = vrot.lane.b32.xlu1 %v8394_v12, %s8006_s28 }
 0x240   : > { %2048 = vrot.lane.b32.xlu0 %v8405_v29, %s8003_s24 }
 0x243   : > { %2578 = vrot.lane.b32.xlu1 %v8405_v29, %s8006_s28 }
 0x244   : > { %2389 = vrot.lane.b32.xlu0 %v8405_v29, %s8005_s27 }
 0x247   : > { %2769 = vrot.lane.b32.xlu1 %v8394_v12, %s8007_s29 }
 0x248   : > { %2767 = vrot.lane.b32.xlu0 %v8405_v29, %s8007_s29 }
 0x24b   : > { %2958 = vrot.lane.b32.xlu1 %v8394_v12, %s8008_s30 }
 0x24c   : > { %2582 = vrot.lane.b32.xlu0 %v8426_v21, %s8006_s28 }
 0x24f   : > { %2956 = vrot.lane.b32.xlu1 %v8405_v29, %s8008_s30 }
 0x250   : > { %2960 = vrot.lane.b32.xlu0 %v8426_v21, %s8008_s30 }
 0x253   : > { %2052 = vrot.lane.b32.xlu1 %v8426_v21, %s8003_s24 }
 0x254   : > { %2056 = vrot.lane.b32.xlu0 %v8438_v32, %s8003_s24 }
 0x257   : > { %2393 = vrot.lane.b32.xlu1 %v8426_v21, %s8005_s27 }
 0x258   : > { %3145 = vrot.lane.b32.xlu0 %v8405_v29, %s8009_s6 }
 0x25b   : > { %2771 = vrot.lane.b32.xlu1 %v8426_v21, %s8007_s29 }
 0x25c   : > { %3143 = vrot.lane.b32.xlu0 %v8384_v28, %s8009_s6 }
 0x25f   : > { %2054 = vrot.lane.b32.xlu1 %v2012_v15, %s8003_s24 }
 0x260   : > { %2397 = vrot.lane.b32.xlu0 %v8438_v32, %s8005_s27 }
 0x263   : > { %3149 = vrot.lane.b32.xlu1 %v8426_v21, %s8009_s6 }
 0x264   : > { %3338 = vrot.lane.b32.xlu0 %v8426_v21, %s8010_s7 }
 0x267   : > { %3147 = vrot.lane.b32.xlu1 %v8394_v12, %s8009_s6 }
 0x268   : > { %2584 = vrot.lane.b32.xlu0 %v2012_v15, %s8006_s28 }
 0x26b   : > { %2395 = vrot.lane.b32.xlu1 %v2012_v15, %s8005_s27 }
 0x26c   : > { %2773 = vrot.lane.b32.xlu0 %v2012_v15, %s8007_s29 }
 0x26f   : > { %3336 = vrot.lane.b32.xlu1 %v8394_v12, %s8010_s7 }
 0x270   : > { %3332 = vrot.lane.b32.xlu0 %v8384_v28, %s8010_s7 }
 0x273   : > { %2586 = vrot.lane.b32.xlu1 %v8438_v32, %s8006_s28 }
 0x274   : > { %2962 = vrot.lane.b32.xlu0 %v2012_v15, %s8008_s30 }
 0x277   : > { %2775 = vrot.lane.b32.xlu1 %v8438_v32, %s8007_s29 }
 0x278   : > { %3151 = vrot.lane.b32.xlu0 %v2012_v15, %s8009_s6 }
 0x27b   : > { %3334 = vrot.lane.b32.xlu1 %v8405_v29, %s8010_s7 }
 0x27c   : > { %3523 = vrot.lane.b32.xlu0 %v8405_v29, %s8011_s8 }
 0x27f   : > { %2964 = vrot.lane.b32.xlu1 %v8438_v32, %s8008_s30 }
 0x280   : > { %3340 = vrot.lane.b32.xlu0 %v2012_v15, %s8010_s7 }
 0x283   : > { %3153 = vrot.lane.b32.xlu1 %v8438_v32, %s8009_s6 }
 0x284   : > { %3529 = vrot.lane.b32.xlu0 %v2012_v15, %s8011_s8 }
 0x287   : > { %3527 = vrot.lane.b32.xlu1 %v8426_v21, %s8011_s8 }
 0x288   : > { %3521 = vrot.lane.b32.xlu0 %v8384_v28, %s8011_s8 }
 0x28b   : > { %3342 = vrot.lane.b32.xlu1 %v8438_v32, %s8010_s7 }
 0x28c   : > { %3712 = vperm.xlu0 %7993, %v7454_v18  }
 0x28f   : > { %3531 = vrot.lane.b32.xlu1 %v8438_v32, %s8011_s8 }
 0x293   : > { %3525 = vrot.lane.b32.xlu1 %v8394_v12, %s8011_s8 }
 0x297   : > { %3717 = vperm.xlu1 %7994, %v7455_v17   ;;  %v7419_v17 = vld [vmem:[%s9549_s1 + $0xc8] sm:$0xff] }
 0x29e   : > { %v2047_v20 = vpop.permute.xlu0 %2046 }
 0x2a2   : > { %v8499_v22 = vpop.permute.xlu0 %2387 }
 0x2a6   : > { %v8501_v26 = vpop.permute.xlu0 %2576 }
 0x2a9   : > { %v2051_v19 = vpop.permute.xlu1 %2050 }
 0x2aa   : > { %v8503_v30 = vpop.permute.xlu0 %2765 }
 0x2ad   : > { %v8505_v33 = vpop.permute.xlu1 %2391 }
 0x2ae   : > { %v8507_v34 = vpop.permute.xlu0 %2954 }
 0x2b1   : > { %v8509_v35 = vpop.permute.xlu1 %2580 }
 0x2b2   : > { %v2049_v23 = vpop.permute.xlu0 %2048 }
 0x2b3   : > { %v2059_v52 = vsel %vm287_vm2, %v2049_v23, %v2051_v19  ;;  %v2058_v60 = vsel %vm287_vm2, %v2047_v20, %v2049_v23 }
 0x2b5   : > { %v8511_v24 = vpop.permute.xlu1 %2578 }
 0x2b6   : > { %v8513_v37 = vpop.permute.xlu0 %2389  ;;  %v2588_v18 = vsel %vm820_vm4, %v8501_v26, %v8511_v24 }
 0x2b7   : > { %v2399_v10 = vsel %vm630_vm3, %v8499_v22, %v8513_v37 }
 0x2b9   : > { %v8515_v40 = vpop.permute.xlu1 %2769 }
 0x2ba   : > { %v8517_v41 = vpop.permute.xlu0 %2767 }
 0x2bb   : > { %v2777_v23 = vsel %vm1010_vm5, %v8503_v30, %v8517_v41 }
 0x2bd   : > { %v8519_v42 = vpop.permute.xlu1 %2958 }
 0x2be   : > { %v8521_v27 = vpop.permute.xlu0 %2582 }
 0x2c1   : > { %v8523_v43 = vpop.permute.xlu1 %2956 }
 0x2c2   : > { %v8525_v44 = vpop.permute.xlu0 %2960 }
 0x2c5   : > { %v2053_v45 = vpop.permute.xlu1 %2052 }
 0x2c6   : > { %v2057_v38 = vpop.permute.xlu0 %2056 }
 0x2c7   : > { %7783 = vmatprep.subr.mxu0 %v2057_v38 }
 0x2c8   : > { %7784 = vmatpush3.msra.mxu0 %v2057_v38 }
 0x2c9   : > { %v2394_v46 = vpop.permute.xlu1 %2393  ;;  %7785 = vmatprep.subr.mxu0 %v2051_v19 }
 0x2ca   : > { %7786 = vmatpush3.msra.mxu0 %v2051_v19  ;;  %v8530_v48 = vpop.permute.xlu0 %3145 }
 0x2cb   : > { %2260 = vmatprep.subr.mxu0 %v2012_v15  ;;  %7788 = vmatmul.mubr.msk.f32.vlgmr.msra.gmra.mxu0 %vm298_vm1, %v7403_v39 }
 0x2cc   : > { %2261 = vmatpush1.msra.mxu0 %v8426_v21  ;;  %2296 = vmatprep.mubr.f32.mxu0 %v9554_v6  ;;  %v2589_v21 = vsel %vm820_vm4, %v8511_v24, %v8509_v35 }
 0x2cd   : > { %v8538_v54 = vpop.permute.xlu1 %2771  ;;  %2262 = vmatprep.subr.mxu0 %v8405_v29 }
 0x2ce   : > { %2263 = vmatpush1.msra.mxu0 %v8384_v28  ;;  %v8542_v56 = vpop.permute.xlu0 %3143  ;;  %v2400_v28 = vsel %vm630_vm3, %v8513_v37, %v8505_v33 }
 0x2cf   : > { %7408 = vmatmul.mubr.msk.f32.vlgmr.msra.gmra.mxu0 %vm298_vm1, %v7400_v47 }
 0x2d0   : > { %2302 = vmatprep.mubr.f32.mxu0 %v9554_v6 }
 0x2d1   : > { %v2055_v3 = vpop.permute.xlu1 %2054 }
 0x2d2   : > { %v2398_v50 = vpop.permute.xlu0 %2397  ;;  %v2061_v49 = vsel %vm287_vm2, %v2055_v3, %v2057_v38  ;;  %v2060_v59 = vsel %vm287_vm2, %v2053_v45, %v2055_v3 }
 0x2d3   : > { %2102 = vmatprep.subr.mxu1 %v2061_v49  ;;  %7797 = vmatprep.subr.mxu0 %v2398_v50 }
 0x2d4   : > { %2103 = vmatpush1.msra.mxu1 %v2060_v59  ;;  %7798 = vmatpush3.msra.mxu0 %v2398_v50 }
 0x2d5   : > { %v8549_v55 = vpop.permute.xlu1 %3149  ;;  %2104 = vmatprep.subr.mxu1 %v2059_v52  ;;  %7799 = vmatprep.subr.mxu0 %v8505_v33 }
 0x2d6   : > { %2105 = vmatpush1.msra.mxu1 %v2058_v60  ;;  %7800 = vmatpush3.msra.mxu0 %v8505_v33  ;;  %v8554_v1 = vpop.permute.xlu0 %3338  ;;  %v2778_v33 = vsel %vm1010_vm5, %v8517_v41, %v8515_v40 }
 0x2d7   : > { %7404 = vmatmul.mubr.msk.f32.vlgmr.msra.gmra.mxu1 %vm298_vm1, %v8422_v14  ;;  %7790 = vmatprep.subr.mxu1 %v8438_v32 }
 0x2d8   : > { %7791 = vmatpush3.msra.mxu1 %v8438_v32  ;;  %2144 = vmatprep.mubr.f32.mxu1 %v9554_v6  ;;  %v7418_v32 = vld [vmem:[%s9549_s1 + $0xc0] sm:$0xff] }
 0x2d9   : > { %v8567_v5 = vpop.permute.xlu1 %3147  ;;  %7792 = vmatprep.subr.mxu1 %v8394_v12  ;;  %7409 = vmatmul.mubr.msk.f32.gmra.mxu0 %vm298_vm1, %v7401_v63 }
 0x2da   : > { %7793 = vmatpush3.msra.mxu1 %v8394_v12  ;;  %v2585_v4 = vpop.permute.xlu0 %2584  ;;  %7801 = vmatprep.mubr.msk.f32.mxu0 %vm298_vm1, %v7412_v2  ;;  %v3156_v3 = vsel %vm1390_vm7, %v8530_v48, %v8567_v5 }
 0x2db   : > { %7405 = vmatmul.mubr.msk.f32.gmra.mxu1 %vm298_vm1, %v7403_v39  ;;  %v2590_v14 = vsel %vm820_vm4, %v8521_v27, %v2585_v4  ;;  %v7425_v27 = vld [vmem:[%s9549_s1 + $0xd8] sm:$0xff]  ;;  %v7431_v39 = vld [vmem:[%s9549_s1 + $0xe8] sm:$0xff] }
 0x2dc   : > { %7794 = vmatprep.mubr.msk.f32.mxu1 %vm298_vm1, %v7400_v47 }
 0x2dd   : > { %v2396_v7 = vpop.permute.xlu1 %2395  ;;  %7802 = vmatmul.mubr.msk.f32.vlgmr.msra.gmra.mxu0 %vm298_vm1, %v7413_v8 }
 0x2de   : > { %v2774_v9 = vpop.permute.xlu0 %2773  ;;  %v2402_v16 = vsel %vm630_vm3, %v2396_v7, %v2398_v50  ;;  %v2401_v25 = vsel %vm630_vm3, %v2394_v46, %v2396_v7  ;;  %2668 = vmatprep.mubr.f32.mxu0 %v9554_v6  ;;  %v2967_v46 = vsel %vm1200_vm6, %v8523_v43, %v8519_v42 }
 0x2df   : > { %7795 = vmatmul.mubr.msk.f32.vlgmr.msra.gmra.mxu1 %vm298_vm1, %v7401_v63  ;;  %2443 = vmatprep.subr.mxu1 %v2402_v16  ;;  %v2779_v26 = vsel %vm1010_vm5, %v8538_v54, %v2774_v9  ;;  %v7443_v63 = vld [vmem:[%s9549_s1 + $0x108] sm:$0xff] }
 0x2e0   : > { %2444 = vmatpush1.msra.mxu1 %v2401_v25  ;;  %2479 = vmatprep.mubr.f32.mxu1 %v9554_v6  ;;  %v7448_v25 = vld [vmem:[%s9549_s1 + $0x110] sm:$0xff] }
 0x2e1   : > { %v8587_v11 = vpop.permute.xlu1 %3336  ;;  %2445 = vmatprep.subr.mxu1 %v2400_v28  ;;  %v7449_v28 = vld [vmem:[%s9549_s1 + $0x118] sm:$0xff] }
 0x2e2   : > { %2446 = vmatpush1.msra.mxu1 %v2399_v10  ;;  %v8593_v13 = vpop.permute.xlu0 %3332 }
 0x2e3   : > { %7414 = vmatmul.mubr.msk.f32.vlgmr.msra.gmra.mxu1 %vm298_vm1, %v7412_v2 }
 0x2e4   : > { %2485 = vmatprep.mubr.f32.mxu1 %v9554_v6 }
 0x2e5   : > { %v2587_v12 = vpop.permute.xlu1 %2586 }
 0x2e6   : > { %7804 = vmatprep.subr.mxu1 %v2587_v12  ;;  %v2591_v29 = vsel %vm820_vm4, %v2585_v4, %v2587_v12  ;;  %v2963_v20 = vpop.permute.xlu0 %2962 }
 0x2e7   : > { %7415 = vmatmul.mubr.msk.f32.gmra.mxu1 %vm298_vm1, %v7413_v8  ;;  %2632 = vmatprep.subr.mxu0 %v2591_v29  ;;  %v2968_v38 = vsel %vm1200_vm6, %v8525_v44, %v2963_v20  ;;  %v2966_v44 = vsel %vm1200_vm6, %v8507_v34, %v8523_v43  ;;  %v7436_v34 = vld [vmem:[%s9549_s1 + $0xf0] sm:$0xff]  ;;  %v3155_v43 = vsel %vm1390_vm7, %v8542_v56, %v8530_v48  ;;  %v7437_v48 = vld [vmem:[%s9549_s1 + $0xf8] sm:$0xff] }
 0x2e8   : > { %7805 = vmatpush3.msra.mxu1 %v2587_v12  ;;  %2633 = vmatpush1.msra.mxu0 %v2590_v14 }
 0x2e9   : > { %7806 = vmatprep.subr.mxu1 %v8509_v35  ;;  %v2776_v15 = vpop.permute.xlu1 %2775  ;;  %2634 = vmatprep.subr.mxu0 %v2589_v21 }
 0x2ea   : > { %7807 = vmatpush3.msra.mxu1 %v8509_v35  ;;  %2635 = vmatpush1.msra.mxu0 %v2588_v18  ;;  %v2780_v22 = vsel %vm1010_vm5, %v2774_v9, %v2776_v15  ;;  %v7424_v35 = vld [vmem:[%s9549_s1 + $0xd0] sm:$0xff]  ;;  %v3152_v24 = vpop.permute.xlu0 %3151 }
 0x2eb   : > { %7808 = vmatprep.mubr.msk.f32.mxu1 %vm298_vm1, %v7418_v32  ;;  %7420 = vmatmul.mubr.msk.f32.vlgmr.msra.gmra.mxu0 %vm298_vm1, %v7418_v32 }
 0x2ec   : > { %7809 = vmatmul.mubr.msk.f32.vlgmr.msra.gmra.mxu1 %vm298_vm1, %v7419_v17  ;;  %2821 = vmatprep.subr.mxu1 %v2780_v22 }
 0x2ed   : > { %7811 = vmatprep.subr.mxu0 %v2776_v15  ;;  %2822 = vmatpush1.msra.mxu1 %v2779_v26  ;;  %v8620_v19 = vpop.permute.xlu1 %3334 }
 0x2ee   : > { %7812 = vmatpush3.msra.mxu0 %v2776_v15  ;;  %2823 = vmatprep.subr.mxu1 %v2778_v33  ;;  %v8648_v41 = vpop.permute.xlu0 %3523  ;;  %v3345_v2 = vsel %vm1580_vm8, %v8620_v19, %v8587_v11 }
 0x2ef   : > { %7813 = vmatprep.subr.mxu0 %v8515_v40  ;;  %2674 = vmatprep.mubr.f32.mxu0 %v9554_v6 }
 0x2f0   : > { %2824 = vmatpush1.msra.mxu1 %v2777_v23  ;;  %2857 = vmatprep.mubr.f32.mxu1 %v9554_v6 }
 0x2f1   : > { %7814 = vmatpush3.msra.mxu0 %v8515_v40  ;;  %7426 = vmatmul.mubr.msk.f32.vlgmr.msra.gmra.mxu1 %vm298_vm1, %v7424_v35  ;;  %v2965_v37 = vpop.permute.xlu1 %2964  ;;  %v7430_v40 = vld [vmem:[%s9549_s1 + $0xe0] sm:$0xff] }
 0x2f2   : > { %7421 = vmatmul.mubr.msk.f32.gmra.mxu0 %vm298_vm1, %v7419_v17  ;;  %2863 = vmatprep.mubr.f32.mxu1 %v9554_v6  ;;  %v2969_v45 = vsel %vm1200_vm6, %v2963_v20, %v2965_v37  ;;  %v3341_v50 = vpop.permute.xlu0 %3340 }
 0x2f3   : > { %7815 = vmatprep.mubr.msk.f32.mxu0 %vm298_vm1, %v7424_v35  ;;  %7818 = vmatprep.subr.mxu1 %v2965_v37  ;;  %v3346_v60 = vsel %vm1580_vm8, %v8554_v1, %v3341_v50  ;;  %v3344_v1 = vsel %vm1580_vm8, %v8593_v13, %v8620_v19 }
 0x2f4   : > { %3010 = vmatprep.subr.mxu0 %v2969_v45  ;;  %7819 = vmatpush3.msra.mxu1 %v2965_v37 }
 0x2f5   : > { %7427 = vmatmul.mubr.msk.f32.gmra.mxu1 %vm298_vm1, %v7425_v27  ;;  %7820 = vmatprep.subr.mxu1 %v8519_v42  ;;  %v3154_v30 = vpop.permute.xlu1 %3153 }
 0x2f6   : > { %7816 = vmatmul.mubr.msk.f32.vlgmr.msra.gmra.mxu0 %vm298_vm1, %v7425_v27  ;;  %7821 = vmatpush3.msra.mxu1 %v8519_v42  ;;  %v3158_v47 = vsel %vm1390_vm7, %v3152_v24, %v3154_v30  ;;  %v3157_v42 = vsel %vm1390_vm7, %v8549_v55, %v3152_v24  ;;  %v3530_v52 = vpop.permute.xlu0 %3529  ;;  %v7442_v55 = vld [vmem:[%s9549_s1 + $0x100] sm:$0xff] }
 0x2f7   : > { %3011 = vmatpush1.msra.mxu0 %v2968_v38  ;;  %3046 = vmatprep.mubr.f32.mxu0 %v9554_v6 }
 0x2f8   : > { %3012 = vmatprep.subr.mxu0 %v2967_v46  ;;  %7822 = vmatprep.mubr.msk.f32.mxu1 %vm298_vm1, %v7430_v40 }
 0x2f9   : > { %3013 = vmatpush1.msra.mxu0 %v2966_v44  ;;  %7823 = vmatmul.mubr.msk.f32.vlgmr.msra.gmra.mxu1 %vm298_vm1, %v7431_v39  ;;  %v3528_v54 = vpop.permute.xlu1 %3527 }
 0x2fa   : > { %7432 = vmatmul.mubr.msk.f32.vlgmr.msra.gmra.mxu0 %vm298_vm1, %v7430_v40  ;;  %3199 = vmatprep.subr.mxu1 %v3158_v47  ;;  %v3535_v8 = vsel %vm1770_vm9, %v3528_v54, %v3530_v52  ;;  %v3522_v7 = vpop.permute.xlu0 %3521 }
 0x2fb   : > { %7825 = vmatprep.subr.mxu0 %v3154_v30  ;;  %3200 = vmatpush1.msra.mxu1 %v3157_v42  ;;  %v3533_v16 = vsel %vm1770_vm9, %v3522_v7, %v8648_v41 }
 0x2fc   : > { %7826 = vmatpush3.msra.mxu0 %v3154_v30  ;;  %3201 = vmatprep.subr.mxu1 %v3156_v3 }
 0x2fd   : > { %7827 = vmatprep.subr.mxu0 %v8567_v5  ;;  %3052 = vmatprep.mubr.f32.mxu0 %v9554_v6  ;;  %v3343_v49 = vpop.permute.xlu1 %3342 }
 0x2fe   : > { %3202 = vmatpush1.msra.mxu1 %v3155_v43  ;;  %3235 = vmatprep.mubr.f32.mxu1 %v9554_v6  ;;  %v3347_v59 = vsel %vm1580_vm8, %v3341_v50, %v3343_v49 }
 0x2ff   : > { %7828 = vmatpush3.msra.mxu0 %v8567_v5  ;;  %7438 = vmatmul.mubr.msk.f32.vlgmr.msra.gmra.mxu1 %vm298_vm1, %v7436_v34 }
 0x300   : > { %7433 = vmatmul.mubr.msk.f32.gmra.mxu0 %vm298_vm1, %v7431_v39  ;;  %3241 = vmatprep.mubr.f32.mxu1 %v9554_v6 }
 0x301   : > { %7829 = vmatprep.mubr.msk.f32.mxu0 %vm298_vm1, %v7436_v34  ;;  %7832 = vmatprep.subr.mxu1 %v3343_v49  ;;  %v3532_v56 = vpop.permute.xlu1 %3531 }
 0x302   : > { %3388 = vmatprep.subr.mxu0 %v3347_v59  ;;  %7833 = vmatpush3.msra.mxu1 %v3343_v49  ;;  %v3536_v5 = vsel %vm1770_vm9, %v3530_v52, %v3532_v56 }
 0x303   : > { %7439 = vmatmul.mubr.msk.f32.gmra.mxu1 %vm298_vm1, %v7437_v48  ;;  %7834 = vmatprep.subr.mxu1 %v8587_v11 }
 0x304   : > { %7830 = vmatmul.mubr.msk.f32.vlgmr.msra.gmra.mxu0 %vm298_vm1, %v7437_v48  ;;  %7835 = vmatpush3.msra.mxu1 %v8587_v11 }
 0x305   : > { %3389 = vmatpush1.msra.mxu0 %v3346_v60  ;;  %3424 = vmatprep.mubr.f32.mxu0 %v9554_v6  ;;  %v3526_v4 = vpop.permute.xlu1 %3525 }
 0x306   : > { %3390 = vmatprep.subr.mxu0 %v3345_v2  ;;  %7836 = vmatprep.mubr.msk.f32.mxu1 %vm298_vm1, %v7442_v55  ;;  %v3534_v9 = vsel %vm1770_vm9, %v8648_v41, %v3526_v4 }
 0x307   : > { %3391 = vmatpush1.msra.mxu0 %v3344_v1  ;;  %7837 = vmatmul.mubr.msk.f32.vlgmr.msra.gmra.mxu1 %vm298_vm1, %v7443_v63 }
 0x308   : > { %7444 = vmatmul.mubr.msk.f32.vlgmr.msra.gmra.mxu0 %vm298_vm1, %v7442_v55  ;;  %3577 = vmatprep.subr.mxu1 %v3536_v5 }
 0x309   : > { %7839 = vmatprep.subr.mxu0 %v3532_v56  ;;  %3578 = vmatpush1.msra.mxu1 %v3535_v8 }
 0x30a   : > { %7840 = vmatpush3.msra.mxu0 %v3532_v56  ;;  %3430 = vmatprep.mubr.f32.mxu0 %v9554_v6 }
 0x30b   : > { %7841 = vmatprep.subr.mxu0 %v3526_v4  ;;  %3579 = vmatprep.subr.mxu1 %v3534_v9 }
 0x30c   : > { %7445 = vmatmul.mubr.msk.f32.gmra.mxu0 %vm298_vm1, %v7443_v63  ;;  %3580 = vmatpush1.msra.mxu1 %v3533_v16 }
 0x30d   : > { %7842 = vmatpush3.msra.mxu0 %v3526_v4  ;;  %3613 = vmatprep.mubr.f32.mxu1 %v9554_v6 }
 0x30e   : > { %7450 = vmatmul.mubr.msk.f32.vlgmr.msra.gmra.mxu1 %vm298_vm1, %v7448_v25  ;;  %7843 = vmatprep.mubr.msk.f32.mxu0 %vm298_vm1, %v7448_v25 }
 0x30f   : > { %3619 = vmatprep.mubr.f32.mxu1 %v9554_v6 }
 0x310   : > { %7844 = vmatmul.mubr.msk.f32.vlgmr.msra.gmra.mxu0 %vm298_vm1, %v7449_v28 }
 0x311   : > { %3895 = vmatprep.mubr.f32.mxu0 %v9554_v6 }
 0x312   : > { %7451 = vmatmul.mubr.msk.f32.gmra.mxu1 %vm298_vm1, %v7449_v28 }
 0x38b   : > { %v7789_v11 = vpop.f32.mrf.mxu0 }
 0x38d   : > { %v2217_v10 = vpop.f32.mrf.mxu0 }
 0x38f   : > { %v2298_v12 = vpop.f32.mrf.mxu0 }
 0x391   : > { %v2300_v14 = vpop.f32.mrf.mxu0 }
 0x397   : > { %v2140_v13 = vpop.f32.mrf.mxu1 }
 0x398   : > { %v2299_v49 = vadd.f32 %v2298_v12, %v2140_v13 }
 0x399   : > { %v2142_v29 = vpop.f32.mrf.mxu1  ;;  %v2304_v15 = vpop.f32.mrf.mxu0 }
 0x39a   : > { %v2301_v52 = vadd.f32 %v2300_v14, %v2142_v29 }
 0x39b   : > { %v2146_v21 = vpop.f32.mrf.mxu1  ;;  %v2306_v20 = vpop.f32.mrf.mxu0 }
 0x39c   : > { %v2305_v5 = vadd.f32 %v2304_v15, %v2146_v21 }
 0x39d   : > { %v2148_v32 = vpop.f32.mrf.mxu1  ;;  %v7803_v26 = vpop.f32.mrf.mxu0 }
 0x39e   : > { %v2307_v0 = vadd.f32 %v2306_v20, %v2148_v32 }
 0x39f   : > { %v7796_v18 = vpop.f32.mrf.mxu1  ;;  %v2558_v35 = vpop.f32.mrf.mxu0 }
 0x3a0   : > { %v2381_v59 = vadd.f32 %v7796_v18, %v7789_v11 }
 0x3a1   : > { %v2375_v17 = vpop.f32.mrf.mxu1 }
 0x3a2   : > { %v2376_v63 = vadd.f32 %v2375_v17, %v2217_v10  ;;  %v2572_v4 = vadd.f32 %v7803_v26, %v2381_v59 }
 0x3a3   : > { %v2481_v22 = vpop.f32.mrf.mxu1 }
 0x3a4   : > { %v2567_v55 = vadd.f32 %v2481_v22, %v2299_v49  ;;  %v2569_v13 = vadd.f32 %v2558_v35, %v2376_v63 }
 0x3a5   : > { %v2483_v19 = vpop.f32.mrf.mxu1 }
 0x3a6   : > { %v2568_v1 = vadd.f32 %v2483_v19, %v2301_v52 }
 0x3a7   : > { %v2487_v33 = vpop.f32.mrf.mxu1 }
 0x3a8   : > { %v2570_v16 = vadd.f32 %v2487_v33, %v2305_v5 }
 0x3a9   : > { %v2489_v23 = vpop.f32.mrf.mxu1 }
 0x3aa   : > { %v2571_v10 = vadd.f32 %v2489_v23, %v2307_v0  ;;  %v3713_v0 = vpop.permute.xlu0 %3712 }
 0x3ab   : > { %v2670_v24 = vpop.f32.mrf.mxu0 }
 0x3ac   : > { %v7810_v37 = vpop.f32.mrf.mxu1  ;;  %v2756_v8 = vadd.f32 %v2670_v24, %v2567_v55 }
 0x3ad   : > { %v2672_v27 = vpop.f32.mrf.mxu0  ;;  %v2761_v25 = vadd.f32 %v7810_v37, %v2572_v4 }
 0x3ae   : > { %v2747_v45 = vpop.f32.mrf.mxu1  ;;  %v2757_v28 = vadd.f32 %v2672_v27, %v2568_v1 }
 0x3af   : > { %v2758_v17 = vadd.f32 %v2747_v45, %v2569_v13 }
 0x3b1   : > { %v2859_v30 = vpop.f32.mrf.mxu1 }
 0x3b2   : > { %v2676_v40 = vpop.f32.mrf.mxu0  ;;  %v2945_v6 = vadd.f32 %v2859_v30, %v2756_v8 }
 0x3b3   : > { %v2861_v41 = vpop.f32.mrf.mxu1  ;;  %v2759_v18 = vadd.f32 %v2676_v40, %v2570_v16 }
 0x3b4   : > { %v2678_v38 = vpop.f32.mrf.mxu0  ;;  %v2946_v29 = vadd.f32 %v2861_v41, %v2757_v28 }
 0x3b5   : > { %v2865_v39 = vpop.f32.mrf.mxu1  ;;  %v2760_v33 = vadd.f32 %v2678_v38, %v2571_v10 }
 0x3b6   : > { %v7817_v46 = vpop.f32.mrf.mxu0  ;;  %v2948_v15 = vadd.f32 %v2865_v39, %v2759_v18 }
 0x3b7   : > { %v2867_v47 = vpop.f32.mrf.mxu1  ;;  %v2950_v14 = vadd.f32 %v7817_v46, %v2761_v25 }
 0x3b8   : > { %v2936_v44 = vpop.f32.mrf.mxu0  ;;  %v2949_v40 = vadd.f32 %v2867_v47, %v2760_v33 }
 0x3b9   : > { %v7824_v54 = vpop.f32.mrf.mxu1  ;;  %v2947_v37 = vadd.f32 %v2936_v44, %v2758_v17 }
 0x3ba   : > { %v3048_v42 = vpop.f32.mrf.mxu0  ;;  %v3139_v26 = vadd.f32 %v7824_v54, %v2950_v14 }
 0x3bb   : > { %v3125_v3 = vpop.f32.mrf.mxu1  ;;  %v3134_v22 = vadd.f32 %v3048_v42, %v2945_v6 }
 0x3bc   : > { %v3050_v50 = vpop.f32.mrf.mxu0  ;;  %v3136_v41 = vadd.f32 %v3125_v3, %v2947_v37 }
 0x3bd   : > { %v3135_v19 = vadd.f32 %v3050_v50, %v2946_v29 }
 0x3bf   : > { %v3237_v34 = vpop.f32.mrf.mxu1 }
 0x3c0   : > { %v3054_v43 = vpop.f32.mrf.mxu0  ;;  %v3323_v24 = vadd.f32 %v3237_v34, %v3134_v22  ;;  %v3718_v34 = vpop.permute.xlu1 %3717 }
 0x3c1   : > { %v3239_v48 = vpop.f32.mrf.mxu1  ;;  %v3137_v32 = vadd.f32 %v3054_v43, %v2948_v15 }
 0x3c2   : > { %v3056_v56 = vpop.f32.mrf.mxu0  ;;  %v3324_v20 = vadd.f32 %v3239_v48, %v3135_v19 }
 0x3c3   : > { %v3243_v60 = vpop.f32.mrf.mxu1  ;;  %v3138_v42 = vadd.f32 %v3056_v56, %v2949_v40 }
 0x3c4   : > { %v7831_v2 = vpop.f32.mrf.mxu0  ;;  %v3326_v23 = vadd.f32 %v3243_v60, %v3137_v32 }
 0x3c5   : > { %v3245_v7 = vpop.f32.mrf.mxu1  ;;  %v3328_v35 = vadd.f32 %v7831_v2, %v3139_v26 }
 0x3c6   : > { %v3314_v9 = vpop.f32.mrf.mxu0  ;;  %v3327_v55 = vadd.f32 %v3245_v7, %v3138_v42 }
 0x3c7   : > { %v7838_v12 = vpop.f32.mrf.mxu1  ;;  %v3325_v50 = vadd.f32 %v3314_v9, %v3136_v41  ;;  %v8811_v41 = vld [vmem:[%s9549_s1 + $0x130] sm:$0xff] }
 0x3c8   : > { %v3426_v11 = vpop.f32.mrf.mxu0  ;;  %v3517_v45 = vadd.f32 %v7838_v12, %v3328_v35  ;;  %7850 = vmatprep.mubr.msk.f32.mxu1 %vm298_vm1, %v8811_v41 }
 0x3c9   : > { %v3503_v27 = vpop.f32.mrf.mxu1  ;;  %v3512_v49 = vadd.f32 %v3426_v11, %v3323_v24 }
 0x3ca   : > { %v3428_v21 = vpop.f32.mrf.mxu0  ;;  %v3514_v47 = vadd.f32 %v3503_v27, %v3325_v50 }
 0x3cb   : > { %v3513_v39 = vadd.f32 %v3428_v21, %v3324_v20 }
 0x3cc   : > { %v3432_v30 = vpop.f32.mrf.mxu0 }
 0x3cd   : > { %v3515_v59 = vadd.f32 %v3432_v30, %v3326_v23  ;;  %v7511_v23 = vld [vmem:[%s9550_s2 + $0x28] sm:$0xff] }
 0x3ce   : > { %v3434_v46 = vpop.f32.mrf.mxu0  ;;  %v3615_v6 = vpop.f32.mrf.mxu1 }
 0x3cf   : > { %v3701_v54 = vadd.f32 %v3615_v6, %v3512_v49  ;;  %v3516_v4 = vadd.f32 %v3434_v46, %v3327_v55 }
 0x3d0   : > { %v3617_v38 = vpop.f32.mrf.mxu1  ;;  %v7845_v44 = vpop.f32.mrf.mxu0 }
 0x3d1   : > { %v3720_v43 = vadd.f32 %v3713_v0, %v3701_v54  ;;  %v3702_v48 = vadd.f32 %v3617_v38, %v3513_v39  ;;  %v3706_v52 = vadd.f32 %v7845_v44, %v3517_v45 }
 0x3d2   : > { %v3621_v3 = vpop.f32.mrf.mxu1  ;;  %v3692_v60 = vpop.f32.mrf.mxu0 }
 0x3d3   : > { %v3726_v56 = vadd.f32 %v3720_v43, %v8285_v62  ;;  %v3721_v63 = vadd.f32 %v3713_v0, %v3702_v48  ;;  %v3725_v2 = vadd.f32 %v3718_v34, %v3706_v52  ;;  %v3704_v5 = vadd.f32 %v3621_v3, %v3515_v59 }
 0x3d4   : > { %v3703_v1 = vadd.f32 %v3692_v60, %v3514_v47  ;;  %v3623_v8 = vpop.f32.mrf.mxu1 }
 0x3d5   : > { %3732 = vst [vmem:[%s8738_s12] sm:$0xff] %v3726_v56  ;;  %v3739_v7 = vmax.f32 %v3726_v56, 0.0  ;;  %v3727_v9 = vadd.f32 %v3721_v63, %v8282_v61  ;;  %v3731_v16 = vadd.f32 %v3725_v2, %v8253_v51  ;;  %v3723_v25 = vadd.f32 %v3718_v34, %v3704_v5  ;;  %v7459_v5 = vld [vmem:[%s9549_s1 + $0x138] sm:$0xff] }
 0x3d6   : > { %v3722_v28 = vadd.f32 %v3713_v0, %v3703_v1  ;;  %v3705_v62 = vadd.f32 %v3623_v8, %v3516_v4  ;;  %v7510_v0 = vld [vmem:[%s9550_s2 + $0x20] sm:$0xff]  ;;  %v9562_v8 = vmov 0.0  }
 0x3d7   : > { %3733 = vst [vmem:[%s8738_s12 + $0x8] sm:$0xff] %v3727_v9  ;;  %3738 = vst.msk [vmem:[%s8738_s12 + $0x28] sm:$0xff] %vm3734_vm13, %v3731_v16  ;;  %v3744_v13 = vmax.f32 %v3731_v16, 0.0  ;;  %v3729_v11 = vadd.f32 %v3723_v25, %v8270_v57  ;;  %v3745_v12 = vmul.f32 %v3739_v7, %v8364_v36  ;;  %v3740_v57 = vmax.f32 %v3727_v9, 0.0  ;;  %v7456_v7 = vld [vmem:[%s9549_s1 + $0x120] sm:$0xff]  ;;  %v7457_v25 = vld [vmem:[%s9549_s1 + $0x128] sm:$0xff] }
 0x3d8   : > { %v3728_v18 = vadd.f32 %v3722_v28, %v8274_v58  ;;  %v3724_v29 = vadd.f32 %v3718_v34, %v3705_v62  ;;  %v9561_v58 = vld [vmem:[#allocation4_spill] sm:$0xff] }
 0x3d9   : > { %3736 = vst [vmem:[%s8738_s12 + $0x18] sm:$0xff] %v3729_v11  ;;  %v3742_v61 = vmax.f32 %v3729_v11, 0.0  ;;  %3757 = vrot.lane.b32.xlu0 %v3745_v12, %s8013_s25  ;;  %v3750_v51 = vmul.f32 %v3744_v13, %v8362_v31  ;;  %v3746_v15 = vmul.f32 %v3740_v57, %v9561_v58  ;;  %v7468_v12 = vld [vmem:[%s9549_s1 + $0x140] sm:$0xff] }
 0x3da   : > { %3735 = vst.msk [vmem:[%s8738_s12 + $0x10] sm:$0xff] %vm3734_vm13, %v3728_v18  ;;  %v3730_v14 = vadd.f32 %v3724_v29, %v8259_v53  ;;  %v3741_v17 = vmax.f32 %v3728_v18, 0.0 }
 0x3db   : > { %3767 = vrot.lane.b32.xlu1 %v3750_v51, %s8013_s25  ;;  %v3748_v10 = vmul.f32 %v3742_v61, %v8364_v36 }
 0x3dc   : > { %3737 = vst [vmem:[%s8738_s12 + $0x20] sm:$0xff] %v3730_v14  ;;  %v3743_v22 = vmax.f32 %v3730_v14, 0.0  ;;  %v3747_v26 = vmul.f32 %v3741_v17, %v8362_v31  ;;  %v7469_v14 = vld [vmem:[%s9549_s1 + $0x148] sm:$0xff] }
 0x3de   : > { %v3749_v21 = vmul.f32 %v3743_v22, %v9561_v58 }
 0x3df   : > { %3763 = vrot.lane.b32.xlu1 %v3748_v10, %s8013_s25 }
 0x3e0   : > { %3765 = vrot.lane.b32.xlu0 %v3749_v21, %s8013_s25 }
 0x3e3   : > { %3759 = vrot.lane.b32.xlu1 %v3746_v15, %s8013_s25 }
 0x3e4   : > { %3761 = vrot.lane.b32.xlu0 %v3747_v26, %s8013_s25 }
 0x44b   : > { %v3758_v53 = vpop.permute.xlu0 %3757 }
 0x44c   : > { %3779 = vst.msk [vmem:[#allocation2] sm:$0xff] %vm2020_vm10, %v3758_v53 }
 0x44d   : > { %v3768_v19 = vpop.permute.xlu1 %3767 }
 0x451   : > { %v3764_v24 = vpop.permute.xlu1 %3763 }
 0x452   : > { %3782 = vst.msk [vmem:[#allocation2 + $0x18] sm:$0xff] %vm2020_vm10, %v3764_v24  ;;  %v3766_v33 = vpop.permute.xlu0 %3765 }
 0x453   : > { %v8769_v37 = vsel %vm2009_vm11, %v3764_v24, %v3766_v33  ;;  %v3772_v27 = vsel %vm2009_vm11, %v3766_v33, %v3768_v19  ;;  %v8772_v30 = vld [vmem:[#allocation2] sm:$0xff] }
 0x454   : > { %3784 = vst.msk [vmem:[#allocation2 + $0x28] sm:$0xff] %vm2023_vm12, %v3772_v27  ;;  %3803 = vrot.lane.b32.xlu0 %v8772_v30, %s8003_s24 }
 0x455   : > { %v3760_v32 = vpop.permute.xlu1 %3759 }
 0x456   : > { %v8778_v20 = vsel %vm2009_vm11, %v3758_v53, %v3760_v32  ;;  %v3762_v35 = vpop.permute.xlu0 %3761 }
 0x457   : > { %v3770_v49 = vsel %vm2009_vm11, %v3760_v32, %v3762_v35  ;;  %v7474_v32 = vld [vmem:[%s9549_s1 + $0x150] sm:$0xff] }
 0x458   : > { %3781 = vst.msk [vmem:[#allocation2 + $0x10] sm:$0xff] %vm2023_vm12, %v3770_v49  ;;  %4144 = vrot.lane.b32.xlu0 %v8772_v30, %s8005_s27  ;;  %v7475_v49 = vld [vmem:[%s9549_s1 + $0x158] sm:$0xff] }
 0x459   : > { %v8813_v46 = vld [vmem:[#allocation2 + $0x18] sm:$0xff] }
 0x45b   : > { %v8825_v6 = vld [vmem:[#allocation2 + $0x28] sm:$0xff] }
 0x45c   : > { %4333 = vrot.lane.b32.xlu0 %v8772_v30, %s8006_s28 }
 0x45f   : > { %v8786_v40 = vld [vmem:[#allocation2 + $0x10] sm:$0xff] }
 0x460   : > { %3807 = vrot.lane.b32.xlu1 %v8786_v40, %s8003_s24  ;;  %4522 = vrot.lane.b32.xlu0 %v8772_v30, %s8007_s29 }
 0x464   : > { %4148 = vrot.lane.b32.xlu1 %v8786_v40, %s8005_s27  ;;  %4711 = vrot.lane.b32.xlu0 %v8772_v30, %s8008_s30 }
 0x468   : > { %4337 = vrot.lane.b32.xlu1 %v8786_v40, %s8006_s28  ;;  %3805 = vrot.lane.b32.xlu0 %v8778_v20, %s8003_s24 }
 0x46c   : > { %4335 = vrot.lane.b32.xlu1 %v8778_v20, %s8006_s28  ;;  %4146 = vrot.lane.b32.xlu0 %v8778_v20, %s8005_s27 }
 0x470   : > { %4526 = vrot.lane.b32.xlu1 %v8786_v40, %s8007_s29  ;;  %4524 = vrot.lane.b32.xlu0 %v8778_v20, %s8007_s29 }
 0x474   : > { %4715 = vrot.lane.b32.xlu1 %v8786_v40, %s8008_s30  ;;  %4339 = vrot.lane.b32.xlu0 %v8813_v46, %s8006_s28 }
 0x478   : > { %4713 = vrot.lane.b32.xlu1 %v8778_v20, %s8008_s30  ;;  %4717 = vrot.lane.b32.xlu0 %v8813_v46, %s8008_s30 }
 0x47c   : > { %3809 = vrot.lane.b32.xlu1 %v8813_v46, %s8003_s24  ;;  %3813 = vrot.lane.b32.xlu0 %v8825_v6, %s8003_s24 }
 0x480   : > { %4150 = vrot.lane.b32.xlu1 %v8813_v46, %s8005_s27  ;;  %4902 = vrot.lane.b32.xlu0 %v8778_v20, %s8009_s6 }
 0x484   : > { %4528 = vrot.lane.b32.xlu1 %v8813_v46, %s8007_s29  ;;  %4900 = vrot.lane.b32.xlu0 %v8772_v30, %s8009_s6 }
 0x488   : > { %3811 = vrot.lane.b32.xlu1 %v8769_v37, %s8003_s24  ;;  %4154 = vrot.lane.b32.xlu0 %v8825_v6, %s8005_s27 }
 0x48c   : > { %4906 = vrot.lane.b32.xlu1 %v8813_v46, %s8009_s6  ;;  %5095 = vrot.lane.b32.xlu0 %v8813_v46, %s8010_s7 }
 0x490   : > { %4904 = vrot.lane.b32.xlu1 %v8786_v40, %s8009_s6  ;;  %4341 = vrot.lane.b32.xlu0 %v8769_v37, %s8006_s28 }
 0x494   : > { %4152 = vrot.lane.b32.xlu1 %v8769_v37, %s8005_s27  ;;  %4530 = vrot.lane.b32.xlu0 %v8769_v37, %s8007_s29 }
 0x498   : > { %5093 = vrot.lane.b32.xlu1 %v8786_v40, %s8010_s7  ;;  %5089 = vrot.lane.b32.xlu0 %v8772_v30, %s8010_s7 }
 0x49c   : > { %4343 = vrot.lane.b32.xlu1 %v8825_v6, %s8006_s28  ;;  %4719 = vrot.lane.b32.xlu0 %v8769_v37, %s8008_s30 }
 0x4a0   : > { %4532 = vrot.lane.b32.xlu1 %v8825_v6, %s8007_s29  ;;  %4908 = vrot.lane.b32.xlu0 %v8769_v37, %s8009_s6 }
 0x4a4   : > { %5091 = vrot.lane.b32.xlu1 %v8778_v20, %s8010_s7  ;;  %5280 = vrot.lane.b32.xlu0 %v8778_v20, %s8011_s8 }
 0x4a8   : > { %4721 = vrot.lane.b32.xlu1 %v8825_v6, %s8008_s30  ;;  %5097 = vrot.lane.b32.xlu0 %v8769_v37, %s8010_s7 }
 0x4ac   : > { %4910 = vrot.lane.b32.xlu1 %v8825_v6, %s8009_s6  ;;  %5286 = vrot.lane.b32.xlu0 %v8769_v37, %s8011_s8 }
 0x4b0   : > { %5284 = vrot.lane.b32.xlu1 %v8813_v46, %s8011_s8  ;;  %5278 = vrot.lane.b32.xlu0 %v8772_v30, %s8011_s8 }
 0x4b4   : > { %5099 = vrot.lane.b32.xlu1 %v8825_v6, %s8010_s7  ;;  %5469 = vperm.xlu0 %7993, %v7510_v0  }
 0x4b8   : > { %5288 = vrot.lane.b32.xlu1 %v8825_v6, %s8011_s8 }
 0x4bc   : > { %5282 = vrot.lane.b32.xlu1 %v8786_v40, %s8011_s8 }
 0x4c0   : > { %5474 = vperm.xlu1 %7994, %v7511_v23   ;;  %v7480_v23 = vld [vmem:[%s9549_s1 + $0x160] sm:$0xff] }
 0x4c6   : > { %v3804_v45 = vpop.permute.xlu0 %3803 }
 0x4ca   : > { %v8895_v39 = vpop.permute.xlu0 %4144 }
 0x4ce   : > { %v8897_v54 = vpop.permute.xlu0 %4333 }
 0x4d2   : > { %v3808_v42 = vpop.permute.xlu1 %3807  ;;  %v8899_v50 = vpop.permute.xlu0 %4522 }
 0x4d6   : > { %v8901_v38 = vpop.permute.xlu1 %4148  ;;  %v8903_v44 = vpop.permute.xlu0 %4711 }
 0x4da   : > { %v8905_v34 = vpop.permute.xlu1 %4337  ;;  %v3806_v59 = vpop.permute.xlu0 %3805 }
 0x4db   : > { %v3816_v18 = vsel %vm287_vm2, %v3806_v59, %v3808_v42  ;;  %v3815_v29 = vsel %vm287_vm2, %v3804_v45, %v3806_v59 }
 0x4de   : > { %v8907_v43 = vpop.permute.xlu1 %4335  ;;  %v8909_v48 = vpop.permute.xlu0 %4146 }
 0x4df   : > { %v4157_v26 = vsel %vm630_vm3, %v8909_v48, %v8901_v38  ;;  %v4156_v53 = vsel %vm630_vm3, %v8895_v39, %v8909_v48  ;;  %v4345_v35 = vsel %vm820_vm4, %v8897_v54, %v8907_v43  ;;  %v7487_v48 = vld [vmem:[%s9549_s1 + $0x178] sm:$0xff] }
 0x4e2   : > { %v8911_v52 = vpop.permute.xlu1 %4526  ;;  %v8913_v55 = vpop.permute.xlu0 %4524 }
 0x4e3   : > { %v9032_v0 = vsel %vm1010_vm5, %v8913_v55, %v8911_v52  ;;  %v9042_v45 = vsel %vm1010_vm5, %v8899_v50, %v8913_v55 }
 0x4e6   : > { %v8915_v47 = vpop.permute.xlu1 %4715  ;;  %v8917_v3 = vpop.permute.xlu0 %4339 }
 0x4ea   : > { %v8919_v60 = vpop.permute.xlu1 %4713  ;;  %v8921_v56 = vpop.permute.xlu0 %4717 }
 0x4eb   : > { %v4724_v55 = vsel %vm1200_vm6, %v8919_v60, %v8915_v47 }
 0x4ee   : > { %v3810_v63 = vpop.permute.xlu1 %3809  ;;  %v3814_v2 = vpop.permute.xlu0 %3813 }
 0x4ef   : > { %7846 = vmatprep.subr.mxu1 %v3814_v2 }
 0x4f0   : > { %7847 = vmatpush3.msra.mxu1 %v3814_v2 }
 0x4f1   : > { %7848 = vmatprep.subr.mxu1 %v3808_v42 }
 0x4f2   : > { %v4151_v4 = vpop.permute.xlu1 %4150  ;;  %7849 = vmatpush3.msra.mxu1 %v3808_v42  ;;  %v8926_v1 = vpop.permute.xlu0 %4902  ;;  %v7481_v42 = vld [vmem:[%s9549_s1 + $0x168] sm:$0xff] }
 0x4f3   : > { %4017 = vmatprep.subr.mxu1 %v8769_v37  ;;  %7851 = vmatmul.mubr.msk.f32.vlgmr.msra.gmra.mxu1 %vm298_vm1, %v7459_v5 }
 0x4f4   : > { %4018 = vmatpush1.msra.mxu1 %v8813_v46  ;;  %4053 = vmatprep.mubr.f32.mxu1 %v9562_v8 }
 0x4f5   : > { %4019 = vmatprep.subr.mxu1 %v8778_v20 }
 0x4f6   : > { %v8936_v9 = vpop.permute.xlu1 %4528  ;;  %4020 = vmatpush1.msra.mxu1 %v8772_v30  ;;  %v8939_v16 = vpop.permute.xlu0 %4900  ;;  %v4346_v30 = vsel %vm820_vm4, %v8907_v43, %v8905_v34 }
 0x4f7   : > { %7464 = vmatmul.mubr.msk.f32.vlgmr.msra.gmra.mxu1 %vm298_vm1, %v7456_v7 }
 0x4f8   : > { %4059 = vmatprep.mubr.f32.mxu1 %v9562_v8 }
 0x4fa   : > { %v3812_v28 = vpop.permute.xlu1 %3811  ;;  %v4155_v62 = vpop.permute.xlu0 %4154 }
 0x4fb   : > { %v3817_v13 = vsel %vm287_vm2, %v3810_v63, %v3812_v28  ;;  %v3818_v11 = vsel %vm287_vm2, %v3812_v28, %v3814_v2  ;;  %7860 = vmatprep.subr.mxu1 %v4155_v62  ;;  %7465 = vmatmul.mubr.msk.f32.gmra.mxu1 %vm298_vm1, %v7457_v25 }
 0x4fc   : > { %3859 = vmatprep.subr.mxu0 %v3818_v11  ;;  %7861 = vmatpush3.msra.mxu1 %v4155_v62 }
 0x4fd   : > { %3860 = vmatpush1.msra.mxu0 %v3817_v13  ;;  %7862 = vmatprep.subr.mxu1 %v8901_v38 }
 0x4fe   : > { %v8955_v61 = vpop.permute.xlu1 %4906  ;;  %3861 = vmatprep.subr.mxu0 %v3816_v18  ;;  %7863 = vmatpush3.msra.mxu1 %v8901_v38  ;;  %v8958_v51 = vpop.permute.xlu0 %5095 }
 0x4ff   : > { %3862 = vmatpush1.msra.mxu0 %v3815_v29  ;;  %7864 = vmatprep.mubr.msk.f32.mxu1 %vm298_vm1, %v7468_v12 }
 0x500   : > { %7460 = vmatmul.mubr.msk.f32.vlgmr.msra.gmra.mxu0 %vm298_vm1, %v8811_v41  ;;  %7853 = vmatprep.subr.mxu0 %v8825_v6 }
 0x501   : > { %7854 = vmatpush3.msra.mxu0 %v8825_v6  ;;  %3901 = vmatprep.mubr.f32.mxu0 %v9562_v8 }
 0x502   : > { %v8969_v22 = vpop.permute.xlu1 %4904  ;;  %7855 = vmatprep.subr.mxu0 %v8786_v40  ;;  %v4342_v57 = vpop.permute.xlu0 %4341  ;;  %7865 = vmatmul.mubr.msk.f32.vlgmr.msra.gmra.mxu1 %vm298_vm1, %v7469_v14 }
 0x503   : > { %7856 = vmatpush3.msra.mxu0 %v8786_v40  ;;  %4425 = vmatprep.mubr.f32.mxu1 %v9562_v8  ;;  %v4347_v27 = vsel %vm820_vm4, %v8917_v3, %v4342_v57 }
 0x504   : > { %7461 = vmatmul.mubr.msk.f32.gmra.mxu0 %vm298_vm1, %v7459_v5  ;;  %v4912_v5 = vsel %vm1390_vm7, %v8939_v16, %v8926_v1 }
 0x505   : > { %7857 = vmatprep.mubr.msk.f32.mxu0 %vm298_vm1, %v7456_v7 }
 0x506   : > { %v4153_v10 = vpop.permute.xlu1 %4152  ;;  %v4531_v21 = vpop.permute.xlu0 %4530 }
 0x507   : > { %v4158_v17 = vsel %vm630_vm3, %v4151_v4, %v4153_v10  ;;  %v4159_v15 = vsel %vm630_vm3, %v4153_v10, %v4155_v62  ;;  %v9021_v46 = vsel %vm1010_vm5, %v8936_v9, %v4531_v21  ;;  %v7499_v62 = vld [vmem:[%s9549_s1 + $0x198] sm:$0xff] }
 0x508   : > { %7858 = vmatmul.mubr.msk.f32.vlgmr.msra.gmra.mxu0 %vm298_vm1, %v7457_v25  ;;  %4200 = vmatprep.subr.mxu0 %v4159_v15  ;;  %9564 = vst [vmem:[#allocation5_spill] sm:$0xff] %v9021_v46  ;;  %v7498_v25 = vld [vmem:[%s9549_s1 + $0x190] sm:$0xff] }
 0x509   : > { %4201 = vmatpush1.msra.mxu0 %v4158_v17  ;;  %4236 = vmatprep.mubr.f32.mxu0 %v9562_v8 }
 0x50a   : > { %v8987_v19 = vpop.permute.xlu1 %5093  ;;  %4202 = vmatprep.subr.mxu0 %v4157_v26  ;;  %v8990_v24 = vpop.permute.xlu0 %5089 }
 0x50b   : > { %4203 = vmatpush1.msra.mxu0 %v4156_v53 }
 0x50c   : > { %7470 = vmatmul.mubr.msk.f32.vlgmr.msra.gmra.mxu0 %vm298_vm1, %v7468_v12 }
 0x50d   : > { %4242 = vmatprep.mubr.f32.mxu0 %v9562_v8 }
 0x50e   : > { %v4344_v33 = vpop.permute.xlu1 %4343  ;;  %v4720_v40 = vpop.permute.xlu0 %4719 }
 0x50f   : > { %7867 = vmatprep.subr.mxu0 %v4344_v33  ;;  %v4348_v37 = vsel %vm820_vm4, %v4342_v57, %v4344_v33  ;;  %v4725_v59 = vsel %vm1200_vm6, %v8921_v56, %v4720_v40  ;;  %v4723_v56 = vsel %vm1200_vm6, %v8903_v44, %v8919_v60  ;;  %v7492_v60 = vld [vmem:[%s9549_s1 + $0x180] sm:$0xff]  ;;  %v7505_v57 = vld [vmem:[%s9549_s1 + $0x1a8] sm:$0xff] }
 0x510   : > { %7471 = vmatmul.mubr.msk.f32.gmra.mxu0 %vm298_vm1, %v7469_v14  ;;  %4389 = vmatprep.subr.mxu1 %v4348_v37 }
 0x511   : > { %7868 = vmatpush3.msra.mxu0 %v4344_v33  ;;  %4390 = vmatpush1.msra.mxu1 %v4347_v27 }
 0x512   : > { %7869 = vmatprep.subr.mxu0 %v8905_v34  ;;  %v9004_v20 = vpop.permute.xlu1 %4532  ;;  %4391 = vmatprep.subr.mxu1 %v4346_v30  ;;  %v4909_v39 = vpop.permute.xlu0 %4908 }
 0x513   : > { %7870 = vmatpush3.msra.mxu0 %v8905_v34  ;;  %4392 = vmatpush1.msra.mxu1 %v4345_v35  ;;  %v9015_v41 = vsel %vm1010_vm5, %v4531_v21, %v9004_v20  ;;  %v7486_v34 = vld [vmem:[%s9549_s1 + $0x170] sm:$0xff]  ;;  %v4914_v2 = vsel %vm1390_vm7, %v8955_v61, %v4909_v39 }
 0x514   : > { %9563 = vst [vmem:[#allocation4_spill] sm:$0xff] %v9015_v41  ;;  %7871 = vmatprep.mubr.msk.f32.mxu0 %vm298_vm1, %v7474_v32  ;;  %7476 = vmatmul.mubr.msk.f32.vlgmr.msra.gmra.mxu1 %vm298_vm1, %v7474_v32 }
 0x515   : > { %7872 = vmatmul.mubr.msk.f32.vlgmr.msra.gmra.mxu0 %vm298_vm1, %v7475_v49  ;;  %4578 = vmatprep.subr.mxu0 %v9015_v41 }
 0x516   : > { %7874 = vmatprep.subr.mxu1 %v9004_v20  ;;  %4579 = vmatpush1.msra.mxu0 %v9021_v46  ;;  %v9027_v6 = vpop.permute.xlu1 %5091  ;;  %v9064_v43 = vpop.permute.xlu0 %5280 }
 0x517   : > { %7875 = vmatpush3.msra.mxu1 %v9004_v20  ;;  %4580 = vmatprep.subr.mxu0 %v9032_v0  ;;  %v5102_v13 = vsel %vm1580_vm8, %v9027_v6, %v8987_v19  ;;  %v5101_v18 = vsel %vm1580_vm8, %v8990_v24, %v9027_v6 }
 0x518   : > { %7876 = vmatprep.subr.mxu1 %v8911_v52  ;;  %4431 = vmatprep.mubr.f32.mxu1 %v9562_v8 }
 0x519   : > { %4581 = vmatpush1.msra.mxu0 %v9042_v45  ;;  %4614 = vmatprep.mubr.f32.mxu0 %v9562_v8 }
 0x51a   : > { %7877 = vmatpush3.msra.mxu1 %v8911_v52  ;;  %7482 = vmatmul.mubr.msk.f32.vlgmr.msra.gmra.mxu0 %vm298_vm1, %v7480_v23  ;;  %v4722_v54 = vpop.permute.xlu1 %4721  ;;  %v5098_v44 = vpop.permute.xlu0 %5097 }
 0x51b   : > { %7477 = vmatmul.mubr.msk.f32.gmra.mxu1 %vm298_vm1, %v7475_v49  ;;  %4620 = vmatprep.mubr.f32.mxu0 %v9562_v8  ;;  %v4726_v50 = vsel %vm1200_vm6, %v4720_v40, %v4722_v54  ;;  %v5103_v28 = vsel %vm1580_vm8, %v8958_v51, %v5098_v44 }
 0x51c   : > { %7878 = vmatprep.mubr.msk.f32.mxu1 %vm298_vm1, %v7480_v23  ;;  %7881 = vmatprep.subr.mxu0 %v4722_v54 }
 0x51d   : > { %4767 = vmatprep.subr.mxu1 %v4726_v50  ;;  %7882 = vmatpush3.msra.mxu0 %v4722_v54 }
 0x51e   : > { %7483 = vmatmul.mubr.msk.f32.gmra.mxu0 %vm298_vm1, %v7481_v42  ;;  %7883 = vmatprep.subr.mxu0 %v8915_v47  ;;  %v4911_v38 = vpop.permute.xlu1 %4910  ;;  %v5287_v16 = vpop.permute.xlu0 %5286 }
 0x51f   : > { %7879 = vmatmul.mubr.msk.f32.vlgmr.msra.gmra.mxu1 %vm298_vm1, %v7481_v42  ;;  %7884 = vmatpush3.msra.mxu0 %v8915_v47  ;;  %v4915_v3 = vsel %vm1390_vm7, %v4909_v39, %v4911_v38  ;;  %v4913_v47 = vsel %vm1390_vm7, %v8926_v1, %v8969_v22  ;;  %v7493_v1 = vld [vmem:[%s9549_s1 + $0x188] sm:$0xff] }
 0x520   : > { %4768 = vmatpush1.msra.mxu1 %v4725_v59  ;;  %4803 = vmatprep.mubr.f32.mxu1 %v9562_v8 }
 0x521   : > { %4769 = vmatprep.subr.mxu1 %v4724_v55  ;;  %7885 = vmatprep.mubr.msk.f32.mxu0 %vm298_vm1, %v7486_v34 }
 0x522   : > { %4770 = vmatpush1.msra.mxu1 %v4723_v56  ;;  %7886 = vmatmul.mubr.msk.f32.vlgmr.msra.gmra.mxu0 %vm298_vm1, %v7487_v48  ;;  %v5285_v63 = vpop.permute.xlu1 %5284  ;;  %v5279_v61 = vpop.permute.xlu0 %5278 }
 0x523   : > { %7488 = vmatmul.mubr.msk.f32.vlgmr.msra.gmra.mxu1 %vm298_vm1, %v7486_v34  ;;  %4956 = vmatprep.subr.mxu0 %v4915_v3  ;;  %v5292_v29 = vsel %vm1770_vm9, %v5285_v63, %v5287_v16  ;;  %v5290_v14 = vsel %vm1770_vm9, %v5279_v61, %v9064_v43 }
 0x524   : > { %7888 = vmatprep.subr.mxu1 %v4911_v38  ;;  %4957 = vmatpush1.msra.mxu0 %v4914_v2 }
 0x525   : > { %7889 = vmatpush3.msra.mxu1 %v4911_v38  ;;  %4958 = vmatprep.subr.mxu0 %v4913_v47 }
 0x526   : > { %7890 = vmatprep.subr.mxu1 %v8969_v22  ;;  %4809 = vmatprep.mubr.f32.mxu1 %v9562_v8  ;;  %v5100_v4 = vpop.permute.xlu1 %5099 }
 0x527   : > { %4959 = vmatpush1.msra.mxu0 %v4912_v5  ;;  %4992 = vmatprep.mubr.f32.mxu0 %v9562_v8  ;;  %v5104_v7 = vsel %vm1580_vm8, %v5098_v44, %v5100_v4 }
 0x528   : > { %7891 = vmatpush3.msra.mxu1 %v8969_v22  ;;  %7494 = vmatmul.mubr.msk.f32.vlgmr.msra.gmra.mxu0 %vm298_vm1, %v7492_v60  ;;  %v7504_v22 = vld [vmem:[%s9549_s1 + $0x1a0] sm:$0xff] }
 0x529   : > { %7489 = vmatmul.mubr.msk.f32.gmra.mxu1 %vm298_vm1, %v7487_v48  ;;  %4998 = vmatprep.mubr.f32.mxu0 %v9562_v8 }
 0x52a   : > { %7892 = vmatprep.mubr.msk.f32.mxu1 %vm298_vm1, %v7492_v60  ;;  %7895 = vmatprep.subr.mxu0 %v5100_v4  ;;  %v5289_v9 = vpop.permute.xlu1 %5288 }
 0x52b   : > { %5145 = vmatprep.subr.mxu1 %v5104_v7  ;;  %7896 = vmatpush3.msra.mxu0 %v5100_v4  ;;  %v5293_v11 = vsel %vm1770_vm9, %v5287_v16, %v5289_v9 }
 0x52c   : > { %7495 = vmatmul.mubr.msk.f32.gmra.mxu0 %vm298_vm1, %v7493_v1  ;;  %7897 = vmatprep.subr.mxu0 %v8987_v19 }
 0x52d   : > { %7893 = vmatmul.mubr.msk.f32.vlgmr.msra.gmra.mxu1 %vm298_vm1, %v7493_v1  ;;  %7898 = vmatpush3.msra.mxu0 %v8987_v19 }
 0x52e   : > { %5146 = vmatpush1.msra.mxu1 %v5103_v28  ;;  %5181 = vmatprep.mubr.f32.mxu1 %v9562_v8  ;;  %v5283_v12 = vpop.permute.xlu1 %5282 }
 0x52f   : > { %5147 = vmatprep.subr.mxu1 %v5102_v13  ;;  %7899 = vmatprep.mubr.msk.f32.mxu0 %vm298_vm1, %v7498_v25  ;;  %v5291_v51 = vsel %vm1770_vm9, %v9064_v43, %v5283_v12 }
 0x530   : > { %5148 = vmatpush1.msra.mxu1 %v5101_v18  ;;  %7900 = vmatmul.mubr.msk.f32.vlgmr.msra.gmra.mxu0 %vm298_vm1, %v7499_v62 }
 0x531   : > { %7500 = vmatmul.mubr.msk.f32.vlgmr.msra.gmra.mxu1 %vm298_vm1, %v7498_v25  ;;  %5334 = vmatprep.subr.mxu0 %v5293_v11 }
 0x532   : > { %7902 = vmatprep.subr.mxu1 %v5289_v9  ;;  %5335 = vmatpush1.msra.mxu0 %v5292_v29 }
 0x533   : > { %7903 = vmatpush3.msra.mxu1 %v5289_v9  ;;  %5187 = vmatprep.mubr.f32.mxu1 %v9562_v8 }
 0x534   : > { %7904 = vmatprep.subr.mxu1 %v5283_v12  ;;  %5336 = vmatprep.subr.mxu0 %v5291_v51 }
 0x535   : > { %7501 = vmatmul.mubr.msk.f32.gmra.mxu1 %vm298_vm1, %v7499_v62  ;;  %5337 = vmatpush1.msra.mxu0 %v5290_v14 }
 0x536   : > { %7905 = vmatpush3.msra.mxu1 %v5283_v12  ;;  %5370 = vmatprep.mubr.f32.mxu0 %v9562_v8 }
 0x537   : > { %7506 = vmatmul.mubr.msk.f32.vlgmr.msra.gmra.mxu0 %vm298_vm1, %v7504_v22  ;;  %7906 = vmatprep.mubr.msk.f32.mxu1 %vm298_vm1, %v7504_v22 }
 0x538   : > { %5376 = vmatprep.mubr.f32.mxu0 %v9562_v8 }
 0x539   : > { %7907 = vmatmul.mubr.msk.f32.vlgmr.msra.gmra.mxu1 %vm298_vm1, %v7505_v57 }
 0x53a   : > { %5639 = vmatprep.mubr.f32.mxu1 %v9562_v8 }
 0x53b   : > { %7507 = vmatmul.mubr.msk.f32.gmra.mxu0 %vm298_vm1, %v7505_v57 }
 0x5b3   : > { %v7852_v10 = vpop.f32.mrf.mxu1 }
 0x5b5   : > { %v3974_v17 = vpop.f32.mrf.mxu1 }
 0x5b7   : > { %v4055_v15 = vpop.f32.mrf.mxu1 }
 0x5b9   : > { %v4057_v53 = vpop.f32.mrf.mxu1 }
 0x5bb   : > { %v4061_v33 = vpop.f32.mrf.mxu1 }
 0x5bd   : > { %v4063_v30 = vpop.f32.mrf.mxu1 }
 0x5c0   : > { %v3897_v21 = vpop.f32.mrf.mxu0 }
 0x5c1   : > { %v4056_v4 = vadd.f32 %v4055_v15, %v3897_v21 }
 0x5c2   : > { %v3899_v26 = vpop.f32.mrf.mxu0  ;;  %v7866_v35 = vpop.f32.mrf.mxu1 }
 0x5c3   : > { %v4058_v13 = vadd.f32 %v4057_v53, %v3899_v26 }
 0x5c4   : > { %v3903_v19 = vpop.f32.mrf.mxu0  ;;  %v4315_v6 = vpop.f32.mrf.mxu1 }
 0x5c5   : > { %v4062_v11 = vadd.f32 %v4061_v33, %v3903_v19 }
 0x5c6   : > { %v3905_v24 = vpop.f32.mrf.mxu0 }
 0x5c7   : > { %v4064_v41 = vadd.f32 %v4063_v30, %v3905_v24 }
 0x5c8   : > { %v7859_v37 = vpop.f32.mrf.mxu0 }
 0x5c9   : > { %v4138_v7 = vadd.f32 %v7859_v37, %v7852_v10 }
 0x5ca   : > { %v4132_v27 = vpop.f32.mrf.mxu0 }
 0x5cb   : > { %v4133_v28 = vadd.f32 %v4132_v27, %v3974_v17  ;;  %v4329_v12 = vadd.f32 %v7866_v35, %v4138_v7 }
 0x5cc   : > { %v4238_v32 = vpop.f32.mrf.mxu0 }
 0x5cd   : > { %v4324_v16 = vadd.f32 %v4238_v32, %v4056_v4  ;;  %v4326_v46 = vadd.f32 %v4315_v6, %v4133_v28 }
 0x5ce   : > { %v4240_v49 = vpop.f32.mrf.mxu0 }
 0x5cf   : > { %v4325_v51 = vadd.f32 %v4240_v49, %v4058_v13 }
 0x5d0   : > { %v4244_v40 = vpop.f32.mrf.mxu0 }
 0x5d1   : > { %v4327_v14 = vadd.f32 %v4244_v40, %v4062_v11 }
 0x5d2   : > { %v4246_v23 = vpop.f32.mrf.mxu0 }
 0x5d3   : > { %v4328_v17 = vadd.f32 %v4246_v23, %v4064_v41 }
 0x5d4   : > { %v4427_v39 = vpop.f32.mrf.mxu1 }
 0x5d5   : > { %v7873_v54 = vpop.f32.mrf.mxu0  ;;  %v4513_v18 = vadd.f32 %v4427_v39, %v4324_v16 }
 0x5d6   : > { %v4429_v42 = vpop.f32.mrf.mxu1  ;;  %v4518_v22 = vadd.f32 %v7873_v54, %v4329_v12 }
 0x5d7   : > { %v4504_v50 = vpop.f32.mrf.mxu0  ;;  %v4514_v15 = vadd.f32 %v4429_v42, %v4325_v51 }
 0x5d8   : > { %v4515_v27 = vadd.f32 %v4504_v50, %v4326_v46 }
 0x5da   : > { %v4616_v38 = vpop.f32.mrf.mxu0 }
 0x5db   : > { %v4433_v34 = vpop.f32.mrf.mxu1  ;;  %v4702_v57 = vadd.f32 %v4616_v38, %v4513_v18 }
 0x5dc   : > { %v4618_v59 = vpop.f32.mrf.mxu0  ;;  %v4516_v37 = vadd.f32 %v4433_v34, %v4327_v14 }
 0x5dd   : > { %v4435_v43 = vpop.f32.mrf.mxu1  ;;  %v4703_v53 = vadd.f32 %v4618_v59, %v4514_v15 }
 0x5de   : > { %v4622_v48 = vpop.f32.mrf.mxu0  ;;  %v4517_v39 = vadd.f32 %v4435_v43, %v4328_v17 }
 0x5df   : > { %v7880_v55 = vpop.f32.mrf.mxu1  ;;  %v4705_v19 = vadd.f32 %v4622_v48, %v4516_v37 }
 0x5e0   : > { %v4624_v3 = vpop.f32.mrf.mxu0  ;;  %v4707_v32 = vadd.f32 %v7880_v55, %v4518_v22 }
 0x5e1   : > { %v4693_v56 = vpop.f32.mrf.mxu1  ;;  %v4706_v7 = vadd.f32 %v4624_v3, %v4517_v39 }
 0x5e2   : > { %v7887_v63 = vpop.f32.mrf.mxu0  ;;  %v4704_v49 = vadd.f32 %v4693_v56, %v4515_v27  ;;  %v5475_v56 = vpop.permute.xlu1 %5474 }
 0x5e3   : > { %v4805_v2 = vpop.f32.mrf.mxu1  ;;  %v4896_v33 = vadd.f32 %v7887_v63, %v4707_v32 }
 0x5e4   : > { %v4882_v47 = vpop.f32.mrf.mxu0  ;;  %v4891_v4 = vadd.f32 %v4805_v2, %v4702_v57  ;;  %v5470_v2 = vpop.permute.xlu0 %5469 }
 0x5e5   : > { %v4807_v44 = vpop.f32.mrf.mxu1  ;;  %v4893_v42 = vadd.f32 %v4882_v47, %v4704_v49 }
 0x5e6   : > { %v4892_v38 = vadd.f32 %v4807_v44, %v4703_v53 }
 0x5e8   : > { %v4994_v60 = vpop.f32.mrf.mxu0 }
 0x5e9   : > { %v4811_v5 = vpop.f32.mrf.mxu1  ;;  %v5080_v35 = vadd.f32 %v4994_v60, %v4891_v4 }
 0x5ea   : > { %v4996_v1 = vpop.f32.mrf.mxu0  ;;  %v4894_v24 = vadd.f32 %v4811_v5, %v4705_v19 }
 0x5eb   : > { %v4813_v9 = vpop.f32.mrf.mxu1  ;;  %v5081_v41 = vadd.f32 %v4996_v1, %v4892_v38 }
 0x5ec   : > { %v5000_v25 = vpop.f32.mrf.mxu0  ;;  %v4895_v59 = vadd.f32 %v4813_v9, %v4706_v7 }
 0x5ed   : > { %v7894_v62 = vpop.f32.mrf.mxu1  ;;  %v5083_v46 = vadd.f32 %v5000_v25, %v4894_v24 }
 0x5ee   : > { %v5002_v29 = vpop.f32.mrf.mxu0  ;;  %v5085_v30 = vadd.f32 %v7894_v62, %v4896_v33 }
 0x5ef   : > { %v5071_v61 = vpop.f32.mrf.mxu1  ;;  %v5084_v28 = vadd.f32 %v5002_v29, %v4895_v59 }
 0x5f0   : > { %v7901_v10 = vpop.f32.mrf.mxu0  ;;  %v5082_v48 = vadd.f32 %v5071_v61, %v4893_v42  ;;  %v7567_v42 = vld [vmem:[%s9550_s2 + $0x38] sm:$0xff] }
 0x5f1   : > { %v5183_v21 = vpop.f32.mrf.mxu1  ;;  %v5274_v23 = vadd.f32 %v7901_v10, %v5085_v30  ;;  %v9205_v30 = vld [vmem:[%s9549_s1 + $0x1c0] sm:$0xff] }
 0x5f2   : > { %v5260_v40 = vpop.f32.mrf.mxu0  ;;  %v5269_v6 = vadd.f32 %v5183_v21, %v5080_v35  ;;  %7913 = vmatprep.mubr.msk.f32.mxu0 %vm298_vm1, %v9205_v30 }
 0x5f3   : > { %v5185_v26 = vpop.f32.mrf.mxu1  ;;  %v5271_v62 = vadd.f32 %v5260_v40, %v5082_v48 }
 0x5f4   : > { %v5270_v60 = vadd.f32 %v5185_v26, %v5081_v41 }
 0x5f5   : > { %v5189_v54 = vpop.f32.mrf.mxu1 }
 0x5f6   : > { %v5272_v16 = vadd.f32 %v5189_v54, %v5083_v46 }
 0x5f7   : > { %v5191_v34 = vpop.f32.mrf.mxu1  ;;  %v5372_v55 = vpop.f32.mrf.mxu0 }
 0x5f8   : > { %v5458_v50 = vadd.f32 %v5372_v55, %v5269_v6  ;;  %v5273_v25 = vadd.f32 %v5191_v34, %v5084_v28  ;;  %v7566_v34 = vld [vmem:[%s9550_s2 + $0x30] sm:$0xff] }
 0x5f9   : > { %v5374_v63 = vpop.f32.mrf.mxu0  ;;  %v7908_v43 = vpop.f32.mrf.mxu1 }
 0x5fa   : > { %v5477_v44 = vadd.f32 %v5470_v2, %v5458_v50  ;;  %v5463_v5 = vadd.f32 %v7908_v43, %v5274_v23  ;;  %v5459_v11 = vadd.f32 %v5374_v63, %v5270_v60 }
 0x5fb   : > { %v5378_v3 = vpop.f32.mrf.mxu0  ;;  %v5449_v47 = vpop.f32.mrf.mxu1 }
 0x5fc   : > { %v5483_v13 = vmax.f32 %v5477_v44, 0.0  ;;  %v5482_v12 = vadd.f32 %v5475_v56, %v5463_v5  ;;  %v5461_v1 = vadd.f32 %v5378_v3, %v5272_v16  ;;  %v5460_v18 = vadd.f32 %v5449_v47, %v5271_v62 }
 0x5fd   : > { %v5380_v51 = vpop.f32.mrf.mxu0  ;;  %v5478_v57 = vadd.f32 %v5470_v2, %v5459_v11 }
 0x5fe   : > { %v5489_v9 = vmul.f32 %v5483_v13, %v8364_v36  ;;  %v5488_v61 = vmax.f32 %v5482_v12, 0.0  ;;  %v5480_v14 = vadd.f32 %v5475_v56, %v5461_v1  ;;  %v5462_v22 = vadd.f32 %v5380_v51, %v5273_v25  ;;  %v7515_v13 = vld [vmem:[%s9549_s1 + $0x1c8] sm:$0xff]  ;;  %v7512_v1 = vld [vmem:[%s9549_s1 + $0x1b0] sm:$0xff]  ;;  %v7513_v51 = vld [vmem:[%s9549_s1 + $0x1b8] sm:$0xff] }
 0x5ff   : > { %v5479_v29 = vadd.f32 %v5470_v2, %v5460_v18  ;;  %v5484_v32 = vmax.f32 %v5478_v57, 0.0  ;;  %v7524_v57 = vld [vmem:[%s9549_s1 + $0x1d0] sm:$0xff] }
 0x600   : > { %v5494_v21 = vmul.f32 %v5488_v61, %v8362_v31  ;;  %v5486_v10 = vmax.f32 %v5480_v14, 0.0  ;;  %5501 = vrot.lane.b32.xlu0 %v5489_v9, %s8013_s25  ;;  %v5481_v15 = vadd.f32 %v5475_v56, %v5462_v22 }
 0x601   : > { %v5485_v17 = vmax.f32 %v5479_v29, 0.0  ;;  %v5490_v26 = vmul.f32 %v5484_v32, %v9561_v58 }
 0x602   : > { %5511 = vrot.lane.b32.xlu1 %v5494_v21, %s8013_s25  ;;  %v5487_v37 = vmax.f32 %v5481_v15, 0.0  ;;  %v5492_v4 = vmul.f32 %v5486_v10, %v8364_v36 }
 0x603   : > { %v5491_v53 = vmul.f32 %v5485_v17, %v8362_v31 }
 0x604   : > { %v5493_v27 = vmul.f32 %v5487_v37, %v9561_v58  ;;  %v7525_v37 = vld [vmem:[%s9549_s1 + $0x1d8] sm:$0xff] }
 0x606   : > { %5507 = vrot.lane.b32.xlu1 %v5492_v4, %s8013_s25  ;;  %5509 = vrot.lane.b32.xlu0 %v5493_v27, %s8013_s25 }
 0x60a   : > { %5503 = vrot.lane.b32.xlu1 %v5490_v26, %s8013_s25  ;;  %5505 = vrot.lane.b32.xlu0 %v5491_v53, %s8013_s25  ;;  %s237_s25 = scalar_lea.vmem %s9553_s5, %s7972_s20 }
 0x672   : > { %v5502_v19 = vpop.permute.xlu0 %5501 }
 0x673   : > { %5523 = vst.msk [vmem:[#allocation3] sm:$0xff] %vm2020_vm10, %v5502_v19 }
 0x674   : > { %v5512_v33 = vpop.permute.xlu1 %5511 }
 0x678   : > { %v5508_v36 = vpop.permute.xlu1 %5507  ;;  %v5510_v35 = vpop.permute.xlu0 %5509 }
 0x679   : > { %5526 = vst.msk [vmem:[#allocation3 + $0x18] sm:$0xff] %vm2020_vm10, %v5508_v36  ;;  %v9163_v39 = vsel %vm2009_vm11, %v5508_v36, %v5510_v35  ;;  %v5516_v49 = vsel %vm2009_vm11, %v5510_v35, %v5512_v33 }
 0x67a   : > { %v9166_v58 = vld [vmem:[#allocation3] sm:$0xff]  ;;  %5528 = vst.msk [vmem:[#allocation3 + $0x28] sm:$0xff] %vm2023_vm12, %v5516_v49  ;;  %v7530_v49 = vld [vmem:[%s9549_s1 + $0x1e0] sm:$0xff] }
 0x67b   : > { %5547 = vrot.lane.b32.xlu0 %v9166_v58, %s8003_s24 }
 0x67c   : > { %v5504_v31 = vpop.permute.xlu1 %5503  ;;  %v5506_v54 = vpop.permute.xlu0 %5505 }
 0x67d   : > { %v9172_v40 = vsel %vm2009_vm11, %v5502_v19, %v5504_v31  ;;  %v5514_v38 = vsel %vm2009_vm11, %v5504_v31, %v5506_v54  ;;  %v7531_v54 = vld [vmem:[%s9549_s1 + $0x1e8] sm:$0xff] }
 0x67e   : > { %5525 = vst.msk [vmem:[#allocation3 + $0x10] sm:$0xff] %vm2023_vm12, %v5514_v38 }
 0x67f   : > { %5888 = vrot.lane.b32.xlu0 %v9166_v58, %s8005_s27 }
 0x680   : > { %v9207_v6 = vld [vmem:[#allocation3 + $0x18] sm:$0xff] }
 0x681   : > { %v9219_v7 = vld [vmem:[#allocation3 + $0x28] sm:$0xff] }
 0x683   : > { %6077 = vrot.lane.b32.xlu0 %v9166_v58, %s8006_s28 }
 0x685   : > { %v9180_v24 = vld [vmem:[#allocation3 + $0x10] sm:$0xff] }
 0x686   : > { %5551 = vrot.lane.b32.xlu1 %v9180_v24, %s8003_s24 }
 0x687   : > { %6266 = vrot.lane.b32.xlu0 %v9166_v58, %s8007_s29 }
 0x68a   : > { %5892 = vrot.lane.b32.xlu1 %v9180_v24, %s8005_s27 }
 0x68b   : > { %6455 = vrot.lane.b32.xlu0 %v9166_v58, %s8008_s30 }
 0x68e   : > { %6081 = vrot.lane.b32.xlu1 %v9180_v24, %s8006_s28 }
 0x68f   : > { %5549 = vrot.lane.b32.xlu0 %v9172_v40, %s8003_s24 }
 0x692   : > { %6270 = vrot.lane.b32.xlu1 %v9180_v24, %s8007_s29 }
 0x693   : > { %5890 = vrot.lane.b32.xlu0 %v9172_v40, %s8005_s27 }
 0x696   : > { %6459 = vrot.lane.b32.xlu1 %v9180_v24, %s8008_s30 }
 0x697   : > { %6079 = vrot.lane.b32.xlu0 %v9172_v40, %s8006_s28 }
 0x69a   : > { %5553 = vrot.lane.b32.xlu1 %v9207_v6, %s8003_s24 }
 0x69b   : > { %6268 = vrot.lane.b32.xlu0 %v9172_v40, %s8007_s29 }
 0x69e   : > { %5894 = vrot.lane.b32.xlu1 %v9207_v6, %s8005_s27 }
 0x69f   : > { %6457 = vrot.lane.b32.xlu0 %v9172_v40, %s8008_s30 }
 0x6a2   : > { %6083 = vrot.lane.b32.xlu1 %v9207_v6, %s8006_s28 }
 0x6a3   : > { %5557 = vrot.lane.b32.xlu0 %v9219_v7, %s8003_s24 }
 0x6a6   : > { %6272 = vrot.lane.b32.xlu1 %v9207_v6, %s8007_s29 }
 0x6a7   : > { %6646 = vrot.lane.b32.xlu0 %v9172_v40, %s8009_s6 }
 0x6aa   : > { %6461 = vrot.lane.b32.xlu1 %v9207_v6, %s8008_s30 }
 0x6ab   : > { %6644 = vrot.lane.b32.xlu0 %v9166_v58, %s8009_s6 }
 0x6ae   : > { %5555 = vrot.lane.b32.xlu1 %v9163_v39, %s8003_s24 }
 0x6af   : > { %5898 = vrot.lane.b32.xlu0 %v9219_v7, %s8005_s27 }
 0x6b2   : > { %6650 = vrot.lane.b32.xlu1 %v9207_v6, %s8009_s6 }
 0x6b3   : > { %6835 = vrot.lane.b32.xlu0 %v9172_v40, %s8010_s7 }
 0x6b6   : > { %6648 = vrot.lane.b32.xlu1 %v9180_v24, %s8009_s6 }
 0x6b7   : > { %6087 = vrot.lane.b32.xlu0 %v9219_v7, %s8006_s28 }
 0x6ba   : > { %5896 = vrot.lane.b32.xlu1 %v9163_v39, %s8005_s27 }
 0x6bb   : > { %6276 = vrot.lane.b32.xlu0 %v9219_v7, %s8007_s29 }
 0x6be   : > { %6839 = vrot.lane.b32.xlu1 %v9207_v6, %s8010_s7 }
 0x6bf   : > { %6833 = vrot.lane.b32.xlu0 %v9166_v58, %s8010_s7 }
 0x6c2   : > { %6085 = vrot.lane.b32.xlu1 %v9163_v39, %s8006_s28 }
 0x6c3   : > { %6465 = vrot.lane.b32.xlu0 %v9219_v7, %s8008_s30 }
 0x6c6   : > { %6274 = vrot.lane.b32.xlu1 %v9163_v39, %s8007_s29 }
 0x6c7   : > { %6654 = vrot.lane.b32.xlu0 %v9219_v7, %s8009_s6 }
 0x6ca   : > { %6837 = vrot.lane.b32.xlu1 %v9180_v24, %s8010_s7 }
 0x6cb   : > { %7024 = vrot.lane.b32.xlu0 %v9172_v40, %s8011_s8 }
 0x6ce   : > { %6463 = vrot.lane.b32.xlu1 %v9163_v39, %s8008_s30 }
 0x6cf   : > { %6843 = vrot.lane.b32.xlu0 %v9219_v7, %s8010_s7 }
 0x6d2   : > { %6652 = vrot.lane.b32.xlu1 %v9163_v39, %s8009_s6 }
 0x6d3   : > { %7032 = vrot.lane.b32.xlu0 %v9219_v7, %s8011_s8 }
 0x6d6   : > { %7028 = vrot.lane.b32.xlu1 %v9207_v6, %s8011_s8 }
 0x6d7   : > { %7022 = vrot.lane.b32.xlu0 %v9166_v58, %s8011_s8 }
 0x6da   : > { %6841 = vrot.lane.b32.xlu1 %v9163_v39, %s8010_s7 }
 0x6db   : > { %7218 = vperm.xlu0 %7993, %v7567_v42  }
 0x6de   : > { %7030 = vrot.lane.b32.xlu1 %v9163_v39, %s8011_s8 }
 0x6e2   : > { %7026 = vrot.lane.b32.xlu1 %v9180_v24, %s8011_s8 }
 0x6e6   : > { %7213 = vperm.xlu1 %7994, %v7566_v34  }
 0x6ed   : > { %v5548_v55 = vpop.permute.xlu0 %5547 }
 0x6f1   : > { %v9289_v2 = vpop.permute.xlu0 %5888 }
 0x6f5   : > { %v9291_v41 = vpop.permute.xlu0 %6077 }
 0x6f8   : > { %v5552_v46 = vpop.permute.xlu1 %5551 }
 0x6f9   : > { %v9293_v23 = vpop.permute.xlu0 %6266 }
 0x6fc   : > { %v9295_v50 = vpop.permute.xlu1 %5892 }
 0x6fd   : > { %v9297_v59 = vpop.permute.xlu0 %6455 }
 0x700   : > { %v9299_v48 = vpop.permute.xlu1 %6081 }
 0x701   : > { %v5550_v63 = vpop.permute.xlu0 %5549 }
 0x702   : > { %v5560_v21 = vsel %vm287_vm2, %v5550_v63, %v5552_v46  ;;  %v5559_v10 = vsel %vm287_vm2, %v5548_v55, %v5550_v63 }
 0x704   : > { %v9301_v43 = vpop.permute.xlu1 %6270 }
 0x705   : > { %v9303_v56 = vpop.permute.xlu0 %5890 }
 0x706   : > { %v5901_v19 = vsel %vm630_vm3, %v9303_v56, %v9295_v50  ;;  %v5900_v33 = vsel %vm630_vm3, %v9289_v2, %v9303_v56  ;;  %v7536_v2 = vld [vmem:[%s9549_s1 + $0x1f0] sm:$0xff] }
 0x708   : > { %v9305_v60 = vpop.permute.xlu1 %6459 }
 0x709   : > { %v9307_v16 = vpop.permute.xlu0 %6079 }
 0x70a   : > { %v6089_v38 = vsel %vm820_vm4, %v9291_v41, %v9307_v16 }
 0x70c   : > { %v5554_v44 = vpop.permute.xlu1 %5553 }
 0x70d   : > { %v9309_v5 = vpop.permute.xlu0 %6268 }
 0x70e   : > { %v6279_v34 = vsel %vm1010_vm5, %v9309_v5, %v9301_v43  ;;  %v6278_v55 = vsel %vm1010_vm5, %v9293_v23, %v9309_v5  ;;  %v7537_v23 = vld [vmem:[%s9549_s1 + $0x1f8] sm:$0xff] }
 0x710   : > { %v5895_v28 = vpop.permute.xlu1 %5894 }
 0x711   : > { %v9311_v62 = vpop.permute.xlu0 %6457 }
 0x712   : > { %v6467_v5 = vsel %vm1200_vm6, %v9297_v59, %v9311_v62 }
 0x714   : > { %v9313_v3 = vpop.permute.xlu1 %6083 }
 0x715   : > { %v5558_v47 = vpop.permute.xlu0 %5557 }
 0x716   : > { %7909 = vmatprep.subr.mxu0 %v5558_v47 }
 0x717   : > { %7910 = vmatpush3.msra.mxu0 %v5558_v47 }
 0x718   : > { %7911 = vmatprep.subr.mxu0 %v5552_v46  ;;  %v9318_v11 = vpop.permute.xlu1 %6272 }
 0x719   : > { %7912 = vmatpush3.msra.mxu0 %v5552_v46  ;;  %v9320_v12 = vpop.permute.xlu0 %6646 }
 0x71a   : > { %5761 = vmatprep.subr.mxu0 %v9163_v39  ;;  %7914 = vmatmul.mubr.msk.f32.vlgmr.msra.gmra.mxu0 %vm298_vm1, %v7515_v13 }
 0x71b   : > { %5762 = vmatpush1.msra.mxu0 %v9207_v6  ;;  %5797 = vmatprep.mubr.f32.mxu0 %v9562_v8 }
 0x71c   : > { %5763 = vmatprep.subr.mxu0 %v9172_v40  ;;  %v9330_v25 = vpop.permute.xlu1 %6461  ;;  %v6090_v40 = vsel %vm820_vm4, %v9307_v16, %v9299_v48  ;;  %v6468_v16 = vsel %vm1200_vm6, %v9311_v62, %v9305_v60 }
 0x71d   : > { %5764 = vmatpush1.msra.mxu0 %v9166_v58  ;;  %v9333_v18 = vpop.permute.xlu0 %6644 }
 0x71e   : > { %7520 = vmatmul.mubr.msk.f32.vlgmr.msra.gmra.mxu0 %vm298_vm1, %v7512_v1  ;;  %v6656_v62 = vsel %vm1390_vm7, %v9333_v18, %v9320_v12 }
 0x71f   : > { %5803 = vmatprep.mubr.f32.mxu0 %v9562_v8 }
 0x720   : > { %v5556_v9 = vpop.permute.xlu1 %5555 }
 0x721   : > { %v5899_v61 = vpop.permute.xlu0 %5898  ;;  %v5561_v14 = vsel %vm287_vm2, %v5554_v44, %v5556_v9  ;;  %v5562_v22 = vsel %vm287_vm2, %v5556_v9, %v5558_v47  ;;  %v7554_v9 = vld [vmem:[%s9549_s1 + $0x220] sm:$0xff] }
 0x722   : > { %7923 = vmatprep.subr.mxu0 %v5899_v61  ;;  %7521 = vmatmul.mubr.msk.f32.gmra.mxu0 %vm298_vm1, %v7513_v51 }
 0x723   : > { %5603 = vmatprep.subr.mxu1 %v5562_v22  ;;  %7924 = vmatpush3.msra.mxu0 %v5899_v61 }
 0x724   : > { %5604 = vmatpush1.msra.mxu1 %v5561_v14  ;;  %7925 = vmatprep.subr.mxu0 %v9295_v50  ;;  %v9349_v29 = vpop.permute.xlu1 %6650 }
 0x725   : > { %5605 = vmatprep.subr.mxu1 %v5560_v21  ;;  %7926 = vmatpush3.msra.mxu0 %v9295_v50  ;;  %v9352_v15 = vpop.permute.xlu0 %6835 }
 0x726   : > { %5606 = vmatpush1.msra.mxu1 %v5559_v10  ;;  %7927 = vmatprep.mubr.msk.f32.mxu0 %vm298_vm1, %v7524_v57 }
 0x727   : > { %7516 = vmatmul.mubr.msk.f32.vlgmr.msra.gmra.mxu1 %vm298_vm1, %v9205_v30  ;;  %7916 = vmatprep.subr.mxu1 %v9219_v7 }
 0x728   : > { %7917 = vmatpush3.msra.mxu1 %v9219_v7  ;;  %5645 = vmatprep.mubr.f32.mxu1 %v9562_v8  ;;  %v9363_v32 = vpop.permute.xlu1 %6648 }
 0x729   : > { %7918 = vmatprep.subr.mxu1 %v9180_v24  ;;  %v6088_v4 = vpop.permute.xlu0 %6087  ;;  %7928 = vmatmul.mubr.msk.f32.vlgmr.msra.gmra.mxu0 %vm298_vm1, %v7525_v37  ;;  %v6657_v59 = vsel %vm1390_vm7, %v9320_v12, %v9363_v32 }
 0x72a   : > { %7919 = vmatpush3.msra.mxu1 %v9180_v24  ;;  %6169 = vmatprep.mubr.f32.mxu0 %v9562_v8 }
 0x72b   : > { %7517 = vmatmul.mubr.msk.f32.gmra.mxu1 %vm298_vm1, %v7515_v13  ;;  %v7548_v13 = vld [vmem:[%s9549_s1 + $0x210] sm:$0xff] }
 0x72c   : > { %7920 = vmatprep.mubr.msk.f32.mxu1 %vm298_vm1, %v7512_v1  ;;  %v5897_v17 = vpop.permute.xlu1 %5896  ;;  %v7549_v1 = vld [vmem:[%s9549_s1 + $0x218] sm:$0xff] }
 0x72d   : > { %v5902_v27 = vsel %vm630_vm3, %v5895_v28, %v5897_v17  ;;  %v6277_v26 = vpop.permute.xlu0 %6276  ;;  %v5903_v53 = vsel %vm630_vm3, %v5897_v17, %v5899_v61  ;;  %v7543_v28 = vld [vmem:[%s9549_s1 + $0x208] sm:$0xff] }
 0x72e   : > { %5944 = vmatprep.subr.mxu1 %v5903_v53 }
 0x72f   : > { %7921 = vmatmul.mubr.msk.f32.vlgmr.msra.gmra.mxu1 %vm298_vm1, %v7513_v51 }
 0x730   : > { %5945 = vmatpush1.msra.mxu1 %v5902_v27  ;;  %5980 = vmatprep.mubr.f32.mxu1 %v9562_v8  ;;  %v9381_v36 = vpop.permute.xlu1 %6839 }
 0x731   : > { %5946 = vmatprep.subr.mxu1 %v5901_v19  ;;  %v9384_v35 = vpop.permute.xlu0 %6833 }
 0x732   : > { %5947 = vmatpush1.msra.mxu1 %v5900_v33  ;;  %v6845_v22 = vsel %vm1580_vm8, %v9384_v35, %v9352_v15 }
 0x733   : > { %7526 = vmatmul.mubr.msk.f32.vlgmr.msra.gmra.mxu1 %vm298_vm1, %v7524_v57  ;;  %7930 = vmatprep.subr.mxu1 %v6088_v4  ;;  %v7555_v57 = vld [vmem:[%s9549_s1 + $0x228] sm:$0xff] }
 0x734   : > { %7931 = vmatpush3.msra.mxu1 %v6088_v4  ;;  %5986 = vmatprep.mubr.f32.mxu1 %v9562_v8  ;;  %v6086_v39 = vpop.permute.xlu1 %6085 }
 0x735   : > { %7932 = vmatprep.subr.mxu1 %v9299_v48  ;;  %v6091_v58 = vsel %vm820_vm4, %v9313_v3, %v6086_v39  ;;  %v6092_v31 = vsel %vm820_vm4, %v6086_v39, %v6088_v4  ;;  %v6466_v30 = vpop.permute.xlu0 %6465  ;;  %v7561_v4 = vld [vmem:[%s9549_s1 + $0x238] sm:$0xff] }
 0x736   : > { %7933 = vmatpush3.msra.mxu1 %v9299_v48  ;;  %6133 = vmatprep.subr.mxu0 %v6092_v31 }
 0x737   : > { %7527 = vmatmul.mubr.msk.f32.gmra.mxu1 %vm298_vm1, %v7525_v37  ;;  %6134 = vmatpush1.msra.mxu0 %v6091_v58  ;;  %v7560_v37 = vld [vmem:[%s9549_s1 + $0x230] sm:$0xff] }
 0x738   : > { %7934 = vmatprep.mubr.msk.f32.mxu1 %vm298_vm1, %v7530_v49  ;;  %v6275_v24 = vpop.permute.xlu1 %6274  ;;  %6135 = vmatprep.subr.mxu0 %v6090_v40 }
 0x739   : > { %v6280_v6 = vsel %vm1010_vm5, %v9318_v11, %v6275_v24  ;;  %6136 = vmatpush1.msra.mxu0 %v6089_v38  ;;  %v6281_v7 = vsel %vm1010_vm5, %v6275_v24, %v6277_v26  ;;  %v6655_v41 = vpop.permute.xlu0 %6654 }
 0x73a   : > { %7532 = vmatmul.mubr.msk.f32.vlgmr.msra.gmra.mxu0 %vm298_vm1, %v7530_v49  ;;  %6322 = vmatprep.subr.mxu1 %v6281_v7 }
 0x73b   : > { %7935 = vmatmul.mubr.msk.f32.vlgmr.msra.gmra.mxu1 %vm298_vm1, %v7531_v54  ;;  %7937 = vmatprep.subr.mxu0 %v6277_v26 }
 0x73c   : > { %6323 = vmatpush1.msra.mxu1 %v6280_v6  ;;  %7938 = vmatpush3.msra.mxu0 %v6277_v26  ;;  %v9411_v42 = vpop.permute.xlu1 %6837 }
 0x73d   : > { %6324 = vmatprep.subr.mxu1 %v6279_v34  ;;  %7939 = vmatprep.subr.mxu0 %v9301_v43  ;;  %v9442_v56 = vpop.permute.xlu0 %7024  ;;  %v6846_v61 = vsel %vm1580_vm8, %v9352_v15, %v9411_v42 }
 0x73e   : > { %6175 = vmatprep.mubr.f32.mxu0 %v9562_v8  ;;  %6325 = vmatpush1.msra.mxu1 %v6278_v55 }
 0x73f   : > { %6358 = vmatprep.mubr.f32.mxu1 %v9562_v8  ;;  %7940 = vmatpush3.msra.mxu0 %v9301_v43  ;;  %v7542_v43 = vld [vmem:[%s9549_s1 + $0x200] sm:$0xff] }
 0x740   : > { %7533 = vmatmul.mubr.msk.f32.gmra.mxu0 %vm298_vm1, %v7531_v54  ;;  %7538 = vmatmul.mubr.msk.f32.vlgmr.msra.gmra.mxu1 %vm298_vm1, %v7536_v2  ;;  %v6464_v46 = vpop.permute.xlu1 %6463 }
 0x741   : > { %7944 = vmatprep.subr.mxu1 %v6466_v30  ;;  %6364 = vmatprep.mubr.f32.mxu1 %v9562_v8  ;;  %v6470_v50 = vsel %vm1200_vm6, %v6464_v46, %v6466_v30  ;;  %v6469_v48 = vsel %vm1200_vm6, %v9330_v25, %v6464_v46  ;;  %v6844_v47 = vpop.permute.xlu0 %6843 }
 0x742   : > { %7945 = vmatpush3.msra.mxu1 %v6466_v30  ;;  %7941 = vmatprep.mubr.msk.f32.mxu0 %vm298_vm1, %v7536_v2 }
 0x743   : > { %7946 = vmatprep.subr.mxu1 %v9305_v60  ;;  %6511 = vmatprep.subr.mxu0 %v6470_v50 }
 0x744   : > { %7947 = vmatpush3.msra.mxu1 %v9305_v60  ;;  %7942 = vmatmul.mubr.msk.f32.vlgmr.msra.gmra.mxu0 %vm298_vm1, %v7537_v23  ;;  %v6653_v63 = vpop.permute.xlu1 %6652 }
 0x745   : > { %7539 = vmatmul.mubr.msk.f32.gmra.mxu1 %vm298_vm1, %v7537_v23  ;;  %6512 = vmatpush1.msra.mxu0 %v6469_v48  ;;  %v6659_v44 = vsel %vm1390_vm7, %v6653_v63, %v6655_v41  ;;  %v6658_v3 = vsel %vm1390_vm7, %v9349_v29, %v6653_v63  ;;  %v7033_v51 = vpop.permute.xlu0 %7032 }
 0x746   : > { %6513 = vmatprep.subr.mxu0 %v6468_v16  ;;  %6547 = vmatprep.mubr.f32.mxu0 %v9562_v8 }
 0x747   : > { %6514 = vmatpush1.msra.mxu0 %v6467_v5  ;;  %7948 = vmatprep.mubr.msk.f32.mxu1 %vm298_vm1, %v7542_v43 }
 0x748   : > { %7544 = vmatmul.mubr.msk.f32.vlgmr.msra.gmra.mxu0 %vm298_vm1, %v7542_v43  ;;  %6700 = vmatprep.subr.mxu1 %v6659_v44  ;;  %v7029_v60 = vpop.permute.xlu1 %7028 }
 0x749   : > { %7949 = vmatmul.mubr.msk.f32.vlgmr.msra.gmra.mxu1 %vm298_vm1, %v7543_v28  ;;  %7951 = vmatprep.subr.mxu0 %v6655_v41  ;;  %v7023_v29 = vpop.permute.xlu0 %7022 }
 0x74a   : > { %6701 = vmatpush1.msra.mxu1 %v6658_v3  ;;  %7952 = vmatpush3.msra.mxu0 %v6655_v41 }
 0x74b   : > { %6702 = vmatprep.subr.mxu1 %v6657_v59  ;;  %7953 = vmatprep.subr.mxu0 %v9363_v32 }
 0x74c   : > { %6553 = vmatprep.mubr.f32.mxu0 %v9562_v8  ;;  %6703 = vmatpush1.msra.mxu1 %v6656_v62  ;;  %v6842_v11 = vpop.permute.xlu1 %6841 }
 0x74d   : > { %6736 = vmatprep.mubr.f32.mxu1 %v9562_v8  ;;  %7954 = vmatpush3.msra.mxu0 %v9363_v32  ;;  %v6848_v12 = vsel %vm1580_vm8, %v6842_v11, %v6844_v47  ;;  %v6847_v25 = vsel %vm1580_vm8, %v9381_v36, %v6842_v11  ;;  %v7034_v32 = vsel %vm1770_vm9, %v7023_v29, %v9442_v56 }
 0x74e   : > { %7545 = vmatmul.mubr.msk.f32.gmra.mxu0 %vm298_vm1, %v7543_v28  ;;  %7550 = vmatmul.mubr.msk.f32.vlgmr.msra.gmra.mxu1 %vm298_vm1, %v7548_v13 }
 0x74f   : > { %7958 = vmatprep.subr.mxu1 %v6844_v47  ;;  %6742 = vmatprep.mubr.f32.mxu1 %v9562_v8 }
 0x750   : > { %7959 = vmatpush3.msra.mxu1 %v6844_v47  ;;  %7955 = vmatprep.mubr.msk.f32.mxu0 %vm298_vm1, %v7548_v13  ;;  %v7031_v18 = vpop.permute.xlu1 %7030 }
 0x751   : > { %7960 = vmatprep.subr.mxu1 %v9411_v42  ;;  %6889 = vmatprep.subr.mxu0 %v6848_v12  ;;  %v7037_v14 = vsel %vm1770_vm9, %v7031_v18, %v7033_v51  ;;  %v7036_v10 = vsel %vm1770_vm9, %v7029_v60, %v7031_v18 }
 0x752   : > { %7961 = vmatpush3.msra.mxu1 %v9411_v42  ;;  %7956 = vmatmul.mubr.msk.f32.vlgmr.msra.gmra.mxu0 %vm298_vm1, %v7549_v1 }
 0x753   : > { %7551 = vmatmul.mubr.msk.f32.gmra.mxu1 %vm298_vm1, %v7549_v1  ;;  %6890 = vmatpush1.msra.mxu0 %v6847_v25 }
 0x754   : > { %6891 = vmatprep.subr.mxu0 %v6846_v61  ;;  %6925 = vmatprep.mubr.f32.mxu0 %v9562_v8  ;;  %v7027_v21 = vpop.permute.xlu1 %7026 }
 0x755   : > { %6892 = vmatpush1.msra.mxu0 %v6845_v22  ;;  %7962 = vmatprep.mubr.msk.f32.mxu1 %vm298_vm1, %v7554_v9  ;;  %v7035_v15 = vsel %vm1770_vm9, %v9442_v56, %v7027_v21 }
 0x756   : > { %7556 = vmatmul.mubr.msk.f32.vlgmr.msra.gmra.mxu0 %vm298_vm1, %v7554_v9  ;;  %7078 = vmatprep.subr.mxu1 %v7037_v14 }
 0x757   : > { %7963 = vmatmul.mubr.msk.f32.vlgmr.msra.gmra.mxu1 %vm298_vm1, %v7555_v57  ;;  %7965 = vmatprep.subr.mxu0 %v7033_v51 }
 0x758   : > { %7079 = vmatpush1.msra.mxu1 %v7036_v10  ;;  %7966 = vmatpush3.msra.mxu0 %v7033_v51 }
 0x759   : > { %6931 = vmatprep.mubr.f32.mxu0 %v9562_v8  ;;  %7967 = vmatprep.subr.mxu0 %v7027_v21 }
 0x75a   : > { %7557 = vmatmul.mubr.msk.f32.gmra.mxu0 %vm298_vm1, %v7555_v57  ;;  %7080 = vmatprep.subr.mxu1 %v7035_v15 }
 0x75b   : > { %7968 = vmatpush3.msra.mxu0 %v7027_v21  ;;  %7081 = vmatpush1.msra.mxu1 %v7034_v32 }
 0x75c   : > { %7114 = vmatprep.mubr.f32.mxu1 %v9562_v8  ;;  %7969 = vmatprep.mubr.msk.f32.mxu0 %vm298_vm1, %v7560_v37 }
 0x75d   : > { %7562 = vmatmul.mubr.msk.f32.vlgmr.msra.gmra.mxu1 %vm298_vm1, %v7560_v37 }
 0x75e   : > { %7970 = vmatmul.mubr.msk.f32.vlgmr.msra.gmra.mxu0 %vm298_vm1, %v7561_v4  ;;  %7120 = vmatprep.mubr.f32.mxu1 %v9562_v8 }
 0x761   : > { %7563 = vmatmul.mubr.msk.f32.gmra.mxu1 %vm298_vm1, %v7561_v4 }
 0x7da   : > { %v7915_v17 = vpop.f32.mrf.mxu0 }
 0x7dc   : > { %v5718_v27 = vpop.f32.mrf.mxu0 }
 0x7de   : > { %v5799_v53 = vpop.f32.mrf.mxu0 }
 0x7e0   : > { %v5801_v36 = vpop.f32.mrf.mxu0 }
 0x7e2   : > { %v5805_v39 = vpop.f32.mrf.mxu0 }
 0x7e4   : > { %v5807_v31 = vpop.f32.mrf.mxu0 }
 0x7e7   : > { %v5641_v26 = vpop.f32.mrf.mxu1 }
 0x7e8   : > { %v5800_v60 = vadd.f32 %v5799_v53, %v5641_v26 }
 0x7e9   : > { %v5643_v19 = vpop.f32.mrf.mxu1  ;;  %v7929_v54 = vpop.f32.mrf.mxu0 }
 0x7ea   : > { %v5802_v13 = vadd.f32 %v5801_v36, %v5643_v19 }
 0x7eb   : > { %v5647_v33 = vpop.f32.mrf.mxu1  ;;  %v6059_v30 = vpop.f32.mrf.mxu0 }
 0x7ec   : > { %v5806_v18 = vadd.f32 %v5805_v39, %v5647_v33 }
 0x7ed   : > { %v5649_v35 = vpop.f32.mrf.mxu1 }
 0x7ee   : > { %v5808_v21 = vadd.f32 %v5807_v31, %v5649_v35 }
 0x7ef   : > { %v7922_v49 = vpop.f32.mrf.mxu1 }
 0x7f0   : > { %v5882_v3 = vadd.f32 %v7922_v49, %v7915_v17 }
 0x7f1   : > { %v5876_v58 = vpop.f32.mrf.mxu1 }
 0x7f2   : > { %v5877_v47 = vadd.f32 %v5876_v58, %v5718_v27  ;;  %v6073_v1 = vadd.f32 %v7929_v54, %v5882_v3 }
 0x7f3   : > { %v5982_v40 = vpop.f32.mrf.mxu1 }
 0x7f4   : > { %v6068_v11 = vadd.f32 %v5982_v40, %v5800_v60  ;;  %v6070_v14 = vadd.f32 %v6059_v30, %v5877_v47 }
 0x7f5   : > { %v5984_v38 = vpop.f32.mrf.mxu1 }
 0x7f6   : > { %v6069_v51 = vadd.f32 %v5984_v38, %v5802_v13 }
 0x7f7   : > { %v5988_v24 = vpop.f32.mrf.mxu1 }
 0x7f8   : > { %v6071_v10 = vadd.f32 %v5988_v24, %v5806_v18 }
 0x7f9   : > { %v5990_v8 = vpop.f32.mrf.mxu1 }
 0x7fa   : > { %v6171_v6 = vpop.f32.mrf.mxu0  ;;  %v6072_v27 = vadd.f32 %v5990_v8, %v5808_v21 }
 0x7fb   : > { %v7936_v7 = vpop.f32.mrf.mxu1  ;;  %v6257_v9 = vadd.f32 %v6171_v6, %v6068_v11 }
 0x7fc   : > { %v6173_v42 = vpop.f32.mrf.mxu0  ;;  %v6262_v22 = vadd.f32 %v7936_v7, %v6073_v1 }
 0x7fd   : > { %v6248_v34 = vpop.f32.mrf.mxu1  ;;  %v6258_v29 = vadd.f32 %v6173_v42, %v6069_v51 }
 0x7fe   : > { %v6259_v32 = vadd.f32 %v6248_v34, %v6070_v14 }
 0x800   : > { %v6177_v55 = vpop.f32.mrf.mxu0  ;;  %v6360_v2 = vpop.f32.mrf.mxu1 }
 0x801   : > { %v6446_v15 = vadd.f32 %v6360_v2, %v6257_v9  ;;  %v6260_v26 = vadd.f32 %v6177_v55, %v6071_v10 }
 0x802   : > { %v6179_v41 = vpop.f32.mrf.mxu0  ;;  %v6362_v46 = vpop.f32.mrf.mxu1 }
 0x803   : > { %v6447_v53 = vadd.f32 %v6362_v46, %v6258_v29  ;;  %v6261_v49 = vadd.f32 %v6179_v41, %v6072_v27 }
 0x804   : > { %v7943_v23 = vpop.f32.mrf.mxu0 }
 0x805   : > { %v6366_v50 = vpop.f32.mrf.mxu1  ;;  %v6451_v4 = vadd.f32 %v7943_v23, %v6262_v22 }
 0x806   : > { %v6437_v48 = vpop.f32.mrf.mxu0  ;;  %v6449_v58 = vadd.f32 %v6366_v50, %v6260_v26  ;;  %v7214_v50 = vpop.permute.xlu1 %7213 }
 0x807   : > { %v6368_v63 = vpop.f32.mrf.mxu1  ;;  %v6448_v33 = vadd.f32 %v6437_v48, %v6259_v32  ;;  %v9566_v32 = vld [vmem:[#allocation4_spill] sm:$0xff] }
 0x808   : > { %v6549_v43 = vpop.f32.mrf.mxu0  ;;  %v6450_v30 = vadd.f32 %v6368_v63, %v6261_v49 }
 0x809   : > { %v7950_v56 = vpop.f32.mrf.mxu1  ;;  %v6635_v19 = vadd.f32 %v6549_v43, %v6446_v15 }
 0x80a   : > { %v6551_v16 = vpop.f32.mrf.mxu0  ;;  %v6640_v39 = vadd.f32 %v7950_v56, %v6451_v4 }
 0x80b   : > { %v6626_v44 = vpop.f32.mrf.mxu1  ;;  %v6636_v40 = vadd.f32 %v6551_v16, %v6447_v53 }
 0x80c   : > { %v6637_v35 = vadd.f32 %v6626_v44, %v6448_v33 }
 0x80e   : > { %v6555_v5 = vpop.f32.mrf.mxu0  ;;  %v6738_v28 = vpop.f32.mrf.mxu1 }
 0x80f   : > { %v6824_v54 = vadd.f32 %v6738_v28, %v6635_v19  ;;  %v6638_v6 = vadd.f32 %v6555_v5, %v6449_v58  ;;  %v7219_v28 = vpop.permute.xlu0 %7218 }
 0x810   : > { %v6557_v59 = vpop.f32.mrf.mxu0  ;;  %v6740_v62 = vpop.f32.mrf.mxu1 }
 0x811   : > { %v6825_v7 = vadd.f32 %v6740_v62, %v6636_v40  ;;  %v6639_v46 = vadd.f32 %v6557_v59, %v6450_v30 }
 0x812   : > { %v7957_v12 = vpop.f32.mrf.mxu0 }
 0x813   : > { %v6744_v25 = vpop.f32.mrf.mxu1  ;;  %v6829_v31 = vadd.f32 %v7957_v12, %v6640_v39 }
 0x814   : > { %v6815_v61 = vpop.f32.mrf.mxu0  ;;  %v6827_v23 = vadd.f32 %v6744_v25, %v6638_v6 }
 0x815   : > { %v6746_v57 = vpop.f32.mrf.mxu1  ;;  %v6826_v8 = vadd.f32 %v6815_v61, %v6637_v35 }
 0x816   : > { %v6927_v37 = vpop.f32.mrf.mxu0  ;;  %v6828_v3 = vadd.f32 %v6746_v57, %v6639_v46 }
 0x817   : > { %v7964_v17 = vpop.f32.mrf.mxu1  ;;  %v7013_v42 = vadd.f32 %v6927_v37, %v6824_v54 }
 0x818   : > { %v6929_v36 = vpop.f32.mrf.mxu0  ;;  %v7018_v55 = vadd.f32 %v7964_v17, %v6829_v31 }
 0x819   : > { %v7004_v24 = vpop.f32.mrf.mxu1  ;;  %v7014_v48 = vadd.f32 %v6929_v36, %v6825_v7 }
 0x81a   : > { %v6933_v38 = vpop.f32.mrf.mxu0  ;;  %v7015_v56 = vadd.f32 %v7004_v24, %v6826_v8 }
 0x81b   : > { %v7016_v63 = vadd.f32 %v6933_v38, %v6827_v23 }
 0x81c   : > { %v6935_v34 = vpop.f32.mrf.mxu0 }
 0x81d   : > { %v7116_v2 = vpop.f32.mrf.mxu1  ;;  %v7017_v11 = vadd.f32 %v6935_v34, %v6828_v3 }
 0x81e   : > { %v7202_v43 = vadd.f32 %v7116_v2, %v7013_v42  ;;  %v7971_v41 = vpop.f32.mrf.mxu0 }
 0x81f   : > { %v7118_v16 = vpop.f32.mrf.mxu1  ;;  %v7207_v44 = vadd.f32 %v7971_v41, %v7018_v55 }
 0x820   : > { %v7221_v5 = vadd.f32 %v7214_v50, %v7202_v43  ;;  %v7203_v60 = vadd.f32 %v7118_v16, %v7014_v48  ;;  %v7193_v62 = vpop.f32.mrf.mxu0 }
 0x821   : > { %v7226_v47 = vadd.f32 %v7219_v28, %v7207_v44  ;;  %v7122_v13 = vpop.f32.mrf.mxu1  ;;  %v7204_v59 = vadd.f32 %v7193_v62, %v7015_v56 }
 0x822   : > { %v7227_v12 = vadd.f32 %v7221_v5, %v9042_v45  ;;  %v7222_v1 = vadd.f32 %v7214_v50, %v7203_v60  ;;  %v7205_v25 = vadd.f32 %v7122_v13, %v7016_v63 }
 0x823   : > { %v7232_v18 = vadd.f32 %v7226_v47, %v9004_v20  ;;  %v7223_v51 = vadd.f32 %v7214_v50, %v7204_v59  ;;  %v7124_v9 = vpop.f32.mrf.mxu1  ;;  %v9565_v20 = vld [vmem:[#allocation5_spill] sm:$0xff] }
 0x824   : > { %7568 = vst [vmem:[%s8738_s12 + $0x30] sm:$0xff] %v7227_v12  ;;  %v7240_v61 = vmax.f32 %v7227_v12, 0.0  ;;  %v7228_v14 = vadd.f32 %v7222_v1, %v9032_v0  ;;  %v7224_v22 = vadd.f32 %v7219_v28, %v7205_v25  ;;  %v7206_v45 = vadd.f32 %v7124_v9, %v7017_v11 }
 0x825   : > { %7573 = vst.msk [vmem:[%s8738_s12 + $0x58] sm:$0xff] %vm3734_vm13, %v7232_v18  ;;  %v7245_v57 = vmax.f32 %v7232_v18, 0.0  ;;  %v7229_v21 = vadd.f32 %v7223_v51, %v8911_v52 }
 0x826   : > { %7246 = vst [vmem:[%s237_s25] sm:$0xff] %v7240_v61  ;;  %7569 = vst [vmem:[%s8738_s12 + $0x38] sm:$0xff] %v7228_v14  ;;  %v7241_v10 = vmax.f32 %v7228_v14, 0.0  ;;  %v7230_v29 = vadd.f32 %v7224_v22, %v9565_v20  ;;  %v7225_v15 = vadd.f32 %v7219_v28, %v7206_v45 }
 0x827   : > { %7251 = vst.msk [vmem:[%s237_s25 + $0x28] sm:$0xff] %vm3734_vm13, %v7245_v57  ;;  %7570 = vst.msk [vmem:[%s8738_s12 + $0x40] sm:$0xff] %vm3734_vm13, %v7229_v21  ;;  %v7242_v37 = vmax.f32 %v7229_v21, 0.0 }
 0x828   : > { %7247 = vst [vmem:[%s237_s25 + $0x8] sm:$0xff] %v7241_v10  ;;  %7571 = vst [vmem:[%s8738_s12 + $0x48] sm:$0xff] %v7230_v29  ;;  %v7243_v0 = vmax.f32 %v7230_v29, 0.0  ;;  %v7231_v4 = vadd.f32 %v7225_v15, %v9566_v32 }
 0x829   : > { %7248 = vst.msk [vmem:[%s237_s25 + $0x10] sm:$0xff] %vm3734_vm13, %v7242_v37 }
 0x82a   : > { %7249 = vst [vmem:[%s237_s25 + $0x18] sm:$0xff] %v7243_v0  ;;  %7572 = vst [vmem:[%s8738_s12 + $0x50] sm:$0xff] %v7231_v4  ;;  %v7244_v52 = vmax.f32 %v7231_v4, 0.0 }
 0x82c   : > { %7250 = vst [vmem:[%s237_s25 + $0x20] sm:$0xff] %v7244_v52 }
 0x82d PF: > { %s16_s18 = sadd.s32 1, %s8001_s18  }
 0x82e   : > { %p13_p4 = scmp.ge.s32.totalorder %s16_s18, 4  }
 0x830   :  { %15 = sbr.rel (!%p13_p4) target bundleno = 1 (0x1), region = 117 }

</bundles_post_ra>
